<compile_context>
chip_gen: v5e
topology: v5e:2x2
jax: 0.10.0
libtpu: 0.0.40
codegen_flags: <defaults>
</compile_context>

<pallas_src>
import functools

import jax
import jax.numpy as jnp
from jax import lax
from jax.experimental import pallas as pl
from jax.experimental.pallas import tpu as pltpu

LANE = 128


# ----------------------------------------------------------------------------
# Small helpers
# ----------------------------------------------------------------------------
def _rup(n, m=LANE):
    return ((n + m - 1) // m) * m


def _pad2(x, rows, cols):
    r, c = x.shape
    return jnp.pad(x, ((0, rows - r), (0, cols - c)))


def _gate_cat_t(w, in_pad, h_pad):
    """PyTorch GRU weight (3H, In) -> (In_pad, 3*H_pad).

    Per-gate transpose + zero-pad; gates (r|z|n) are concatenated along lanes
    so every gate chunk starts on a 128-aligned lane boundary (one fused MXU
    matmul per step, static aligned gate slices)."""
    three_h, _ = w.shape
    h = three_h // 3
    parts = [_pad2(jnp.transpose(w[g * h:(g + 1) * h, :]), in_pad, h_pad)
             for g in range(3)]
    return jnp.concatenate(parts, axis=1)


def _gate_cat_b(b, h_pad):
    h = b.shape[0] // 3
    parts = [jnp.pad(b[g * h:(g + 1) * h], (0, h_pad - h)) for g in range(3)]
    return jnp.concatenate(parts).reshape(1, 3 * h_pad)


def _pick_tile(dim, pref, align):
    if dim <= pref:
        return dim
    t = (pref // align) * align
    while t >= align:
        if dim % t == 0:
            return t
        t -= align
    return dim


# ----------------------------------------------------------------------------
# Shared affine kernel:  o = x @ w + b   (w already transposed / padded)
# ----------------------------------------------------------------------------
def _affine_kernel(x_ref, w_ref, b_ref, o_ref):
    o_ref[...] = (
        jnp.dot(x_ref[...], w_ref[...], preferred_element_type=jnp.float32)
        + b_ref[...]
    )


def input_projection(x, w_units, b_units, *, tm_max=256):
    """Hoisted GRU input projections for all 6 GRUs in one pallas_call.

    x: (M, E_pad) bf16, w_units: (6, E_pad, 3H_pad) bf16, b_units: (6, 1, 3H_pad) f32.
    The output is written directly in (unit, M, 3H_pad) layout via the out_spec
    index map, so no XLA-side transpose of the largest intermediate is needed.
    """
    M, E = x.shape
    U, _, threeH = w_units.shape
    tm = _pick_tile(M, tm_max, 8)
    return pl.pallas_call(
        _affine_kernel,
        out_shape=jax.ShapeDtypeStruct((U, M, threeH), jnp.float32),
        grid=(M // tm, U),  # x block stays resident across the unit axis
        in_specs=[
            pl.BlockSpec((tm, E), lambda i, j: (i, 0)),
            pl.BlockSpec((None, E, threeH), lambda i, j: (j, 0, 0)),
            pl.BlockSpec((None, 1, threeH), lambda i, j: (j, 0, 0)),
        ],
        out_specs=pl.BlockSpec((None, tm, threeH), lambda i, j: (j, i, 0)),
        compiler_params=pltpu.CompilerParams(
            dimension_semantics=("parallel", "parallel")),
    )(x, w_units, b_units)


def linear(x, w_t, b_row, *, tm_max=512, tn_max=1024):
    """Tiled affine: x (M,K) @ w_t (K,N) + b (1,N) -> (M,N) f32 (bf16 MXU operands).

    TODO(synk): add a K grid axis ('arbitrary' + f32 acc scratch) if K grows
    beyond what full-K blocks allow under v7x's 64 MiB VMEM.
    """
    M, K = x.shape
    N = w_t.shape[1]
    tm = _pick_tile(M, tm_max, 8)
    tn = _pick_tile(N, tn_max, 128)
    return pl.pallas_call(
        _affine_kernel,
        out_shape=jax.ShapeDtypeStruct((M, N), jnp.float32),
        grid=(M // tm, N // tn),
        in_specs=[
            pl.BlockSpec((tm, K), lambda i, j: (i, 0)),
            pl.BlockSpec((K, tn), lambda i, j: (0, j)),
            pl.BlockSpec((1, tn), lambda i, j: (0, j)),
        ],
        out_specs=pl.BlockSpec((tm, tn), lambda i, j: (i, j)),
        compiler_params=pltpu.CompilerParams(
            dimension_semantics=("parallel", "parallel")),
    )(x, w_t, b_row)


# ----------------------------------------------------------------------------
# Fused bidirectional encoder kernel (per grid step: one encoder, both
# directions, last-position gather via scalar-prefetched lens, hidden2latent).
# ----------------------------------------------------------------------------
def _encoder_kernel(lens_ref, gi_ref, whh_ref, bhh_ref, wh2l_ref, bh2l_ref,
                    out_ref, lastf_ref, lastb_ref):
    # gi_ref:   (2*S, N, 3H)  row d*S + s  (d = direction, s = step)
    # whh_ref:  (2, H, 3H), bhh_ref: (2, 1, 3H)   -- gates fused on lanes
    # wh2l_ref: (2, H, L) (fwd / bwd halves of hidden2latent), bh2l_ref: (1, L)
    # out_ref:  (S, L);  lastf_ref / lastb_ref: (S, H) VMEM scratch.
    two_s, N, threeH = gi_ref.shape
    S = two_s // 2
    H = threeH // 3

    col_iota = lax.broadcasted_iota(jnp.int32, (N, H), 0)

    def gru_cell(h, gi, d):
        gh = jnp.dot(h, whh_ref[d], preferred_element_type=jnp.float32) + bhh_ref[d]
        rz = jax.nn.sigmoid(gi[:, :2 * H] + gh[:, :2 * H])
        r = rz[:, :H]
        z = rz[:, H:]
        n = jnp.tanh(gi[:, 2 * H:] + r * gh[:, 2 * H:])
        return (1.0 - z) * n + z * h

    def pick(h, col):
        # row `col` of h as (1, H): mask + sublane reduce (no value relayout).
        return jnp.sum(jnp.where(col_iota == col, h, 0.0), axis=0, keepdims=True)

    def body(t, carry):
        h_f, h_b = carry
        sb = S - 1 - t
        # forward direction, sequence position t
        h_f = gru_cell(h_f, gi_ref[t], 0)
        lastf_ref[pl.ds(t, 1), :] = pick(h_f, lens_ref[t] - 1)
        # backward direction, sequence position sb (processed back-to-front)
        h_b = gru_cell(h_b, gi_ref[S + sb], 1)
        lastb_ref[pl.ds(sb, 1), :] = pick(h_b, lens_ref[sb] - 1)
        return h_f, h_b

    h0 = jnp.zeros((N, H), jnp.float32)
    lax.fori_loop(0, S, body, (h0, h0))

    # hidden2latent(concat([fwd, bwd], -1)) == fwd @ W_f + bwd @ W_b + b
    out_ref[...] = (
        jnp.dot(lastf_ref[...], wh2l_ref[0], preferred_element_type=jnp.float32)
        + jnp.dot(lastb_ref[...], wh2l_ref[1], preferred_element_type=jnp.float32)
        + bh2l_ref[...]
    )


def encoder_call(review_lens, gi_enc, whh_enc, bhh_enc, wh2l, bh2l):
    _, two_s, N, threeH = gi_enc.shape
    S = two_s // 2
    H = threeH // 3
    L = wh2l.shape[-1]
    return pl.pallas_call(
        _encoder_kernel,
        out_shape=jax.ShapeDtypeStruct((2, S, L), jnp.float32),
        grid_spec=pltpu.PrefetchScalarGridSpec(
            num_scalar_prefetch=1,
            grid=(2,),  # user / item encoder; sharded across the 2 TCs on v7x
            in_specs=[
                pl.BlockSpec((None, two_s, N, threeH), lambda e, lens: (e, 0, 0, 0)),
                pl.BlockSpec((None, 2, H, threeH), lambda e, lens: (e, 0, 0, 0)),
                pl.BlockSpec((None, 2, 1, threeH), lambda e, lens: (e, 0, 0, 0)),
                pl.BlockSpec((None, 2, H, L), lambda e, lens: (e, 0, 0, 0)),
                pl.BlockSpec((None, 1, L), lambda e, lens: (e, 0, 0)),
            ],
            out_specs=pl.BlockSpec((None, S, L), lambda e, lens: (e, 0, 0)),
            scratch_shapes=[pltpu.VMEM((S, H), jnp.float32),
                            pltpu.VMEM((S, H), jnp.float32)],
        ),
        compiler_params=pltpu.CompilerParams(dimension_semantics=("parallel",)),
    )(review_lens, gi_enc, whh_enc, bhh_enc, wh2l, bh2l)


# ----------------------------------------------------------------------------
# Fused decoder kernel (per grid step: one decoder).  VQ of the user latent,
# tanh, latent2output and the W_ih projection of de_hidden are all in-kernel.
# ----------------------------------------------------------------------------
def _decoder_kernel(gi_ref, lat_ref, cb_ref, wl2o_ref, bl2o_ref, wih_ref,
                    whh_ref, bhh_ref, o_ref, diff_ref, ge_ref,
                    *, n_clusters, n_latent, commitment):
    # gi_ref:  (S, N, 3H)  precomputed emb @ W_ih^T + b_ih (gates fused on lanes)
    # lat_ref: (S, L)      user latent (d=0) or item latent (d=1)
    # cb_ref:  (L, K_pad)  VQ codebook (zero-padded)
    # wl2o_ref:(L, E), bl2o_ref:(1, E), wih_ref:(E, 3H), whh_ref:(H, 3H), bhh_ref:(1, 3H)
    # o_ref:   (S, N, H);  diff_ref: (8, 128);  ge_ref: (S, 3H) VMEM scratch.
    S, N, threeH = gi_ref.shape
    H = threeH // 3
    d = pl.program_id(0)

    lat = lat_ref[...]

    # ---- vector quantization (meaningful for d == 0; cheap, selected below) --
    e = cb_ref[...]
    K = e.shape[1]
    h_sum = jnp.sum(lat * lat, axis=1, keepdims=True)
    e_sum = jnp.sum(e * e, axis=0, keepdims=True)
    dist = h_sum - 2.0 * jnp.dot(lat, e, preferred_element_type=jnp.float32) + e_sum
    k_iota = lax.broadcasted_iota(jnp.int32, (S, K), 1)
    dist = jnp.where(k_iota < n_clusters, dist, jnp.float32(1e30))  # mask padded codes
    min_d = jnp.min(dist, axis=1, keepdims=True)
    idx = jnp.min(jnp.where(dist == min_d, k_iota, K), axis=1, keepdims=True)
    onehot = (k_iota == idx).astype(jnp.float32)
    quantize = lax.dot_general(onehot, e, (((1,), (1,)), ((), ())),
                               preferred_element_type=jnp.float32)   # (S, L)
    dd = lat - quantize
    mse = jnp.sum(dd * dd) / (S * n_latent)   # padded lanes are zero in both
    diff_ref[...] = jnp.broadcast_to(commitment * mse, diff_ref.shape)

    lat_used = jnp.where(d == 0, quantize, lat)  # user decoder consumes the quantized latent

    # ---- decoder prologue: tanh -> latent2output -> fused W_ih projection ----
    deh = jnp.tanh(lat_used)                                                       # (S, L)
    deh = jnp.dot(deh, wl2o_ref[...], preferred_element_type=jnp.float32) + bl2o_ref[...]  # (S, E)
    ge_ref[...] = jnp.dot(deh, wih_ref[...], preferred_element_type=jnp.float32)   # (S, 3H)

    # ---- GRU recurrence (seq axis = S, batch axis = N; batch_first=False port) --
    def body(s, h):
        gi = gi_ref[s] + ge_ref[pl.ds(s, 1), :]
        gh = jnp.dot(h, whh_ref[...], preferred_element_type=jnp.float32) + bhh_ref[...]
        rz = jax.nn.sigmoid(gi[:, :2 * H] + gh[:, :2 * H])
        r = rz[:, :H]
        z = rz[:, H:]
        n = jnp.tanh(gi[:, 2 * H:] + r * gh[:, 2 * H:])
        h = (1.0 - z) * n + z * h
        o_ref[s] = h          # lane-dense (H padded to 128): unmasked store
        return h

    lax.fori_loop(0, S, body, jnp.zeros((N, H), jnp.float32))


def decoder_call(gi_dec, latents, codebook, wl2o, bl2o, wih, whh, bhh,
                 *, n_clusters, n_latent, commitment):
    _, S, N, threeH = gi_dec.shape
    H = threeH // 3
    L = latents.shape[2]
    E = wl2o.shape[2]
    K = codebook.shape[1]
    kernel = functools.partial(_decoder_kernel, n_clusters=n_clusters,
                               n_latent=n_latent, commitment=commitment)
    return pl.pallas_call(
        kernel,
        out_shape=(
            jax.ShapeDtypeStruct((2, S, N, H), jnp.float32),
            jax.ShapeDtypeStruct((2, 8, LANE), jnp.float32),
        ),
        grid=(2,),  # user / item decoder; sharded across the 2 TCs on v7x
        in_specs=[
            pl.BlockSpec((None, S, N, threeH), lambda d: (d, 0, 0, 0)),
            pl.BlockSpec((None, S, L), lambda d: (d, 0, 0)),
            pl.BlockSpec((L, K), lambda d: (0, 0)),
            pl.BlockSpec((None, L, E), lambda d: (d, 0, 0)),
            pl.BlockSpec((None, 1, E), lambda d: (d, 0, 0)),
            pl.BlockSpec((None, E, threeH), lambda d: (d, 0, 0)),
            pl.BlockSpec((None, H, threeH), lambda d: (d, 0, 0)),
            pl.BlockSpec((None, 1, threeH), lambda d: (d, 0, 0)),
        ],
        out_specs=(
            pl.BlockSpec((None, S, N, H), lambda d: (d, 0, 0, 0)),
            pl.BlockSpec((None, 8, LANE), lambda d: (d, 0, 0)),
        ),
        scratch_shapes=[pltpu.VMEM((S, threeH), jnp.float32)],
        compiler_params=pltpu.CompilerParams(dimension_semantics=("parallel",)),
    )(gi_dec, latents, codebook, wl2o, bl2o, wih, whh, bhh)


# ----------------------------------------------------------------------------
# Parameter preparation: transpose, gate-fuse, lane-pad to 128 -- done once.
# ----------------------------------------------------------------------------
def prepare_params(raw):
    ue, ie = raw["user_encoder"], raw["item_encoder"]
    ud, idd = raw["user_decoder"], raw["item_decoder"]
    H = ue["w_hh_f"].shape[1]
    E = raw["embedding"].shape[1]
    L = ue["w_h2l"].shape[0]
    V = raw["w_o2v"].shape[0]
    K = raw["user_embedding"].shape[1]
    Hp, Ep, Lp, Vp, Kp = _rup(H), _rup(E), _rup(L), _rup(V), _rup(K)

    # Hoisted input projection: 6 units x (E_pad, 3H_pad), bf16 MXU operands.
    units_w = [ue["w_ih_f"], ue["w_ih_b"], ie["w_ih_f"], ie["w_ih_b"],
               ud["w_ih"], idd["w_ih"]]
    units_b = [ue["b_ih_f"], ue["b_ih_b"], ie["b_ih_f"], ie["b_ih_b"],
               ud["b_ih"], idd["b_ih"]]
    w_proj = jnp.stack([_gate_cat_t(w, Ep, Hp) for w in units_w]).astype(jnp.bfloat16)
    b_proj = jnp.stack([_gate_cat_b(b, Hp) for b in units_b])

    # Encoders: gate-fused hidden-to-hidden weights per direction (f32 recurrence).
    whh_enc = jnp.stack([
        jnp.stack([_gate_cat_t(ue["w_hh_f"], Hp, Hp), _gate_cat_t(ue["w_hh_b"], Hp, Hp)]),
        jnp.stack([_gate_cat_t(ie["w_hh_f"], Hp, Hp), _gate_cat_t(ie["w_hh_b"], Hp, Hp)]),
    ])                                                                    # (2, 2, Hp, 3Hp)
    bhh_enc = jnp.stack([
        jnp.stack([_gate_cat_b(ue["b_hh_f"], Hp), _gate_cat_b(ue["b_hh_b"], Hp)]),
        jnp.stack([_gate_cat_b(ie["b_hh_f"], Hp), _gate_cat_b(ie["b_hh_b"], Hp)]),
    ])                                                                    # (2, 2, 1, 3Hp)

    def h2l(enc):
        wt = jnp.transpose(enc["w_h2l"])                    # (2H, L): rows [:H]=fwd, [H:]=bwd
        return jnp.stack([_pad2(wt[:H], Hp, Lp), _pad2(wt[H:], Hp, Lp)])
    wh2l = jnp.stack([h2l(ue), h2l(ie)])                                  # (2, 2, Hp, Lp)
    bh2l = jnp.stack([jnp.pad(ue["b_h2l"], (0, Lp - L)).reshape(1, Lp),
                      jnp.pad(ie["b_h2l"], (0, Lp - L)).reshape(1, Lp)])  # (2, 1, Lp)

    # Decoders.
    wl2o = jnp.stack([_pad2(jnp.transpose(ud["w_l2o"]), Lp, Ep),
                      _pad2(jnp.transpose(idd["w_l2o"]), Lp, Ep)])        # (2, Lp, Ep)
    bl2o = jnp.stack([jnp.pad(ud["b_l2o"], (0, Ep - E)).reshape(1, Ep),
                      jnp.pad(idd["b_l2o"], (0, Ep - E)).reshape(1, Ep)])  # (2, 1, Ep)
    wih_dec = jnp.stack([_gate_cat_t(ud["w_ih"], Ep, Hp),
                         _gate_cat_t(idd["w_ih"], Ep, Hp)])               # (2, Ep, 3Hp)
    whh_dec = jnp.stack([_gate_cat_t(ud["w_hh"], Hp, Hp),
                         _gate_cat_t(idd["w_hh"], Hp, Hp)])               # (2, Hp, 3Hp)
    bhh_dec = jnp.stack([_gate_cat_b(ud["b_hh"], Hp),
                         _gate_cat_b(idd["b_hh"], Hp)])                   # (2, 1, 3Hp)

    params = dict(
        embedding=jnp.pad(raw["embedding"], ((0, 0), (0, Ep - E))).astype(jnp.bfloat16),
        codebook=_pad2(raw["user_embedding"], Lp, Kp),
        w_proj=w_proj, b_proj=b_proj,
        whh_enc=whh_enc, bhh_enc=bhh_enc, wh2l=wh2l, bh2l=bh2l,
        wl2o=wl2o, bl2o=bl2o, wih_dec=wih_dec, whh_dec=whh_dec, bhh_dec=bhh_dec,
        w_o2v_t=_pad2(jnp.transpose(raw["w_o2v"]), Hp, Vp).astype(jnp.bfloat16),
        b_o2v=jnp.pad(raw["b_o2v"], (0, Vp - V)).reshape(1, Vp),
    )
    cfg = dict(n_vocab=V, n_latent=L, n_clusters=K)   # static Python ints (kept out of jit args)
    return params, cfg


# ----------------------------------------------------------------------------
# _ENC_NETWORK forward (eval mode: dropout = identity)
# ----------------------------------------------------------------------------
def enc_network_forward(p, reviews, review_lens, user_ids, item_ids, *, cfg, commitment):
    del user_ids, item_ids   # unused by the PyTorch forward as well
    B, T = reviews.shape
    Hp = p["whh_dec"].shape[1]
    S, N = B, T  # nn.GRU default batch_first=False: seq axis = B, batch axis = T

    # Shared embedding gather (bf16, lane-padded E), done once for all GRUs.
    emb = jnp.take(p["embedding"], reviews, axis=0)                   # (B, T, Ep) bf16

    # Hoisted input projections for all six GRUs: one bf16 MXU matmul, written
    # directly in (unit, S*N, 3H) layout (no XLA-side transpose).
    gi = input_projection(emb.reshape(B * T, -1), p["w_proj"], p["b_proj"])
    gi = gi.reshape(6, S, N, 3 * Hp)
    gi_enc = gi[:4].reshape(2, 2 * S, N, 3 * Hp)    # (encoder, dir*S + step, N, 3H)
    gi_dec = gi[4:]                                 # (decoder, step, N, 3H)
    # TODO(synk): for very long S*N, move the step axis onto an 'arbitrary' grid
    # dimension and stream gi per step (v7x 64 MiB VMEM budget).

    # Fused bidirectional encoders (+ last-position gather + hidden2latent).
    en_latent = encoder_call(review_lens, gi_enc, p["whh_enc"], p["bhh_enc"],
                             p["wh2l"], p["bh2l"])                    # (2, B, Lp)

    # Fused decoders; VQ of the user latent + commitment MSE fused into d == 0.
    dec_out, diff = decoder_call(
        gi_dec, en_latent, p["codebook"], p["wl2o"], p["bl2o"],
        p["wih_dec"], p["whh_dec"], p["bhh_dec"],
        n_clusters=cfg["n_clusters"], n_latent=cfg["n_latent"],
        commitment=commitment)                                        # (2,B,T,Hp), (2,8,128)
    # TODO(synk): training-mode EMA codebook update (in-place mutation of
    # m_cluster_size / m_avg_user_embedding / m_user_embedding) not implemented;
    # this is the eval-mode forward path.

    # Single fused output2vocab matmul for both decoders (bf16 MXU operands).
    logits = linear(dec_out.reshape(2 * B * T, Hp).astype(jnp.bfloat16),
                    p["w_o2v_t"], p["b_o2v"])                         # (2BT, Vp)
    logits = logits[:, :cfg["n_vocab"]]
    user_logits = logits[:B * T]
    item_logits = logits[B * T:]
    return user_logits, item_logits, diff[0, 0, 0]


# ----------------------------------------------------------------------------
# Deterministic parameter initialization (shapes follow the module __init__)
# ----------------------------------------------------------------------------
def init_params(key, vocab, emb, hid, lat, clust):
    keys = iter(jax.random.split(key, 48))

    def nxt(shape):
        return 0.1 * jax.random.normal(next(keys), shape, dtype=jnp.float32)

    def encoder():
        return dict(
            w_ih_f=nxt((3 * hid, emb)), w_hh_f=nxt((3 * hid, hid)),
            b_ih_f=nxt((3 * hid,)), b_hh_f=nxt((3 * hid,)),
            w_ih_b=nxt((3 * hid, emb)), w_hh_b=nxt((3 * hid, hid)),
            b_ih_b=nxt((3 * hid,)), b_hh_b=nxt((3 * hid,)),
            w_h2l=nxt((lat, 2 * hid)), b_h2l=nxt((lat,)),
        )

    def decoder():
        return dict(
            w_l2o=nxt((emb, lat)), b_l2o=nxt((emb,)),
            w_ih=nxt((3 * hid, hid)), w_hh=nxt((3 * hid, hid)),
            b_ih=nxt((3 * hid,)), b_hh=nxt((3 * hid,)),
        )

    return dict(
        embedding=nxt((vocab, emb)),          # shared nn.Embedding
        user_embedding=nxt((lat, clust)),     # VQ codebook (latent_size, cluster_num)
        user_encoder=encoder(),
        item_encoder=encoder(),
        user_decoder=decoder(),
        item_decoder=decoder(),
        w_o2v=nxt((vocab, hid)),              # output2vocab Linear(hidden, vocab)
        b_o2v=nxt((vocab,)),
    )


if __name__ == "__main__":
    B, T = 4, 8
    VOCAB = 50
    HID = 32           # hidden_size == embedding_size (required by the module's GRUs)
    EMB = HID
    LAT = 16
    CLUST = 8
    COMMITMENT = 0.25

    key = jax.random.PRNGKey(0)
    k_par, k_rev, k_len = jax.random.split(key, 3)
    raw_params = init_params(k_par, VOCAB, EMB, HID, LAT, CLUST)
    params, cfg = prepare_params(raw_params)   # one-time weight layout / padding prep

    reviews = jax.random.randint(k_rev, (B, T), 0, VOCAB, dtype=jnp.int32)
    # module assumes review_lens >= 1 (it indexes position len-1)
    review_lens = jax.random.randint(k_len, (B,), 1, T + 1, dtype=jnp.int32)
    user_ids = jnp.arange(B, dtype=jnp.int32)   # unused by forward (parity with PyTorch)
    item_ids = jnp.arange(B, dtype=jnp.int32)   # unused by forward

    fwd = jax.jit(functools.partial(enc_network_forward, cfg=cfg, commitment=COMMITMENT))
    user_logits, item_logits, user_quantize_diff = fwd(
        params, reviews, review_lens, user_ids, item_ids)

    jax.block_until_ready((user_logits, item_logits, user_quantize_diff))
    assert user_logits.shape == (B * T, VOCAB)
    assert item_logits.shape == (B * T, VOCAB)
    assert user_quantize_diff.shape == ()
    print("KERNEL_OK")
</pallas_src>

<mosaic_0001>
module attributes {stable_mosaic.version = 11 : i64} {
  func.func @_encoder_kernel(%arg0: i32, %arg1: memref<4xi32, #tpu.memory_space<smem>>, %arg2: memref<1x8x8x384xf32, #tpu.memory_space<vmem>>, %arg3: memref<1x2x128x384xf32, #tpu.memory_space<vmem>>, %arg4: memref<1x2x1x384xf32, #tpu.memory_space<vmem>>, %arg5: memref<1x2x128x128xf32, #tpu.memory_space<vmem>>, %arg6: memref<1x1x128xf32, #tpu.memory_space<vmem>>, %arg7: memref<1x4x128xf32, #tpu.memory_space<vmem>>, %arg8: memref<4x128xf32, #tpu.memory_space<vmem>>, %arg9: memref<4x128xf32, #tpu.memory_space<vmem>>) attributes {dimension_semantics = [#tpu.dimension_semantics<parallel>], iteration_bounds = array<i64: 2>, scalar_prefetch = 1 : i64, scratch_operands = 2 : i64, tpu.core_type = #tpu.core_type<tc>, window_params = [{transform_indices = @transform_0, window_bounds = array<i64: 1, 8, 8, 384>}, {transform_indices = @transform_1, window_bounds = array<i64: 1, 2, 128, 384>}, {transform_indices = @transform_2, window_bounds = array<i64: 1, 2, 1, 384>}, {transform_indices = @transform_3, window_bounds = array<i64: 1, 2, 128, 128>}, {transform_indices = @transform_4, window_bounds = array<i64: 1, 1, 128>}, {transform_indices = @transform_5, window_bounds = array<i64: 1, 4, 128>}]} {
    %0 = tpu.iota {dimensions = array<i32: 0>} : vector<8x128xi32>
    %cst = arith.constant 0.000000e+00 : f32
    %1 = vector.broadcast %cst : f32 to vector<8x128xf32>
    %c0_i32 = arith.constant 0 : i32
    %c4_i32 = arith.constant 4 : i32
    %2 = arith.addi %c0_i32, %c4_i32 : i32
    %c1_i32 = arith.constant 1 : i32
    %3:2 = scf.for %arg10 = %c0_i32 to %2 step %c1_i32 iter_args(%arg11 = %1, %arg12 = %1) -> (vector<8x128xf32>, vector<8x128xf32>)  : i32 {
      %c3_i32 = arith.constant 3 : i32
      %20 = arith.subi %c3_i32, %arg10 : i32
      %c0_19 = arith.constant 0 : index
      %21 = arith.index_cast %arg10 : i32 to index
      %c0_20 = arith.constant 0 : index
      %c0_21 = arith.constant 0 : index
      %22 = vector.load %arg2[%c0_19, %21, %c0_20, %c0_21] : memref<1x8x8x384xf32, #tpu.memory_space<vmem>>, vector<1x1x8x384xf32>
      %23 = vector.shape_cast %22 : vector<1x1x8x384xf32> to vector<8x384xf32>
      %c0_22 = arith.constant 0 : index
      %c0_23 = arith.constant 0 : index
      %c0_24 = arith.constant 0 : index
      %c0_25 = arith.constant 0 : index
      %24 = vector.load %arg3[%c0_22, %c0_23, %c0_24, %c0_25] : memref<1x2x128x384xf32, #tpu.memory_space<vmem>>, vector<1x1x128x384xf32>
      %25 = vector.shape_cast %24 : vector<1x1x128x384xf32> to vector<128x384xf32>
      %cst_26 = arith.constant dense<0.000000e+00> : vector<8x384xf32>
      %26 = tpu.matmul %arg11, %25, %cst_26 {dimension_numbers = #tpu.dot_dimension_numbers<[1], [0], [0], [1], [0, 0, 1, 1], [], []>} : vector<8x128xf32>, vector<128x384xf32>, vector<8x384xf32> -> vector<8x384xf32>
      %c0_27 = arith.constant 0 : index
      %c0_28 = arith.constant 0 : index
      %c0_29 = arith.constant 0 : index
      %c0_30 = arith.constant 0 : index
      %27 = vector.load %arg4[%c0_27, %c0_28, %c0_29, %c0_30] : memref<1x2x1x384xf32, #tpu.memory_space<vmem>>, vector<1x1x1x384xf32>
      %28 = vector.shape_cast %27 : vector<1x1x1x384xf32> to vector<1x384xf32>
      %29 = vector.broadcast %28 : vector<1x384xf32> to vector<8x384xf32>
      %30 = arith.addf %26, %29 : vector<8x384xf32>
      %31 = vector.extract_strided_slice %23 {offsets = [0, 0], sizes = [8, 256], strides = [1, 1]} : vector<8x384xf32> to vector<8x256xf32>
      %32 = vector.extract_strided_slice %30 {offsets = [0, 0], sizes = [8, 256], strides = [1, 1]} : vector<8x384xf32> to vector<8x256xf32>
      %33 = arith.addf %31, %32 : vector<8x256xf32>
      %34 = arith.negf %33 : vector<8x256xf32>
      %35 = math.exp %34 : vector<8x256xf32>
      %cst_31 = arith.constant 1.000000e+00 : f32
      %36 = vector.broadcast %cst_31 : f32 to vector<8x256xf32>
      %37 = arith.addf %36, %35 : vector<8x256xf32>
      %38 = arith.divf %36, %37 : vector<8x256xf32>
      %39 = vector.extract_strided_slice %38 {offsets = [0, 0], sizes = [8, 128], strides = [1, 1]} : vector<8x256xf32> to vector<8x128xf32>
      %40 = vector.extract_strided_slice %38 {offsets = [0, 128], sizes = [8, 128], strides = [1, 1]} : vector<8x256xf32> to vector<8x128xf32>
      %41 = vector.extract_strided_slice %23 {offsets = [0, 256], sizes = [8, 128], strides = [1, 1]} : vector<8x384xf32> to vector<8x128xf32>
      %42 = vector.extract_strided_slice %30 {offsets = [0, 256], sizes = [8, 128], strides = [1, 1]} : vector<8x384xf32> to vector<8x128xf32>
      %43 = arith.mulf %39, %42 : vector<8x128xf32>
      %44 = arith.addf %41, %43 : vector<8x128xf32>
      %45 = math.tanh %44 : vector<8x128xf32>
      %cst_32 = arith.constant 1.000000e+00 : f32
      %46 = vector.broadcast %cst_32 : f32 to vector<8x128xf32>
      %47 = arith.subf %46, %40 : vector<8x128xf32>
      %48 = arith.mulf %47, %45 : vector<8x128xf32>
      %49 = arith.mulf %40, %arg11 : vector<8x128xf32>
      %50 = arith.addf %48, %49 : vector<8x128xf32>
      %51 = arith.index_cast %arg10 : i32 to index
      %52 = memref.load %arg1[%51] : memref<4xi32, #tpu.memory_space<smem>>
      %c1_i32_33 = arith.constant 1 : i32
      %53 = arith.subi %52, %c1_i32_33 : i32
      %54 = vector.broadcast %53 : i32 to vector<8x128xi32>
      %55 = arith.cmpi eq, %0, %54 : vector<8x128xi32>
      %cst_34 = arith.constant 0.000000e+00 : f32
      %56 = vector.broadcast %cst_34 : f32 to vector<8x128xf32>
      %57 = arith.select %55, %50, %56 : vector<8x128xi1>, vector<8x128xf32>
      %cst_35 = arith.constant dense<0.000000e+00> : vector<128xf32>
      %58 = vector.multi_reduction <add>, %57, %cst_35 [0] : vector<8x128xf32> to vector<128xf32>
      %59 = vector.shape_cast %58 : vector<128xf32> to vector<1x128xf32>
      %60 = arith.index_cast %arg10 : i32 to index
      %c0_36 = arith.constant 0 : index
      %61 = vector.load %arg8[%60, %c0_36] : memref<4x128xf32, #tpu.memory_space<vmem>>, vector<1x128xf32>
      tpu.vector_store %arg8[%60, %c0_36], %59 {strides = array<i32>} : memref<4x128xf32, #tpu.memory_space<vmem>>, vector<1x128xf32>,
      %c4_i32_37 = arith.constant 4 : i32
      %62 = arith.addi %c4_i32_37, %20 : i32
      %c0_38 = arith.constant 0 : index
      %63 = arith.index_cast %62 : i32 to index
      %c0_39 = arith.constant 0 : index
      %c0_40 = arith.constant 0 : index
      %64 = vector.load %arg2[%c0_38, %63, %c0_39, %c0_40] : memref<1x8x8x384xf32, #tpu.memory_space<vmem>>, vector<1x1x8x384xf32>
      %65 = vector.shape_cast %64 : vector<1x1x8x384xf32> to vector<8x384xf32>
      %c0_41 = arith.constant 0 : index
      %c1_42 = arith.constant 1 : index
      %c0_43 = arith.constant 0 : index
      %c0_44 = arith.constant 0 : index
      %66 = vector.load %arg3[%c0_41, %c1_42, %c0_43, %c0_44] : memref<1x2x128x384xf32, #tpu.memory_space<vmem>>, vector<1x1x128x384xf32>
      %67 = vector.shape_cast %66 : vector<1x1x128x384xf32> to vector<128x384xf32>
      %cst_45 = arith.constant dense<0.000000e+00> : vector<8x384xf32>
      %68 = tpu.matmul %arg12, %67, %cst_45 {dimension_numbers = #tpu.dot_dimension_numbers<[1], [0], [0], [1], [0, 0, 1, 1], [], []>} : vector<8x128xf32>, vector<128x384xf32>, vector<8x384xf32> -> vector<8x384xf32>
      %c0_46 = arith.constant 0 : index
      %c1_47 = arith.constant 1 : index
      %c0_48 = arith.constant 0 : index
      %c0_49 = arith.constant 0 : index
      %69 = vector.load %arg4[%c0_46, %c1_47, %c0_48, %c0_49] : memref<1x2x1x384xf32, #tpu.memory_space<vmem>>, vector<1x1x1x384xf32>
      %70 = vector.shape_cast %69 : vector<1x1x1x384xf32> to vector<1x384xf32>
      %71 = vector.broadcast %70 : vector<1x384xf32> to vector<8x384xf32>
      %72 = arith.addf %68, %71 : vector<8x384xf32>
      %73 = vector.extract_strided_slice %65 {offsets = [0, 0], sizes = [8, 256], strides = [1, 1]} : vector<8x384xf32> to vector<8x256xf32>
      %74 = vector.extract_strided_slice %72 {offsets = [0, 0], sizes = [8, 256], strides = [1, 1]} : vector<8x384xf32> to vector<8x256xf32>
      %75 = arith.addf %73, %74 : vector<8x256xf32>
      %76 = arith.negf %75 : vector<8x256xf32>
      %77 = math.exp %76 : vector<8x256xf32>
      %cst_50 = arith.constant 1.000000e+00 : f32
      %78 = vector.broadcast %cst_50 : f32 to vector<8x256xf32>
      %79 = arith.addf %78, %77 : vector<8x256xf32>
      %80 = arith.divf %78, %79 : vector<8x256xf32>
      %81 = vector.extract_strided_slice %80 {offsets = [0, 0], sizes = [8, 128], strides = [1, 1]} : vector<8x256xf32> to vector<8x128xf32>
      %82 = vector.extract_strided_slice %80 {offsets = [0, 128], sizes = [8, 128], strides = [1, 1]} : vector<8x256xf32> to vector<8x128xf32>
      %83 = vector.extract_strided_slice %65 {offsets = [0, 256], sizes = [8, 128], strides = [1, 1]} : vector<8x384xf32> to vector<8x128xf32>
      %84 = vector.extract_strided_slice %72 {offsets = [0, 256], sizes = [8, 128], strides = [1, 1]} : vector<8x384xf32> to vector<8x128xf32>
      %85 = arith.mulf %81, %84 : vector<8x128xf32>
      %86 = arith.addf %83, %85 : vector<8x128xf32>
      %87 = math.tanh %86 : vector<8x128xf32>
      %cst_51 = arith.constant 1.000000e+00 : f32
      %88 = vector.broadcast %cst_51 : f32 to vector<8x128xf32>
      %89 = arith.subf %88, %82 : vector<8x128xf32>
      %90 = arith.mulf %89, %87 : vector<8x128xf32>
      %91 = arith.mulf %82, %arg12 : vector<8x128xf32>
      %92 = arith.addf %90, %91 : vector<8x128xf32>
      %93 = arith.index_cast %20 : i32 to index
      %94 = memref.load %arg1[%93] : memref<4xi32, #tpu.memory_space<smem>>
      %c1_i32_52 = arith.constant 1 : i32
      %95 = arith.subi %94, %c1_i32_52 : i32
      %96 = vector.broadcast %95 : i32 to vector<8x128xi32>
      %97 = arith.cmpi eq, %0, %96 : vector<8x128xi32>
      %cst_53 = arith.constant 0.000000e+00 : f32
      %98 = vector.broadcast %cst_53 : f32 to vector<8x128xf32>
      %99 = arith.select %97, %92, %98 : vector<8x128xi1>, vector<8x128xf32>
      %cst_54 = arith.constant dense<0.000000e+00> : vector<128xf32>
      %100 = vector.multi_reduction <add>, %99, %cst_54 [0] : vector<8x128xf32> to vector<128xf32>
      %101 = vector.shape_cast %100 : vector<128xf32> to vector<1x128xf32>
      %102 = arith.index_cast %20 : i32 to index
      %c0_55 = arith.constant 0 : index
      %103 = vector.load %arg9[%102, %c0_55] : memref<4x128xf32, #tpu.memory_space<vmem>>, vector<1x128xf32>
      tpu.vector_store %arg9[%102, %c0_55], %101 {strides = array<i32>} : memref<4x128xf32, #tpu.memory_space<vmem>>, vector<1x128xf32>,
      scf.yield %50, %92 : vector<8x128xf32>, vector<8x128xf32>
    }
    %c4_i32_0 = arith.constant 4 : i32
    %c0 = arith.constant 0 : index
    %c0_1 = arith.constant 0 : index
    %4 = vector.load %arg8[%c0, %c0_1] : memref<4x128xf32, #tpu.memory_space<vmem>>, vector<4x128xf32>
    %c0_2 = arith.constant 0 : index
    %c0_3 = arith.constant 0 : index
    %c0_4 = arith.constant 0 : index
    %c0_5 = arith.constant 0 : index
    %5 = vector.load %arg5[%c0_2, %c0_3, %c0_4, %c0_5] : memref<1x2x128x128xf32, #tpu.memory_space<vmem>>, vector<1x1x128x128xf32>
    %6 = vector.shape_cast %5 : vector<1x1x128x128xf32> to vector<128x128xf32>
    %cst_6 = arith.constant dense<0.000000e+00> : vector<4x128xf32>
    %7 = tpu.matmul %4, %6, %cst_6 {dimension_numbers = #tpu.dot_dimension_numbers<[1], [0], [0], [1], [0, 0, 1, 1], [], []>} : vector<4x128xf32>, vector<128x128xf32>, vector<4x128xf32> -> vector<4x128xf32>
    %c0_7 = arith.constant 0 : index
    %c0_8 = arith.constant 0 : index
    %8 = vector.load %arg9[%c0_7, %c0_8] : memref<4x128xf32, #tpu.memory_space<vmem>>, vector<4x128xf32>
    %c0_9 = arith.constant 0 : index
    %c1 = arith.constant 1 : index
    %c0_10 = arith.constant 0 : index
    %c0_11 = arith.constant 0 : index
    %9 = vector.load %arg5[%c0_9, %c1, %c0_10, %c0_11] : memref<1x2x128x128xf32, #tpu.memory_space<vmem>>, vector<1x1x128x128xf32>
    %10 = vector.shape_cast %9 : vector<1x1x128x128xf32> to vector<128x128xf32>
    %cst_12 = arith.constant dense<0.000000e+00> : vector<4x128xf32>
    %11 = tpu.matmul %8, %10, %cst_12 {dimension_numbers = #tpu.dot_dimension_numbers<[1], [0], [0], [1], [0, 0, 1, 1], [], []>} : vector<4x128xf32>, vector<128x128xf32>, vector<4x128xf32> -> vector<4x128xf32>
    %12 = arith.addf %7, %11 : vector<4x128xf32>
    %c0_13 = arith.constant 0 : index
    %c0_14 = arith.constant 0 : index
    %c0_15 = arith.constant 0 : index
    %13 = vector.load %arg6[%c0_13, %c0_14, %c0_15] : memref<1x1x128xf32, #tpu.memory_space<vmem>>, vector<1x1x128xf32>
    %14 = vector.shape_cast %13 : vector<1x1x128xf32> to vector<1x128xf32>
    %15 = vector.broadcast %14 : vector<1x128xf32> to vector<4x128xf32>
    %16 = arith.addf %12, %15 : vector<4x128xf32>
    %c0_16 = arith.constant 0 : index
    %c0_17 = arith.constant 0 : index
    %c0_18 = arith.constant 0 : index
    %17 = vector.load %arg7[%c0_16, %c0_17, %c0_18] : memref<1x4x128xf32, #tpu.memory_space<vmem>>, vector<1x4x128xf32>
    %18 = vector.shape_cast %17 : vector<1x4x128xf32> to vector<4x128xf32>
    %19 = vector.shape_cast %16 : vector<4x128xf32> to vector<1x4x128xf32>
    tpu.vector_store %arg7[%c0_16, %c0_17, %c0_18], %19 {strides = array<i32>} : memref<1x4x128xf32, #tpu.memory_space<vmem>>, vector<1x4x128xf32>,
    return
  }
  func.func @transform_0(%arg0: i32, %arg1: memref<4xi32, #tpu.memory_space<smem>>) -> (i32, i32, i32, i32) {
    %c0_i32 = arith.constant 0 : i32
    %c0_i32_0 = arith.constant 0 : i32
    %c0_i32_1 = arith.constant 0 : i32
    %c0_i32_2 = arith.constant 0 : i32
    return %arg0, %c0_i32, %c0_i32_0, %c0_i32_1 : i32, i32, i32, i32
  }
  func.func @transform_1(%arg0: i32, %arg1: memref<4xi32, #tpu.memory_space<smem>>) -> (i32, i32, i32, i32) {
    %c0_i32 = arith.constant 0 : i32
    %c0_i32_0 = arith.constant 0 : i32
    %c0_i32_1 = arith.constant 0 : i32
    %c0_i32_2 = arith.constant 0 : i32
    return %arg0, %c0_i32, %c0_i32_0, %c0_i32_1 : i32, i32, i32, i32
  }
  func.func @transform_2(%arg0: i32, %arg1: memref<4xi32, #tpu.memory_space<smem>>) -> (i32, i32, i32, i32) {
    %c0_i32 = arith.constant 0 : i32
    %c0_i32_0 = arith.constant 0 : i32
    %c0_i32_1 = arith.constant 0 : i32
    %c0_i32_2 = arith.constant 0 : i32
    return %arg0, %c0_i32, %c0_i32_0, %c0_i32_1 : i32, i32, i32, i32
  }
  func.func @transform_3(%arg0: i32, %arg1: memref<4xi32, #tpu.memory_space<smem>>) -> (i32, i32, i32, i32) {
    %c0_i32 = arith.constant 0 : i32
    %c0_i32_0 = arith.constant 0 : i32
    %c0_i32_1 = arith.constant 0 : i32
    %c0_i32_2 = arith.constant 0 : i32
    return %arg0, %c0_i32, %c0_i32_0, %c0_i32_1 : i32, i32, i32, i32
  }
  func.func @transform_4(%arg0: i32, %arg1: memref<4xi32, #tpu.memory_space<smem>>) -> (i32, i32, i32) {
    %c0_i32 = arith.constant 0 : i32
    %c0_i32_0 = arith.constant 0 : i32
    %c0_i32_1 = arith.constant 0 : i32
    return %arg0, %c0_i32, %c0_i32_0 : i32, i32, i32
  }
  func.func @transform_5(%arg0: i32, %arg1: memref<4xi32, #tpu.memory_space<smem>>) -> (i32, i32, i32) {
    %c0_i32 = arith.constant 0 : i32
    %c0_i32_0 = arith.constant 0 : i32
    %c0_i32_1 = arith.constant 0 : i32
    return %arg0, %c0_i32, %c0_i32_0 : i32, i32, i32
  }
}

module attributes {stable_mosaic.version = 11 : i64} {
  func.func @_affine_kernel(%arg0: i32, %arg1: i32, %arg2: memref<32x128xbf16, #tpu.memory_space<vmem>>, %arg3: memref<1x128x384xbf16, #tpu.memory_space<vmem>>, %arg4: memref<1x1x384xf32, #tpu.memory_space<vmem>>, %arg5: memref<1x32x384xf32, #tpu.memory_space<vmem>>) attributes {dimension_semantics = [#tpu.dimension_semantics<parallel>, #tpu.dimension_semantics<parallel>], iteration_bounds = array<i64: 1, 6>, scalar_prefetch = 0 : i64, scratch_operands = 0 : i64, tpu.core_type = #tpu.core_type<tc>, window_params = [{transform_indices = @transform_0, window_bounds = array<i64: 32, 128>}, {transform_indices = @transform_1, window_bounds = array<i64: 1, 128, 384>}, {transform_indices = @transform_2, window_bounds = array<i64: 1, 1, 384>}, {transform_indices = @transform_3, window_bounds = array<i64: 1, 32, 384>}]} {
    %c0 = arith.constant 0 : index
    %c0_0 = arith.constant 0 : index
    %0 = vector.load %arg2[%c0, %c0_0] : memref<32x128xbf16, #tpu.memory_space<vmem>>, vector<32x128xbf16>
    %c0_1 = arith.constant 0 : index
    %c0_2 = arith.constant 0 : index
    %c0_3 = arith.constant 0 : index
    %1 = vector.load %arg3[%c0_1, %c0_2, %c0_3] : memref<1x128x384xbf16, #tpu.memory_space<vmem>>, vector<1x128x384xbf16>
    %2 = vector.shape_cast %1 : vector<1x128x384xbf16> to vector<128x384xbf16>
    %cst = arith.constant dense<0.000000e+00> : vector<32x384xf32>
    %3 = tpu.matmul %0, %2, %cst {dimension_numbers = #tpu.dot_dimension_numbers<[1], [0], [0], [1], [0, 0, 1, 1], [], []>} : vector<32x128xbf16>, vector<128x384xbf16>, vector<32x384xf32> -> vector<32x384xf32>
    %c0_4 = arith.constant 0 : index
    %c0_5 = arith.constant 0 : index
    %c0_6 = arith.constant 0 : index
    %4 = vector.load %arg4[%c0_4, %c0_5, %c0_6] : memref<1x1x384xf32, #tpu.memory_space<vmem>>, vector<1x1x384xf32>
    %5 = vector.shape_cast %4 : vector<1x1x384xf32> to vector<1x384xf32>
    %6 = vector.broadcast %5 : vector<1x384xf32> to vector<32x384xf32>
    %7 = arith.addf %3, %6 : vector<32x384xf32>
    %c0_7 = arith.constant 0 : index
    %c0_8 = arith.constant 0 : index
    %c0_9 = arith.constant 0 : index
    %8 = vector.load %arg5[%c0_7, %c0_8, %c0_9] : memref<1x32x384xf32, #tpu.memory_space<vmem>>, vector<1x32x384xf32>
    %9 = vector.shape_cast %8 : vector<1x32x384xf32> to vector<32x384xf32>
    %10 = vector.shape_cast %7 : vector<32x384xf32> to vector<1x32x384xf32>
    tpu.vector_store %arg5[%c0_7, %c0_8, %c0_9], %10 {strides = array<i32>} : memref<1x32x384xf32, #tpu.memory_space<vmem>>, vector<1x32x384xf32>,
    return
  }
  func.func @transform_0(%arg0: i32, %arg1: i32) -> (i32, i32) {
    %c0_i32 = arith.constant 0 : i32
    %c0_i32_0 = arith.constant 0 : i32
    return %arg0, %c0_i32 : i32, i32
  }
  func.func @transform_1(%arg0: i32, %arg1: i32) -> (i32, i32, i32) {
    %c0_i32 = arith.constant 0 : i32
    %c0_i32_0 = arith.constant 0 : i32
    %c0_i32_1 = arith.constant 0 : i32
    return %arg1, %c0_i32, %c0_i32_0 : i32, i32, i32
  }
  func.func @transform_2(%arg0: i32, %arg1: i32) -> (i32, i32, i32) {
    %c0_i32 = arith.constant 0 : i32
    %c0_i32_0 = arith.constant 0 : i32
    %c0_i32_1 = arith.constant 0 : i32
    return %arg1, %c0_i32, %c0_i32_0 : i32, i32, i32
  }
  func.func @transform_3(%arg0: i32, %arg1: i32) -> (i32, i32, i32) {
    %c0_i32 = arith.constant 0 : i32
    %c0_i32_0 = arith.constant 0 : i32
    return %arg1, %arg0, %c0_i32 : i32, i32, i32
  }
}

module attributes {stable_mosaic.version = 11 : i64} {
  func.func @_decoder_kernel(%arg0: i32, %arg1: memref<1x4x8x384xf32, #tpu.memory_space<vmem>>, %arg2: memref<1x4x128xf32, #tpu.memory_space<vmem>>, %arg3: memref<128x128xf32, #tpu.memory_space<vmem>>, %arg4: memref<1x128x128xf32, #tpu.memory_space<vmem>>, %arg5: memref<1x1x128xf32, #tpu.memory_space<vmem>>, %arg6: memref<1x128x384xf32, #tpu.memory_space<vmem>>, %arg7: memref<1x128x384xf32, #tpu.memory_space<vmem>>, %arg8: memref<1x1x384xf32, #tpu.memory_space<vmem>>, %arg9: memref<1x4x8x128xf32, #tpu.memory_space<vmem>>, %arg10: memref<1x8x128xf32, #tpu.memory_space<vmem>>, %arg11: memref<4x384xf32, #tpu.memory_space<vmem>>) attributes {dimension_semantics = [#tpu.dimension_semantics<parallel>], iteration_bounds = array<i64: 2>, scalar_prefetch = 0 : i64, scratch_operands = 1 : i64, tpu.core_type = #tpu.core_type<tc>, window_params = [{transform_indices = @transform_0, window_bounds = array<i64: 1, 4, 8, 384>}, {transform_indices = @transform_1, window_bounds = array<i64: 1, 4, 128>}, {pipeline_mode = #tpu.pipeline_mode<synchronous>, transform_indices = @transform_2, window_bounds = array<i64: 128, 128>}, {transform_indices = @transform_3, window_bounds = array<i64: 1, 128, 128>}, {transform_indices = @transform_4, window_bounds = array<i64: 1, 1, 128>}, {transform_indices = @transform_5, window_bounds = array<i64: 1, 128, 384>}, {transform_indices = @transform_6, window_bounds = array<i64: 1, 128, 384>}, {transform_indices = @transform_7, window_bounds = array<i64: 1, 1, 384>}, {transform_indices = @transform_8, window_bounds = array<i64: 1, 4, 8, 128>}, {transform_indices = @transform_9, window_bounds = array<i64: 1, 8, 128>}]} {
    %c0 = arith.constant 0 : index
    %c0_0 = arith.constant 0 : index
    %c0_1 = arith.constant 0 : index
    %0 = vector.load %arg2[%c0, %c0_0, %c0_1] : memref<1x4x128xf32, #tpu.memory_space<vmem>>, vector<1x4x128xf32>
    %1 = vector.shape_cast %0 : vector<1x4x128xf32> to vector<4x128xf32>
    %c0_2 = arith.constant 0 : index
    %c0_3 = arith.constant 0 : index
    %2 = vector.load %arg3[%c0_2, %c0_3] : memref<128x128xf32, #tpu.memory_space<vmem>>, vector<128x128xf32>
    %3 = arith.mulf %1, %1 : vector<4x128xf32>
    %cst = arith.constant dense<0.000000e+00> : vector<4xf32>
    %4 = vector.multi_reduction <add>, %3, %cst [1] : vector<4x128xf32> to vector<4xf32>
    %5 = vector.shape_cast %4 : vector<4xf32> to vector<4x1xf32>
    %6 = arith.mulf %2, %2 : vector<128x128xf32>
    %cst_4 = arith.constant dense<0.000000e+00> : vector<128xf32>
    %7 = vector.multi_reduction <add>, %6, %cst_4 [0] : vector<128x128xf32> to vector<128xf32>
    %8 = vector.shape_cast %7 : vector<128xf32> to vector<1x128xf32>
    %cst_5 = arith.constant dense<0.000000e+00> : vector<4x128xf32>
    %9 = tpu.matmul %1, %2, %cst_5 {dimension_numbers = #tpu.dot_dimension_numbers<[1], [0], [0], [1], [0, 0, 1, 1], [], []>} : vector<4x128xf32>, vector<128x128xf32>, vector<4x128xf32> -> vector<4x128xf32>
    %cst_6 = arith.constant 2.000000e+00 : f32
    %10 = vector.broadcast %cst_6 : f32 to vector<4x128xf32>
    %11 = arith.mulf %10, %9 : vector<4x128xf32>
    %12 = vector.broadcast %5 : vector<4x1xf32> to vector<4x128xf32>
    %13 = arith.subf %12, %11 : vector<4x128xf32>
    %14 = vector.broadcast %8 : vector<1x128xf32> to vector<4x128xf32>
    %15 = arith.addf %13, %14 : vector<4x128xf32>
    %16 = tpu.iota {dimensions = array<i32: 1>} : vector<4x128xi32>
    %c8_i32 = arith.constant 8 : i32
    %17 = vector.broadcast %c8_i32 : i32 to vector<4x128xi32>
    %18 = arith.cmpi slt, %16, %17 : vector<4x128xi32>
    %cst_7 = arith.constant 1.000000e+30 : f32
    %19 = vector.broadcast %cst_7 : f32 to vector<4x128xf32>
    %20 = arith.select %18, %15, %19 : vector<4x128xi1>, vector<4x128xf32>
    %cst_8 = arith.constant dense<0x7F800000> : vector<4xf32>
    %21 = vector.multi_reduction <minimumf>, %20, %cst_8 [1] : vector<4x128xf32> to vector<4xf32>
    %22 = vector.shape_cast %21 : vector<4xf32> to vector<4x1xf32>
    %23 = vector.broadcast %22 : vector<4x1xf32> to vector<4x128xf32>
    %24 = arith.cmpf oeq, %20, %23 : vector<4x128xf32>
    %c128_i32 = arith.constant 128 : i32
    %25 = vector.broadcast %c128_i32 : i32 to vector<4x128xi32>
    %26 = arith.select %24, %16, %25 : vector<4x128xi1>, vector<4x128xi32>
    %cst_9 = arith.constant dense<2147483647> : vector<4xi32>
    %27 = vector.multi_reduction <minsi>, %26, %cst_9 [1] : vector<4x128xi32> to vector<4xi32>
    %28 = vector.shape_cast %27 : vector<4xi32> to vector<4x1xi32>
    %29 = vector.broadcast %28 : vector<4x1xi32> to vector<4x128xi32>
    %30 = arith.cmpi eq, %16, %29 : vector<4x128xi32>
    %31 = arith.extui %30 : vector<4x128xi1> to vector<4x128xi32>
    %32 = arith.sitofp %31 : vector<4x128xi32> to vector<4x128xf32>
    %cst_10 = arith.constant dense<0.000000e+00> : vector<4x128xf32>
    %33 = tpu.matmul %32, %2, %cst_10 {dimension_numbers = #tpu.dot_dimension_numbers<[1], [1], [0], [0], [0, 0, 1, 0], [], []>} : vector<4x128xf32>, vector<128x128xf32>, vector<4x128xf32> -> vector<4x128xf32>
    %34 = arith.subf %1, %33 : vector<4x128xf32>
    %35 = arith.mulf %34, %34 : vector<4x128xf32>
    %36 = vector.shape_cast %35 : vector<4x128xf32> to vector<1x4x128xf32>
    %cst_11 = arith.constant dense<0.000000e+00> : vector<1xf32>
    %37 = vector.multi_reduction <add>, %36, %cst_11 [1, 2] : vector<1x4x128xf32> to vector<1xf32>
    %38 = vector.shape_cast %37 : vector<1xf32> to vector<1x1x1xf32>
    %39 = vector.extract %38[0, 0, 0] : f32 from vector<1x1x1xf32>
    %cst_12 = arith.constant 6.400000e+01 : f32
    %40 = arith.divf %39, %cst_12 : f32
    %cst_13 = arith.constant 2.500000e-01 : f32
    %41 = arith.mulf %cst_13, %40 : f32
    %42 = vector.broadcast %41 : f32 to vector<8x128xf32>
    %c0_14 = arith.constant 0 : index
    %c0_15 = arith.constant 0 : index
    %c0_16 = arith.constant 0 : index
    %43 = vector.load %arg10[%c0_14, %c0_15, %c0_16] : memref<1x8x128xf32, #tpu.memory_space<vmem>>, vector<1x8x128xf32>
    %44 = vector.shape_cast %43 : vector<1x8x128xf32> to vector<8x128xf32>
    %45 = vector.shape_cast %42 : vector<8x128xf32> to vector<1x8x128xf32>
    tpu.vector_store %arg10[%c0_14, %c0_15, %c0_16], %45 {strides = array<i32>} : memref<1x8x128xf32, #tpu.memory_space<vmem>>, vector<1x8x128xf32>,
    %c0_i32 = arith.constant 0 : i32
    %46 = arith.cmpi eq, %arg0, %c0_i32 : i32
    %47 = arith.select %46, %33, %1 : vector<4x128xf32>
    %48 = math.tanh %47 : vector<4x128xf32>
    %c0_17 = arith.constant 0 : index
    %c0_18 = arith.constant 0 : index
    %c0_19 = arith.constant 0 : index
    %49 = vector.load %arg4[%c0_17, %c0_18, %c0_19] : memref<1x128x128xf32, #tpu.memory_space<vmem>>, vector<1x128x128xf32>
    %50 = vector.shape_cast %49 : vector<1x128x128xf32> to vector<128x128xf32>
    %cst_20 = arith.constant dense<0.000000e+00> : vector<4x128xf32>
    %51 = tpu.matmul %48, %50, %cst_20 {dimension_numbers = #tpu.dot_dimension_numbers<[1], [0], [0], [1], [0, 0, 1, 1], [], []>} : vector<4x128xf32>, vector<128x128xf32>, vector<4x128xf32> -> vector<4x128xf32>
    %c0_21 = arith.constant 0 : index
    %c0_22 = arith.constant 0 : index
    %c0_23 = arith.constant 0 : index
    %52 = vector.load %arg5[%c0_21, %c0_22, %c0_23] : memref<1x1x128xf32, #tpu.memory_space<vmem>>, vector<1x1x128xf32>
    %53 = vector.shape_cast %52 : vector<1x1x128xf32> to vector<1x128xf32>
    %54 = vector.broadcast %53 : vector<1x128xf32> to vector<4x128xf32>
    %55 = arith.addf %51, %54 : vector<4x128xf32>
    %c0_24 = arith.constant 0 : index
    %c0_25 = arith.constant 0 : index
    %c0_26 = arith.constant 0 : index
    %56 = vector.load %arg6[%c0_24, %c0_25, %c0_26] : memref<1x128x384xf32, #tpu.memory_space<vmem>>, vector<1x128x384xf32>
    %57 = vector.shape_cast %56 : vector<1x128x384xf32> to vector<128x384xf32>
    %cst_27 = arith.constant dense<0.000000e+00> : vector<4x384xf32>
    %58 = tpu.matmul %55, %57, %cst_27 {dimension_numbers = #tpu.dot_dimension_numbers<[1], [0], [0], [1], [0, 0, 1, 1], [], []>} : vector<4x128xf32>, vector<128x384xf32>, vector<4x384xf32> -> vector<4x384xf32>
    %c0_28 = arith.constant 0 : index
    %c0_29 = arith.constant 0 : index
    %59 = vector.load %arg11[%c0_28, %c0_29] : memref<4x384xf32, #tpu.memory_space<vmem>>, vector<4x384xf32>
    tpu.vector_store %arg11[%c0_28, %c0_29], %58 {strides = array<i32>} : memref<4x384xf32, #tpu.memory_space<vmem>>, vector<4x384xf32>,
    %cst_30 = arith.constant 0.000000e+00 : f32
    %60 = vector.broadcast %cst_30 : f32 to vector<8x128xf32>
    %c0_i32_31 = arith.constant 0 : i32
    %c4_i32 = arith.constant 4 : i32
    %61 = arith.addi %c0_i32_31, %c4_i32 : i32
    %c1_i32 = arith.constant 1 : i32
    %62 = scf.for %arg12 = %c0_i32_31 to %61 step %c1_i32 iter_args(%arg13 = %60) -> (vector<8x128xf32>)  : i32 {
      %c0_33 = arith.constant 0 : index
      %63 = arith.index_cast %arg12 : i32 to index
      %c0_34 = arith.constant 0 : index
      %c0_35 = arith.constant 0 : index
      %64 = vector.load %arg1[%c0_33, %63, %c0_34, %c0_35] : memref<1x4x8x384xf32, #tpu.memory_space<vmem>>, vector<1x1x8x384xf32>
      %65 = vector.shape_cast %64 : vector<1x1x8x384xf32> to vector<8x384xf32>
      %66 = arith.index_cast %arg12 : i32 to index
      %c0_36 = arith.constant 0 : index
      %67 = vector.load %arg11[%66, %c0_36] : memref<4x384xf32, #tpu.memory_space<vmem>>, vector<1x384xf32>
      %68 = vector.broadcast %67 : vector<1x384xf32> to vector<8x384xf32>
      %69 = arith.addf %65, %68 : vector<8x384xf32>
      %c0_37 = arith.constant 0 : index
      %c0_38 = arith.constant 0 : index
      %c0_39 = arith.constant 0 : index
      %70 = vector.load %arg7[%c0_37, %c0_38, %c0_39] : memref<1x128x384xf32, #tpu.memory_space<vmem>>, vector<1x128x384xf32>
      %71 = vector.shape_cast %70 : vector<1x128x384xf32> to vector<128x384xf32>
      %cst_40 = arith.constant dense<0.000000e+00> : vector<8x384xf32>
      %72 = tpu.matmul %arg13, %71, %cst_40 {dimension_numbers = #tpu.dot_dimension_numbers<[1], [0], [0], [1], [0, 0, 1, 1], [], []>} : vector<8x128xf32>, vector<128x384xf32>, vector<8x384xf32> -> vector<8x384xf32>
      %c0_41 = arith.constant 0 : index
      %c0_42 = arith.constant 0 : index
      %c0_43 = arith.constant 0 : index
      %73 = vector.load %arg8[%c0_41, %c0_42, %c0_43] : memref<1x1x384xf32, #tpu.memory_space<vmem>>, vector<1x1x384xf32>
      %74 = vector.shape_cast %73 : vector<1x1x384xf32> to vector<1x384xf32>
      %75 = vector.broadcast %74 : vector<1x384xf32> to vector<8x384xf32>
      %76 = arith.addf %72, %75 : vector<8x384xf32>
      %77 = vector.extract_strided_slice %69 {offsets = [0, 0], sizes = [8, 256], strides = [1, 1]} : vector<8x384xf32> to vector<8x256xf32>
      %78 = vector.extract_strided_slice %76 {offsets = [0, 0], sizes = [8, 256], strides = [1, 1]} : vector<8x384xf32> to vector<8x256xf32>
      %79 = arith.addf %77, %78 : vector<8x256xf32>
      %80 = arith.negf %79 : vector<8x256xf32>
      %81 = math.exp %80 : vector<8x256xf32>
      %cst_44 = arith.constant 1.000000e+00 : f32
      %82 = vector.broadcast %cst_44 : f32 to vector<8x256xf32>
      %83 = arith.addf %82, %81 : vector<8x256xf32>
      %84 = arith.divf %82, %83 : vector<8x256xf32>
      %85 = vector.extract_strided_slice %84 {offsets = [0, 0], sizes = [8, 128], strides = [1, 1]} : vector<8x256xf32> to vector<8x128xf32>
      %86 = vector.extract_strided_slice %84 {offsets = [0, 128], sizes = [8, 128], strides = [1, 1]} : vector<8x256xf32> to vector<8x128xf32>
      %87 = vector.extract_strided_slice %69 {offsets = [0, 256], sizes = [8, 128], strides = [1, 1]} : vector<8x384xf32> to vector<8x128xf32>
      %88 = vector.extract_strided_slice %76 {offsets = [0, 256], sizes = [8, 128], strides = [1, 1]} : vector<8x384xf32> to vector<8x128xf32>
      %89 = arith.mulf %85, %88 : vector<8x128xf32>
      %90 = arith.addf %87, %89 : vector<8x128xf32>
      %91 = math.tanh %90 : vector<8x128xf32>
      %cst_45 = arith.constant 1.000000e+00 : f32
      %92 = vector.broadcast %cst_45 : f32 to vector<8x128xf32>
      %93 = arith.subf %92, %86 : vector<8x128xf32>
      %94 = arith.mulf %93, %91 : vector<8x128xf32>
      %95 = arith.mulf %86, %arg13 : vector<8x128xf32>
      %96 = arith.addf %94, %95 : vector<8x128xf32>
      %c0_46 = arith.constant 0 : index
      %97 = arith.index_cast %arg12 : i32 to index
      %c0_47 = arith.constant 0 : index
      %c0_48 = arith.constant 0 : index
      %98 = vector.load %arg9[%c0_46, %97, %c0_47, %c0_48] : memref<1x4x8x128xf32, #tpu.memory_space<vmem>>, vector<1x1x8x128xf32>
      %99 = vector.shape_cast %98 : vector<1x1x8x128xf32> to vector<8x128xf32>
      %100 = vector.shape_cast %96 : vector<8x128xf32> to vector<1x1x8x128xf32>
      tpu.vector_store %arg9[%c0_46, %97, %c0_47, %c0_48], %100 {strides = array<i32>} : memref<1x4x8x128xf32, #tpu.memory_space<vmem>>, vector<1x1x8x128xf32>,
      scf.yield %96 : vector<8x128xf32>
    }
    %c4_i32_32 = arith.constant 4 : i32
    return
  }
  func.func @transform_0(%arg0: i32) -> (i32, i32, i32, i32) {
    %c0_i32 = arith.constant 0 : i32
    %c0_i32_0 = arith.constant 0 : i32
    %c0_i32_1 = arith.constant 0 : i32
    %c0_i32_2 = arith.constant 0 : i32
    return %arg0, %c0_i32, %c0_i32_0, %c0_i32_1 : i32, i32, i32, i32
  }
  func.func @transform_1(%arg0: i32) -> (i32, i32, i32) {
    %c0_i32 = arith.constant 0 : i32
    %c0_i32_0 = arith.constant 0 : i32
    %c0_i32_1 = arith.constant 0 : i32
    return %arg0, %c0_i32, %c0_i32_0 : i32, i32, i32
  }
  func.func @transform_2(%arg0: i32) -> (i32, i32) {
    %c0_i32 = arith.constant 0 : i32
    %c0_i32_0 = arith.constant 0 : i32
    %c0_i32_1 = arith.constant 0 : i32
    return %c0_i32, %c0_i32_0 : i32, i32
  }
  func.func @transform_3(%arg0: i32) -> (i32, i32, i32) {
    %c0_i32 = arith.constant 0 : i32
    %c0_i32_0 = arith.constant 0 : i32
    %c0_i32_1 = arith.constant 0 : i32
    return %arg0, %c0_i32, %c0_i32_0 : i32, i32, i32
  }
  func.func @transform_4(%arg0: i32) -> (i32, i32, i32) {
    %c0_i32 = arith.constant 0 : i32
    %c0_i32_0 = arith.constant 0 : i32
    %c0_i32_1 = arith.constant 0 : i32
    return %arg0, %c0_i32, %c0_i32_0 : i32, i32, i32
  }
  func.func @transform_5(%arg0: i32) -> (i32, i32, i32) {
    %c0_i32 = arith.constant 0 : i32
    %c0_i32_0 = arith.constant 0 : i32
    %c0_i32_1 = arith.constant 0 : i32
    return %arg0, %c0_i32, %c0_i32_0 : i32, i32, i32
  }
  func.func @transform_6(%arg0: i32) -> (i32, i32, i32) {
    %c0_i32 = arith.constant 0 : i32
    %c0_i32_0 = arith.constant 0 : i32
    %c0_i32_1 = arith.constant 0 : i32
    return %arg0, %c0_i32, %c0_i32_0 : i32, i32, i32
  }
  func.func @transform_7(%arg0: i32) -> (i32, i32, i32) {
    %c0_i32 = arith.constant 0 : i32
    %c0_i32_0 = arith.constant 0 : i32
    %c0_i32_1 = arith.constant 0 : i32
    return %arg0, %c0_i32, %c0_i32_0 : i32, i32, i32
  }
  func.func @transform_8(%arg0: i32) -> (i32, i32, i32, i32) {
    %c0_i32 = arith.constant 0 : i32
    %c0_i32_0 = arith.constant 0 : i32
    %c0_i32_1 = arith.constant 0 : i32
    %c0_i32_2 = arith.constant 0 : i32
    return %arg0, %c0_i32, %c0_i32_0, %c0_i32_1 : i32, i32, i32, i32
  }
  func.func @transform_9(%arg0: i32) -> (i32, i32, i32) {
    %c0_i32 = arith.constant 0 : i32
    %c0_i32_0 = arith.constant 0 : i32
    %c0_i32_1 = arith.constant 0 : i32
    return %arg0, %c0_i32, %c0_i32_0 : i32, i32, i32
  }
}

module attributes {stable_mosaic.version = 11 : i64} {
  func.func @_affine_kernel(%arg0: i32, %arg1: i32, %arg2: memref<64x128xbf16, #tpu.memory_space<vmem>>, %arg3: memref<128x128xbf16, #tpu.memory_space<vmem>>, %arg4: memref<1x128xf32, #tpu.memory_space<vmem>>, %arg5: memref<64x128xf32, #tpu.memory_space<vmem>>) attributes {dimension_semantics = [#tpu.dimension_semantics<parallel>, #tpu.dimension_semantics<parallel>], iteration_bounds = array<i64: 1, 1>, scalar_prefetch = 0 : i64, scratch_operands = 0 : i64, tpu.core_type = #tpu.core_type<tc>, window_params = [{transform_indices = @transform_0, window_bounds = array<i64: 64, 128>}, {transform_indices = @transform_1, window_bounds = array<i64: 128, 128>}, {transform_indices = @transform_2, window_bounds = array<i64: 1, 128>}, {transform_indices = @transform_3, window_bounds = array<i64: 64, 128>}]} {
    %c0 = arith.constant 0 : index
    %c0_0 = arith.constant 0 : index
    %0 = vector.load %arg2[%c0, %c0_0] : memref<64x128xbf16, #tpu.memory_space<vmem>>, vector<64x128xbf16>
    %c0_1 = arith.constant 0 : index
    %c0_2 = arith.constant 0 : index
    %1 = vector.load %arg3[%c0_1, %c0_2] : memref<128x128xbf16, #tpu.memory_space<vmem>>, vector<128x128xbf16>
    %cst = arith.constant dense<0.000000e+00> : vector<64x128xf32>
    %2 = tpu.matmul %0, %1, %cst {dimension_numbers = #tpu.dot_dimension_numbers<[1], [0], [0], [1], [0, 0, 1, 1], [], []>} : vector<64x128xbf16>, vector<128x128xbf16>, vector<64x128xf32> -> vector<64x128xf32>
    %c0_3 = arith.constant 0 : index
    %c0_4 = arith.constant 0 : index
    %3 = vector.load %arg4[%c0_3, %c0_4] : memref<1x128xf32, #tpu.memory_space<vmem>>, vector<1x128xf32>
    %4 = vector.broadcast %3 : vector<1x128xf32> to vector<64x128xf32>
    %5 = arith.addf %2, %4 : vector<64x128xf32>
    %c0_5 = arith.constant 0 : index
    %c0_6 = arith.constant 0 : index
    %6 = vector.load %arg5[%c0_5, %c0_6] : memref<64x128xf32, #tpu.memory_space<vmem>>, vector<64x128xf32>
    tpu.vector_store %arg5[%c0_5, %c0_6], %5 {strides = array<i32>} : memref<64x128xf32, #tpu.memory_space<vmem>>, vector<64x128xf32>,
    return
  }
  func.func @transform_0(%arg0: i32, %arg1: i32) -> (i32, i32) {
    %c0_i32 = arith.constant 0 : i32
    %c0_i32_0 = arith.constant 0 : i32
    return %arg0, %c0_i32 : i32, i32
  }
  func.func @transform_1(%arg0: i32, %arg1: i32) -> (i32, i32) {
    %c0_i32 = arith.constant 0 : i32
    %c0_i32_0 = arith.constant 0 : i32
    return %c0_i32, %arg1 : i32, i32
  }
  func.func @transform_2(%arg0: i32, %arg1: i32) -> (i32, i32) {
    %c0_i32 = arith.constant 0 : i32
    %c0_i32_0 = arith.constant 0 : i32
    return %c0_i32, %arg1 : i32, i32
  }
  func.func @transform_3(%arg0: i32, %arg1: i32) -> (i32, i32) {
    %c0_i32 = arith.constant 0 : i32
    return %arg0, %arg1 : i32, i32
  }
}

</mosaic_0001>

<bundles_post_ra>
// kernel: enc_network_forward.4
= control target key start
LH: loop header
LB: loop body
LE: loop exit
PB: predicated region body
PF: predicated region fallthrough
CT: control target
= control target key end

     0   :  { %8 = vsyncpa [#allocation3], 0  ;;  %s1194_s0 = inlined_call_operand.vmem [shape: bf16[32,128], index: 0, kind: input, shape index: {}]   ;;  %s1195_s1 = inlined_call_operand.hbm [shape: bf16[6,128,384], index: 1, kind: input, shape index: {}]   ;;  %s1196_s2 = inlined_call_operand.hbm [shape: f32[6,1,384], index: 2, kind: input, shape index: {}]   ;;  %s1197_s3 = inlined_call_operand.vmem [shape: f32[6,32,384], index: 3, kind: output, shape index: {}]  }
   0x1   :  { %10 = vsyncpa [#allocation3 + $0x1], 0 }
   0x2   :  { %11 = vsyncpa [#allocation5], 0 }
   0x3   :  { %13 = vsyncpa [#allocation5 + $0x1], 0  ;;  %s1023_s12 = smov 0   ;;  %s1025_s13 = smov 0  }
   0x4   :  { %s1027_s14 = smov 0   ;;  %s1029_s15 = smov 0  }
   0x5   :  { %s1031_s16 = smov 0   ;;  %s1033_s17 = smov 0  }
   0x6 LB: > { %s668_s18 = sadd.s32 4294967295, %s999_s17   ;;  %s28_s19 = sadd.s32 1, %s995_s16  ;;  %s999_s17 = sphi %s1033_s17, %s19_s17   ;;  %s995_s16 = sphi %s1031_s16, %s1204_s16   ;;  %s991_s15 = sphi %s1029_s15, %s1203_s15   ;;  %s987_s14 = sphi %s1027_s14, %s1202_s14   ;;  %s983_s13 = sphi %s1025_s13, %s1201_s13   ;;  %s979_s12 = sphi %s1023_s12, %s1200_s12  }
   0x7   : > { %p29_p0 = scmp.ge.s32.totalorder %s28_s19, 6  ;;  %s64_s20 = sadd.s32 1, %s987_s14 }
   0x8   : > { %p71_p1 = scmp.ne.s32.totalorder %s987_s14, %s983_s13  ;;  %p72_p2 = scmp.eq.s32.totalorder %s999_s17, 0 }
   0x9   : > { %s1206_s19 = smov (%p29_p0, %s28_s19), 0  ;;  %p77_p4 = scmp.ne.s32.totalorder %s983_s13, %s979_s12 }
   0xa   : > { %p73_p3 = por %p72_p2, %p71_p1  ;;  %s61_s21 = ssub.s32 %s995_s16, %s1206_s19 }
   0xb   : > { %p78_p5 = scmp.eq.s32.totalorder %s668_s18, 0  ;;  %p62_p6 = scmp.eq.s32.totalorder %s61_s21, 0 }
   0xc   : > { %p834_p8 = scmp.lt.s32.totalorder %s999_s17, 6  ;;  %s164_s24 = sand.u32 1, %s987_s14  }
   0xd   : > { %p1062_p7 = por %p78_p5, %p77_p4  ;;  %s817_s25 = smul.u32 192, %s995_s16 }
   0xe   : > { %s1068_s23 = scalar_select %p62_p6, %s987_s14, %s64_s20  }
   0xf   : > { %s816_s26 = smul.u32 192, %s164_s24  ;;  %s173_s29 = scalar_lea.hbm %s1195_s1, %s817_s25 }
  0x10   : > { %p1075_p9 = pnand %p834_p8, %p73_p3  ;;  %s174_s4 = sshll.u32 %s173_s29, 4  ;;  %s175_s4 = int_to_ptr.hbm [resolvable:$true] %s174_s4 }
  0x11   : > { %s168_s5 = scalar_lea.vmem [#allocation2], %s816_s26  ;;  %s165_s7 = scalar_lea.sflag [#allocation3], %s164_s24 }
  0x12   : > { %s176_s6 = sshll.u32 %s168_s5, 4  ;;  %s1001_s8 = smov 192   ;;  %s177_s6 = int_to_ptr.vmem [resolvable:$true] %s176_s6 }
  0x13   : > { %s1002_s9 = smov 12   ;;  %p674_p10 = scmp.ge.s32.totalorder %s999_s17, 1 }
  0x14   : > { %830 = dma.hbm_to_vmem [thread:$0]  (!%p1075_p9), %s175_s4, 3072, %s177_s6, %s165_s7, %s1001_s8, %s1001_s8, %s1002_s9  }
  0x15   : > { %p203_p11 = scmp.lt.s32.totalorder %s999_s17, 7  ;;  %s818_s10 = smul.u32 3, %s164_s24 }
  0x16   : > { %s819_s11 = smul.u32 3, %s995_s16  ;;  %s187_s27 = scalar_lea.sflag [#allocation5], %s164_s24 }
  0x17   : > { %p204_p12 = pnand %p674_p10, %p203_p11  ;;  %s190_s21 = scalar_lea.vmem [#allocation4], %s818_s10 }
  0x18   : > { %s194_s20 = scalar_lea.hbm %s1196_s2, %s819_s11  ;;  %s198_s25 = sshll.u32 %s190_s21, 4  ;;  %s199_s25 = int_to_ptr.vmem [resolvable:$true] %s198_s25 }
  0x19   : > { %s196_s26 = sshll.u32 %s194_s20, 4  ;;  %207 = sbr.rel (%p204_p12) target bundleno = 230 (0xe6), region = 32  ;;  %s197_s26 = int_to_ptr.hbm [resolvable:$true] %s196_s26 }
  0x1a   : > { %833 = dma.hbm_to_vmem [thread:$0]  (!%p1075_p9), %s197_s26, 48, %s199_s25, %s187_s27  }
  0x1b   : > { %s209_s28 = sand.u32 (!%p204_p12), 1, %s983_s13  }
  0x1c   : > { %s820_s29 = smul.u32 (!%p204_p12), 192, %s209_s28  ;;  %s210_s4 = scalar_lea.sflag (!%p204_p12), [#allocation3], %s209_s28 }
  0x1e   : > { %s1090_s5 = scalar_lea.vmem [#allocation2], %s820_s29 }
  0x1f   : > { %970 = dma.done.wait (%p1062_p7), %s210_s4, 3072  }
  0x20   : > { %972 = vsyncadd (%p1062_p7), %s210_s4, 4294964224  ;;  %s821_s6 = smul.u32 3, %s209_s28  ;;  %s220_s7 = scalar_lea.sflag [#allocation5], %s209_s28 }
  0x22   : > { %s1096_s8 = scalar_lea.vmem [#allocation4], %s821_s6 }
  0x23   : > { %974 = dma.done.wait (%p1062_p7), %s220_s7, 48  }
  0x24   : > { %976 = vsyncadd (%p1062_p7), %s220_s7, 4294967248  ;;  %v805_v0 = vld [vmem:[%s1090_s5 + $0xac] sm:$0xf]  ;;  %v772_v1 = vld [vmem:[%s1090_s5 + $0xb4] sm:$0xf0]  ;;  %p269_p13 = scmp.lt.s32.totalorder %s991_s15, 5 }
  0x25   : > { %v778_v2 = vld [vmem:[%s1090_s5 + $0xb0] sm:$0xf]  ;;  %v775_v3 = vor.u32 %v805_v0, %v772_v1  ;;  %v807_v4 = vld [vmem:[%s1090_s5 + $0xb8] sm:$0xf0]  ;;  %v802_v5 = vld [vmem:[%s1090_s5 + $0x94] sm:$0xf] }
  0x26   : > { %v760_v6 = vld [vmem:[%s1090_s5 + $0x9c] sm:$0xf0]  ;;  %v779_v7 = vor.u32 %v807_v4, %v778_v2  ;;  %v766_v8 = vld [vmem:[%s1090_s5 + $0x98] sm:$0xf]  ;;  %v804_v9 = vld [vmem:[%s1090_s5 + $0xa0] sm:$0xf0] }
  0x27   : > { %v770_v10 = vld [vmem:[%s1090_s5 + $0xa8] sm:$0xf]  ;;  %482 = vmatpush.bf16.msra.mxu1 %v775_v3  ;;  %v763_v11 = vor.u32 %v802_v5, %v760_v6  ;;  %v806_v12 = vld [vmem:[%s1090_s5 + $0xb0] sm:$0xf0]  ;;  %v767_v13 = vor.u32 %v804_v9, %v766_v8  ;;  %v799_v15 = vld [vmem:[%s1090_s5 + $0x7c] sm:$0xf] }
  0x28   : > { %501 = vmatpush.bf16.msra.mxu2 %v779_v7  ;;  %v771_v14 = vor.u32 %v806_v12, %v770_v10  ;;  %v748_v16 = vld [vmem:[%s1090_s5 + $0x84] sm:$0xf0]  ;;  %v758_v17 = vld [vmem:[%s1090_s5 + $0x90] sm:$0xf]  ;;  %v754_v18 = vld [vmem:[%s1090_s5 + $0x80] sm:$0xf] }
  0x29   : > { %v801_v19 = vld [vmem:[%s1090_s5 + $0x88] sm:$0xf0]  ;;  %v803_v20 = vld [vmem:[%s1090_s5 + $0x98] sm:$0xf0]  ;;  %v751_v22 = vor.u32 %v799_v15, %v748_v16  ;;  %v746_v23 = vld [vmem:[%s1090_s5 + $0x78] sm:$0xf] }
  0x2a   : > { %808 = vmatpush.bf16.msra.mxu3 %v771_v14  ;;  %v759_v21 = vor.u32 %v803_v20, %v758_v17  ;;  %463 = vmatpush.bf16.msra.mxu0 %v771_v14  ;;  %v800_v24 = vld [vmem:[%s1090_s5 + $0x80] sm:$0xf0]  ;;  %v755_v25 = vor.u32 %v801_v19, %v754_v18  ;;  %v736_v27 = vld [vmem:[%s1090_s5 + $0x6c] sm:$0xf0]  ;;  %v742_v28 = vld [vmem:[%s1090_s5 + $0x68] sm:$0xf] }
  0x2b   : > { %483 = vmatpush.bf16.msra.mxu1 %v763_v11  ;;  %v796_v26 = vld [vmem:[%s1090_s5 + $0x64] sm:$0xf]  ;;  %v798_v29 = vld [vmem:[%s1090_s5 + $0x70] sm:$0xf0]  ;;  %v747_v30 = vor.u32 %v800_v24, %v746_v23  ;;  %v734_v32 = vld [vmem:[%s1090_s5 + $0x60] sm:$0xf] }
  0x2c   : > { %502 = vmatpush.bf16.msra.mxu2 %v767_v13  ;;  %v739_v31 = vor.u32 %v796_v26, %v736_v27  ;;  %v797_v33 = vld [vmem:[%s1090_s5 + $0x68] sm:$0xf0]  ;;  %v743_v34 = vor.u32 %v798_v29, %v742_v28  ;;  %v724_v36 = vld [vmem:[%s1090_s5 + $0x54] sm:$0xf0]  ;;  %v730_v37 = vld [vmem:[%s1090_s5 + $0x50] sm:$0xf] }
  0x2d   : > { %v793_v35 = vld [vmem:[%s1090_s5 + $0x4c] sm:$0xf]  ;;  %v795_v38 = vld [vmem:[%s1090_s5 + $0x58] sm:$0xf0]  ;;  %v735_v39 = vor.u32 %v797_v33, %v734_v32  ;;  %v722_v41 = vld [vmem:[%s1090_s5 + $0x48] sm:$0xf] }
  0x2e   : > { %809 = vmatpush.bf16.msra.mxu3 %v759_v21  ;;  %464 = vmatpush.bf16.msra.mxu0 %v759_v21  ;;  %v727_v40 = vor.u32 %v793_v35, %v724_v36  ;;  %v794_v42 = vld [vmem:[%s1090_s5 + $0x50] sm:$0xf0]  ;;  %v731_v43 = vor.u32 %v795_v38, %v730_v37  ;;  %v712_v45 = vld [vmem:[%s1090_s5 + $0x3c] sm:$0xf0]  ;;  %v718_v46 = vld [vmem:[%s1090_s5 + $0x38] sm:$0xf] }
  0x2f   : > { %484 = vmatpush.bf16.msra.mxu1 %v751_v22  ;;  %v790_v44 = vld [vmem:[%s1090_s5 + $0x34] sm:$0xf]  ;;  %v792_v47 = vld [vmem:[%s1090_s5 + $0x40] sm:$0xf0]  ;;  %v723_v48 = vor.u32 %v794_v42, %v722_v41  ;;  %v710_v50 = vld [vmem:[%s1090_s5 + $0x30] sm:$0xf] }
  0x30   : > { %503 = vmatpush.bf16.msra.mxu2 %v755_v25  ;;  %v715_v49 = vor.u32 %v790_v44, %v712_v45  ;;  %v791_v51 = vld [vmem:[%s1090_s5 + $0x38] sm:$0xf0]  ;;  %v719_v52 = vor.u32 %v792_v47, %v718_v46  ;;  %v700_v54 = vld [vmem:[%s1090_s5 + $0x24] sm:$0xf0]  ;;  %v706_v55 = vld [vmem:[%s1090_s5 + $0x20] sm:$0xf] }
  0x31   : > { %v787_v53 = vld [vmem:[%s1090_s5 + $0x1c] sm:$0xf]  ;;  %v789_v56 = vld [vmem:[%s1090_s5 + $0x28] sm:$0xf0]  ;;  %v711_v57 = vor.u32 %v791_v51, %v710_v50  ;;  %v698_v59 = vld [vmem:[%s1090_s5 + $0x18] sm:$0xf] }
  0x32   : > { %810 = vmatpush.bf16.msra.mxu3 %v747_v30  ;;  %465 = vmatpush.bf16.msra.mxu0 %v747_v30  ;;  %v703_v58 = vor.u32 %v787_v53, %v700_v54  ;;  %v788_v60 = vld [vmem:[%s1090_s5 + $0x20] sm:$0xf0]  ;;  %v707_v61 = vor.u32 %v789_v56, %v706_v55  ;;  %v688_v63 = vld [vmem:[%s1090_s5 + $0xc] sm:$0xf0]  ;;  %v694_v0 = vld [vmem:[%s1090_s5 + $0x8] sm:$0xf] }
  0x33   : > { %485 = vmatpush.bf16.msra.mxu1 %v739_v31  ;;  %v784_v62 = vld [vmem:[%s1090_s5 + $0x4] sm:$0xf]  ;;  %v786_v1 = vld [vmem:[%s1090_s5 + $0x10] sm:$0xf0]  ;;  %v699_v2 = vor.u32 %v788_v60, %v698_v59  ;;  %v686_v4 = vld [vmem:[%s1090_s5] sm:$0xf] }
  0x34   : > { %504 = vmatpush.bf16.msra.mxu2 %v743_v34  ;;  %v691_v3 = vor.u32 %v784_v62, %v688_v63  ;;  %v785_v5 = vld [vmem:[%s1090_s5 + $0x8] sm:$0xf0]  ;;  %v695_v6 = vor.u32 %v786_v1, %v694_v0  ;;  %v782_v7 = vld [vmem:[%s1194_s0] sm:$0xff]  ;;  %s1208_s15 = smov (!%p269_p13, %s991_s15), 5 }
  0x35   : > { %v687_v8 = vor.u32 %v785_v5, %v686_v4  ;;  %v783_v9 = vld [vmem:[%s1194_s0 + $0x8] sm:$0xff]  ;;  %v315_v10 = vld [vmem:[%s1096_s8] sm:$0x7]  ;;  %s822_s10 = smul.u32 96, %s1208_s15 }
  0x36   : > { %811 = vmatpush.bf16.msra.mxu3 %v735_v39  ;;  %466 = vmatpush.bf16.msra.mxu0 %v735_v39  ;;  %v318_v11 = vperm.slane %v315_v10, 1  ;;  %v317_v14 = vperm.slane %v315_v10, 0  ;;  %v319_v15 = vperm.slane %v315_v10, 2 }
  0x37   : > { %486 = vmatpush.bf16.msra.mxu1 %v727_v40  ;;  %s1162_s18 = scalar_lea.vmem %s1197_s3, %s822_s10 }
  0x38   : > { %505 = vmatpush.bf16.msra.mxu2 %v731_v43 }
  0x3a   : > { %812 = vmatpush.bf16.msra.mxu3 %v723_v48  ;;  %467 = vmatpush.bf16.msra.mxu0 %v723_v48 }
  0x3b   : > { %487 = vmatpush.bf16.msra.mxu1 %v715_v49 }
  0x3c   : > { %506 = vmatpush.bf16.msra.mxu2 %v719_v52 }
  0x3e   : > { %813 = vmatpush.bf16.msra.mxu3 %v711_v57  ;;  %468 = vmatpush.bf16.msra.mxu0 %v711_v57 }
  0x3f   : > { %488 = vmatpush.bf16.msra.mxu1 %v703_v58 }
  0x40   : > { %507 = vmatpush.bf16.msra.mxu2 %v707_v61 }
  0x42   : > { %814 = vmatpush.bf16.msra.mxu3 %v699_v2  ;;  %469 = vmatpush.bf16.msra.mxu0 %v699_v2 }
  0x43   : > { %489 = vmatpush.bf16.msra.mxu1 %v691_v3 }
  0x44   : > { %508 = vmatpush.bf16.msra.mxu2 %v695_v6 }
  0x46   : > { %490 = vmatmul.bf16.vlgmr.msra.gmra.mxu1 %v782_v7  ;;  %815 = vmatpush.bf16.msra.mxu3 %v687_v8 }
  0x47   : > { %509 = vmatmul.bf16.vlgmr.msra.gmra.mxu2 %v782_v7  ;;  %470 = vmatpush.bf16.msra.mxu0 %v687_v8 }
  0x49   : > { %476 = vmatmul.bf16.vlgmr.msra.gmra.mxu3 %v783_v9 }
  0x4a   : > { %471 = vmatmul.bf16.vlgmr.msra.gmra.mxu0 %v782_v7 }
  0x56   : > { %495 = vmatmul.bf16.gmra.mxu1 %v783_v9 }
  0x57   : > { %514 = vmatmul.bf16.gmra.mxu2 %v783_v9 }
  0xc3   : > { %v491_v12 = vpop.f32.mrf.mxu1 }
  0xc4   : > { %v492_v13 = vadd.f32 %v491_v12, %v318_v11 }
  0xc6   : > { %521 = vst [vmem:[%s1162_s18 + $0x8] sm:$0xff] %v492_v13 }
  0xc7   : > { %v472_v16 = vpop.f32.mrf.mxu0 }
  0xc8   : > { %v473_v17 = vadd.f32 %v472_v16, %v317_v14 }
  0xca   : > { %v510_v18 = vpop.f32.mrf.mxu2  ;;  %520 = vst [vmem:[%s1162_s18] sm:$0xff] %v473_v17 }
  0xcb   : > { %v511_v19 = vadd.f32 %v510_v18, %v319_v15  ;;  %v493_v20 = vpop.f32.mrf.mxu1 }
  0xcc   : > { %v494_v21 = vadd.f32 %v493_v20, %v318_v11  ;;  %v477_v22 = vpop.f32.mrf.mxu3 }
  0xcd   : > { %522 = vst [vmem:[%s1162_s18 + $0x10] sm:$0xff] %v511_v19  ;;  %v478_v23 = vadd.f32 %v477_v22, %v317_v14 }
  0xce   : > { %524 = vst [vmem:[%s1162_s18 + $0x20] sm:$0xff] %v494_v21 }
  0xcf   : > { %526 = vst [vmem:[%s1162_s18 + $0x30] sm:$0xff] %v478_v23  ;;  %v474_v24 = vpop.f32.mrf.mxu0 }
  0xd0   : > { %v475_v25 = vadd.f32 %v474_v24, %v317_v14 }
  0xd2   : > { %v512_v26 = vpop.f32.mrf.mxu2  ;;  %523 = vst [vmem:[%s1162_s18 + $0x18] sm:$0xff] %v475_v25 }
  0xd3   : > { %v513_v27 = vadd.f32 %v512_v26, %v319_v15  ;;  %v496_v28 = vpop.f32.mrf.mxu1 }
  0xd4   : > { %v497_v29 = vadd.f32 %v496_v28, %v318_v11  ;;  %v479_v30 = vpop.f32.mrf.mxu3 }
  0xd5   : > { %525 = vst [vmem:[%s1162_s18 + $0x28] sm:$0xff] %v513_v27  ;;  %v480_v31 = vadd.f32 %v479_v30, %v317_v14 }
  0xd6   : > { %527 = vst [vmem:[%s1162_s18 + $0x38] sm:$0xff] %v497_v29 }
  0xd7   : > { %529 = vst [vmem:[%s1162_s18 + $0x48] sm:$0xff] %v480_v31 }
  0xda   : > { %v515_v32 = vpop.f32.mrf.mxu2 }
  0xdb   : > { %v516_v33 = vadd.f32 %v515_v32, %v319_v15  ;;  %v498_v34 = vpop.f32.mrf.mxu1 }
  0xdc   : > { %v499_v35 = vadd.f32 %v498_v34, %v318_v11 }
  0xdd   : > { %528 = vst [vmem:[%s1162_s18 + $0x40] sm:$0xff] %v516_v33 }
  0xde   : > { %530 = vst [vmem:[%s1162_s18 + $0x50] sm:$0xff] %v499_v35 }
  0xe2   : > { %v517_v36 = vpop.f32.mrf.mxu2 }
  0xe3   : > { %v518_v37 = vadd.f32 %v517_v36, %v319_v15 }
  0xe5   : > { %531 = vst [vmem:[%s1162_s18 + $0x58] sm:$0xff] %v518_v37 }
  0xe6 PF: > { %s19_s17 = sadd.s32 1, %s999_s17   ;;  %s1200_s12 = smov %s983_s13 }
  0xe7   : > { %p16_p0 = scmp.ge.s32.totalorder %s19_s17, 8   ;;  %s1201_s13 = smov %s987_s14 }
  0xe8   : > { %s1202_s14 = smov %s1068_s23  ;;  %s1203_s15 = smov %s995_s16 }
  0xe9   : > { %s1204_s16 = smov %s1206_s19  ;;  %18 = sbr.rel (!%p16_p0) target bundleno = 6 (0x6), region = 88 }
  0xee   :  { %564 = vsyncpa [#allocation3], 1 }
  0xef   :  { %566 = vsyncpa [#allocation3 + $0x1], 1 }
  0xf0   :  { %567 = vsyncpa [#allocation5], 1 }
  0xf1   :  { %569 = vsyncpa [#allocation5 + $0x1], 1 }

// kernel: enc_network_forward.7
= control target key start
LH: loop header
LB: loop body
LE: loop exit
PB: predicated region body
PF: predicated region fallthrough
CT: control target
= control target key end

     0   :  { %s323_s1 = inlined_call_operand.vmem [shape: bf16[128,128], index: 1, kind: input, shape index: {}]   ;;  %s324_s2 = inlined_call_operand.vmem [shape: f32[1,128], index: 2, kind: input, shape index: {}]   ;;  %s325_s0 = inlined_call_operand.vmem [shape: bf16[64,128], index: 0, kind: input, shape index: {}]   ;;  %s326_s3 = inlined_call_operand.vmem [shape: f32[64,128], index: 3, kind: output, shape index: {}]  }
   0x1   :  { %v214_v0 = vld [vmem:[%s323_s1 + $0x38] sm:$0xff]  ;;  %v213_v1 = vld [vmem:[%s323_s1 + $0x30] sm:$0xff]  ;;  %v212_v2 = vld [vmem:[%s323_s1 + $0x28] sm:$0xff] }
   0x2   :  { %114 = vmatpush.bf16.msra.mxu0 %v214_v0  ;;  %215 = vmatpush.bf16.msra.mxu1 %v214_v0  ;;  %v211_v3 = vld [vmem:[%s323_s1 + $0x20] sm:$0xff]  ;;  %v210_v4 = vld [vmem:[%s323_s1 + $0x18] sm:$0xff]  ;;  %v209_v5 = vld [vmem:[%s323_s1 + $0x10] sm:$0xff] }
   0x3   :  { %216 = vmatpush.bf16.msra.mxu2 %v214_v0  ;;  %217 = vmatpush.bf16.msra.mxu3 %v214_v0  ;;  %v208_v6 = vld [vmem:[%s323_s1 + $0x8] sm:$0xff]  ;;  %v207_v7 = vld [vmem:[%s323_s1] sm:$0xff]  ;;  %v205_v10 = vld [vmem:[%s325_s0 + $0x10] sm:$0xff] }
   0x4   :  { %v203_v8 = vld [vmem:[%s325_s0] sm:$0xff]  ;;  %v204_v9 = vld [vmem:[%s325_s0 + $0x8] sm:$0xff]  ;;  %v206_v11 = vld [vmem:[%s325_s0 + $0x18] sm:$0xff] }
   0x5   :  { %v239_v12 = vld [vmem:[%s324_s2] ss:$0 sm:$0xff] }
   0x6   :  { %115 = vmatpush.bf16.msra.mxu0 %v213_v1  ;;  %218 = vmatpush.bf16.msra.mxu1 %v213_v1 }
   0x7   :  { %219 = vmatpush.bf16.msra.mxu2 %v213_v1  ;;  %220 = vmatpush.bf16.msra.mxu3 %v213_v1 }
   0xa   :  { %116 = vmatpush.bf16.msra.mxu0 %v212_v2  ;;  %221 = vmatpush.bf16.msra.mxu1 %v212_v2 }
   0xb   :  { %222 = vmatpush.bf16.msra.mxu2 %v212_v2  ;;  %223 = vmatpush.bf16.msra.mxu3 %v212_v2 }
   0xe   :  { %117 = vmatpush.bf16.msra.mxu0 %v211_v3  ;;  %224 = vmatpush.bf16.msra.mxu1 %v211_v3 }
   0xf   :  { %225 = vmatpush.bf16.msra.mxu2 %v211_v3  ;;  %226 = vmatpush.bf16.msra.mxu3 %v211_v3 }
  0x12   :  { %118 = vmatpush.bf16.msra.mxu0 %v210_v4  ;;  %227 = vmatpush.bf16.msra.mxu1 %v210_v4 }
  0x13   :  { %228 = vmatpush.bf16.msra.mxu2 %v210_v4  ;;  %229 = vmatpush.bf16.msra.mxu3 %v210_v4 }
  0x16   :  { %119 = vmatpush.bf16.msra.mxu0 %v209_v5  ;;  %230 = vmatpush.bf16.msra.mxu1 %v209_v5 }
  0x17   :  { %231 = vmatpush.bf16.msra.mxu2 %v209_v5  ;;  %232 = vmatpush.bf16.msra.mxu3 %v209_v5 }
  0x1a   :  { %120 = vmatpush.bf16.msra.mxu0 %v208_v6  ;;  %233 = vmatpush.bf16.msra.mxu1 %v208_v6 }
  0x1b   :  { %234 = vmatpush.bf16.msra.mxu2 %v208_v6  ;;  %235 = vmatpush.bf16.msra.mxu3 %v208_v6 }
  0x1e   :  { %121 = vmatpush.bf16.msra.mxu0 %v207_v7  ;;  %236 = vmatpush.bf16.msra.mxu1 %v207_v7 }
  0x1f   :  { %237 = vmatpush.bf16.msra.mxu2 %v207_v7  ;;  %238 = vmatpush.bf16.msra.mxu3 %v207_v7 }
  0x21   :  { %122 = vmatmul.bf16.vlgmr.msra.gmra.mxu0 %v203_v8  ;;  %127 = vmatmul.bf16.vlgmr.msra.gmra.mxu1 %v204_v9 }
  0x22   :  { %132 = vmatmul.bf16.vlgmr.msra.gmra.mxu2 %v205_v10  ;;  %137 = vmatmul.bf16.vlgmr.msra.gmra.mxu3 %v206_v11 }
  0x9e   :  { %v123_v13 = vpop.f32.mrf.mxu0  ;;  %v128_v14 = vpop.f32.mrf.mxu1 }
  0x9f   :  { %v124_v15 = vadd.f32 %v239_v12, %v123_v13  ;;  %v129_v16 = vadd.f32 %v239_v12, %v128_v14 }
  0xa1   :  { %143 = vst [vmem:[%s326_s3] sm:$0xff] %v124_v15 }
  0xa2   :  { %145 = vst [vmem:[%s326_s3 + $0x10] sm:$0xff] %v129_v16 }
  0xa5   :  { %v133_v17 = vpop.f32.mrf.mxu2  ;;  %v138_v18 = vpop.f32.mrf.mxu3 }
  0xa6   :  { %v134_v19 = vadd.f32 %v239_v12, %v133_v17  ;;  %v139_v20 = vadd.f32 %v239_v12, %v138_v18  ;;  %v125_v21 = vpop.f32.mrf.mxu0  ;;  %v130_v22 = vpop.f32.mrf.mxu1 }
  0xa7   :  { %v126_v23 = vadd.f32 %v239_v12, %v125_v21  ;;  %v131_v24 = vadd.f32 %v239_v12, %v130_v22 }
  0xa8   :  { %147 = vst [vmem:[%s326_s3 + $0x20] sm:$0xff] %v134_v19 }
  0xa9   :  { %149 = vst [vmem:[%s326_s3 + $0x30] sm:$0xff] %v139_v20 }
  0xaa   :  { %144 = vst [vmem:[%s326_s3 + $0x8] sm:$0xff] %v126_v23 }
  0xab   :  { %146 = vst [vmem:[%s326_s3 + $0x18] sm:$0xff] %v131_v24 }
  0xad   :  { %v135_v25 = vpop.f32.mrf.mxu2  ;;  %v140_v26 = vpop.f32.mrf.mxu3 }
  0xae   :  { %v136_v27 = vadd.f32 %v239_v12, %v135_v25  ;;  %v141_v28 = vadd.f32 %v239_v12, %v140_v26 }
  0xb0   :  { %148 = vst [vmem:[%s326_s3 + $0x28] sm:$0xff] %v136_v27 }
  0xb1   :  { %150 = vst [vmem:[%s326_s3 + $0x38] sm:$0xff] %v141_v28 }

// kernel: enc_network_forward.5
= control target key start
LH: loop header
LB: loop body
LE: loop exit
PB: predicated region body
PF: predicated region fallthrough
CT: control target
= control target key end

     0   :  { %s1332_s24 = smov [#allocation5]   ;;  %s1762_s0 = inlined_call_operand.hbm [shape: s32[4], index: 0, kind: input, shape index: {}]   ;;  %s1763_s1 = inlined_call_operand.vmem [shape: f32[2,8,8,384], index: 1, kind: input, shape index: {}]   ;;  %s1764_s2 = inlined_call_operand.hbm [shape: f32[2,2,128,384], index: 2, kind: input, shape index: {}]   ;;  %s1765_s3 = inlined_call_operand.hbm [shape: f32[2,2,1,384], index: 3, kind: input, shape index: {}]   ;;  %s1766_s4 = inlined_call_operand.vmem [shape: f32[2,2,128,128], index: 4, kind: input, shape index: {}]   ;;  %s1767_s5 = inlined_call_operand.hbm [shape: f32[2,1,128], index: 5, kind: input, shape index: {}]   ;;  %s1768_s6 = inlined_call_operand.vmem [shape: f32[2,4,128], index: 6, kind: output, shape index: {}]  }
   0x1   :  { %1769 = sst [smem:[#allocation14_spill]] %s1765_s3  ;;  %s12_s23 = sshll.u32 %s1762_s0, 4  ;;  %s13_s23 = int_to_ptr.hbm [resolvable:$true] %s12_s23 }
   0x2   :  { %15 = dma.hbm_to_smem %s13_s23, 16, %s1332_s24, [#allocation4] }
   0x3   :  { %1294 = dma.done.wait [#allocation4], 16 }
   0x4   :  { %1295 = vsyncadd [#allocation4], 4294967280 }
   0x5   :  { %18 = sfence }
   0x6   :  { %19 = vsyncpa [#allocation7], 0 }
   0x7   :  { %21 = vsyncpa [#allocation7 + $0x1], 0 }
   0x8   :  { %22 = vsyncpa [#allocation9], 0 }
   0x9   :  { %24 = vsyncpa [#allocation9 + $0x1], 0  ;;  %s1375_s25 = smov 0   ;;  %s1377_s26 = smov 0  }
   0xa   :  { %s1379_s27 = smov 0   ;;  %s1381_s28 = smov 0  }
   0xb LB: > { %s1394_s0 = sadd.s32 4294967295, %s1318_s28   ;;  %s1397_s29 = sadd.s32 1, %s1318_s28   ;;  %s1318_s28 = sphi %s1381_s28, %s1784_s28   ;;  %s1314_s27 = sphi %s1379_s27, %s1783_s27   ;;  %s1310_s26 = sphi %s1377_s26, %s1782_s26   ;;  %s1306_s25 = sphi %s1375_s25, %s1781_s25  }
   0xc   : > { %s60_s30 = ssub.s32 %s1318_s28, %s1397_s29  ;;  %s63_s7 = sadd.s32 1, %s1314_s27 }
   0xd   : > { %p61_p0 = scmp.eq.s32.totalorder %s60_s30, 0  ;;  %p70_p1 = scmp.ne.s32.totalorder %s1314_s27, %s1310_s26 }
   0xe   : > { %p71_p2 = scmp.eq.s32.totalorder %s1318_s28, 0  ;;  %p76_p3 = scmp.ne.s32.totalorder %s1310_s26, %s1306_s25 }
   0xf   : > { %s1407_s8 = scalar_select %p61_p0, %s1314_s27, %s63_s7  }
  0x10   : > { %p72_p4 = por %p71_p2, %p70_p1  ;;  %p77_p5 = scmp.eq.s32.totalorder %s1394_s0, 0 }
  0x11   : > { %p1081_p6 = scmp.lt.s32.totalorder %s1318_s28, 2  ;;  %s1416_s10 = sand.u32 1, %s1314_s27  }
  0x12   : > { %p1411_p7 = por %p77_p5, %p76_p3  ;;  %s234_s12 = sand.u32 1, %s1318_s28  }
  0x13   : > { %p1418_p8 = pnand %p1081_p6, %p72_p4  ;;  %s1060_s13 = smul.u32 6, %s1416_s10 }
  0x14   : > { %s1061_s14 = smul.u32 6, %s1318_s28  ;;  %s1772_s3 = sld [smem:[#allocation14_spill]] }
  0x15   : > { %s238_s18 = scalar_lea.vmem [#allocation8], %s1060_s13  ;;  %s1428_s21 = scalar_lea.sflag [#allocation9], %s234_s12 }
  0x16   : > { %s245_s19 = sshll.u32 %s238_s18, 4  ;;  %p1180_p10 = pneg %p1418_p8  ;;  %s246_s19 = int_to_ptr.vmem [resolvable:$true] %s245_s19 }
  0x1a   : > { %s242_s17 = scalar_lea.hbm %s1772_s3, %s1061_s14  ;;  %s1183_s30 = scalar_lea.hbm %s1772_s3, 12 }
  0x1b   : > { %s243_s20 = sshll.u32 %s242_s17, 4  ;;  %s244_s20 = int_to_ptr.hbm [resolvable:$true] %s243_s20 }
  0x1c   : > { %s1176_s22 = sshra.s32 %s244_s20, 4  ;;  %s1177_s22 = int_to_ptr.hbm [resolvable:$true] %s1176_s22 }
  0x1d   : > { %s1178_s23 = scalar_lea.hbm %s1177_s22, 6  ;;  %p1184_p13 = scmp.lt.s32.totalorder %s1177_s22, %s1772_s3 }
  0x1e   : > { %p1179_p9 = scmp.ne.s32.totalorder %s1177_s22, %s1178_s23  ;;  %p1185_p0 = scmp.lt.s32.totalorder %s1183_s30, %s1178_s23 }
  0x20   : > { %p1181_p11 = pnand %p1180_p10, %p1179_p9  ;;  %p1186_p1 = por %p1185_p0, %p1184_p13 }
  0x22   : > { %p1182_p12 = pneg %p1181_p11 }
  0x24   : > { %p1187_p2 = pnand %p1186_p1, %p1182_p12 }
  0x26   : > { %1190 = shalt.err (!%p1187_p2)
}
  0x27   : > { %s1333_s12 = smov 48   ;;  %s1334_s14 = smov 3  }
  0x28   : > { %1077 = dma.hbm_to_vmem [thread:$0]  (!%p1418_p8), %s244_s20, 96, %s246_s19, %s1428_s21, %s1333_s12, %s1333_s12, %s1334_s14  }
  0x29   : > { %p975_p3 = scmp.ge.s32.totalorder %s1318_s28, 1  ;;  %p278_p4 = scmp.lt.s32.totalorder %s1318_s28, 3 }
  0x2a   : > { %s1058_s15 = smul.u32 768, %s1416_s10  ;;  %s213_s7 = scalar_lea.sflag [#allocation7], %s1416_s10 }
  0x2b   : > { %p1447_p5 = pnand %p975_p3, %p278_p4  ;;  %s1059_s17 = smul.u32 768, %s1318_s28 }
  0x2c   : > { %s216_s24 = scalar_lea.vmem [#allocation6], %s1058_s15  ;;  %s1213_s14 = scalar_lea.hbm %s1764_s2, 1536 }
  0x2d   : > { %s221_s23 = scalar_lea.hbm %s1764_s2, %s1059_s17  ;;  %s224_s25 = sshll.u32 %s216_s24, 4  ;;  %s225_s25 = int_to_ptr.vmem [resolvable:$true] %s224_s25 }
  0x2e   : > { %s222_s30 = sshll.u32 %s221_s23, 4  ;;  %s223_s30 = int_to_ptr.hbm [resolvable:$true] %s222_s30 }
  0x2f   : > { %s1206_s19 = sshra.s32 %s223_s30, 4  ;;  %s1207_s19 = int_to_ptr.hbm [resolvable:$true] %s1206_s19 }
  0x30   : > { %s1208_s20 = scalar_lea.hbm %s1207_s19, 768  ;;  %p1214_p12 = scmp.lt.s32.totalorder %s1207_s19, %s1764_s2 }
  0x31   : > { %p1209_p6 = scmp.ne.s32.totalorder %s1207_s19, %s1208_s20  ;;  %p1215_p13 = scmp.lt.s32.totalorder %s1213_s14, %s1208_s20 }
  0x33   : > { %p1211_p9 = pnand %p1209_p6, %p1180_p10  ;;  %p1216_p0 = por %p1215_p13, %p1214_p12 }
  0x35   : > { %p1212_p11 = pneg %p1211_p9 }
  0x37   : > { %p1217_p1 = pnand %p1216_p0, %p1212_p11 }
  0x39   : > { %1220 = shalt.err (!%p1217_p1)
}
  0x3a   : > { %s1335_s15 = smov 384   ;;  %s1336_s22 = smov 24  }
  0x3b   : > { %1074 = dma.hbm_to_vmem [thread:$0]  (!%p1418_p8), %s223_s30, 12288, %s225_s25, %s213_s7, %s1335_s15, %s1335_s15, %s1336_s22  }
  0x3c   : > { %s269_s13 = scalar_lea.hbm %s1767_s5, %s1318_s28  ;;  %s266_s3 = scalar_lea.vmem [#allocation10], %s1416_s10 }
  0x3d   : > { %s271_s12 = sshll.u32 %s269_s13, 4  ;;  %s273_s18 = sshll.u32 %s266_s3, 4  ;;  %s272_s12 = int_to_ptr.hbm [resolvable:$true] %s271_s12  ;;  %s274_s18 = int_to_ptr.vmem [resolvable:$true] %s273_s18 }
  0x3e   : > { %s1236_s19 = sshra.s32 %s272_s12, 4  ;;  %s1243_s25 = scalar_lea.hbm %s1767_s5, 2  ;;  %s1237_s19 = int_to_ptr.hbm [resolvable:$true] %s1236_s19 }
  0x3f   : > { %s1238_s20 = scalar_lea.hbm %s1237_s19, 1  ;;  %p1244_p6 = scmp.lt.s32.totalorder %s1237_s19, %s1767_s5 }
  0x40   : > { %p1239_p2 = scmp.ne.s32.totalorder %s1237_s19, %s1238_s20  ;;  %p1245_p9 = scmp.lt.s32.totalorder %s1243_s25, %s1238_s20 }
  0x42   : > { %p1241_p3 = pnand %p1239_p2, %p1180_p10  ;;  %p1246_p11 = por %p1245_p9, %p1244_p6 }
  0x44   : > { %p1242_p4 = pneg %p1241_p3 }
  0x46   : > { %p1247_p12 = pnand %p1246_p11, %p1242_p4 }
  0x48   : > { %1250 = shalt.err (!%p1247_p12)
}
  0x49   : > { %1080 = dma.hbm_to_vmem [thread:$0]  (!%p1418_p8), %s272_s12, 16, %s274_s18, %s1428_s21  }
  0x4a   : > { %282 = sbr.rel (%p1447_p5) target bundleno = 475 (0x1db), region = 40  ;;  %s1487_s3 = sand.u32 (!%p1447_p5), 1, %s1310_s26  }
  0x4b   : > { %s1062_s28 = smul.u32 (!%p1447_p5), 768, %s1487_s3  ;;  %s285_s10 = scalar_lea.sflag (!%p1447_p5), [#allocation7], %s1487_s3 }
  0x4d   : > { %s1491_s15 = scalar_lea.vmem (!%p1447_p5), [#allocation6], %s1062_s28 }
  0x4f   : > { %1297 = dma.done.wait (%p1411_p7), %s285_s10, 12288  }
  0x50   : > { %1299 = vsyncadd (%p1411_p7), %s285_s10, 4294955008  ;;  %s294_s11 = sand.u32 1, %s1394_s0   ;;  %s1063_s21 = smul.u32 6, %s1487_s3 }
  0x51   : > { %s295_s16 = scalar_lea.sflag [#allocation9], %s294_s11 }
  0x52   : > { %s1499_s22 = scalar_lea.vmem [#allocation8], %s1063_s21 }
  0x53   : > { %1301 = dma.done.wait (%p1411_p7), %s295_s16, 112  }
  0x54   : > { %1303 = vsyncadd (%p1411_p7), %s295_s16, 4294967184  ;;  %p353_p8 = scmp.lt.s32.totalorder %s1394_s0, 1  ;;  %v367_v0 = vlaneseq  ;;  %s307_s7 = scalar_lea.vmem [#allocation10], %s1487_s3  ;;  %v1525_v2 = vmov 0.0   ;;  %v1527_v3 = vmov 0.0  }
  0x55   : > { %s1529_s28 = smov 0  }
  0x56   : > { %s1786_s0 = smov (!%p353_p8, %s1394_s0), 1  ;;  %v1507_v1 = vshrl.u32 %v367_v0, 7 }
  0x57   : > { %s1064_s23 = smul.u32 192, %s1786_s0  ;;  %s1055_s24 = sshll.u32 %s1786_s0, 8 }
  0x58   : > { %s1512_s18 = scalar_lea.vmem %s1766_s4, %s1055_s24  ;;  %s979_s19 = sshll.u32 %s1786_s0, 2 }
  0x59   : > { %s1517_s9 = scalar_lea.vmem %s1763_s1, %s1064_s23  ;;  %s1522_s30 = scalar_lea.vmem %s1768_s6, %s979_s19 }
  0x5a LB: >> { %v429_v4 = vld [vmem:[%s1491_s15 + $0x168] sm:$0xff]  ;;  %v426_v5 = vld [vmem:[%s1491_s15 + $0x150] sm:$0xff]  ;;  %v423_v8 = vld [vmem:[%s1491_s15 + $0x138] sm:$0xff]  ;;  %s1056_s0 = smul.u32 24, %s1330_s28  ;;  %s560_s10 = ssub.s32 7, %s1330_s28  ;;  %s1330_s28 = sphi %s1529_s28, %s374_s28   ;;  %v1326_v3 = vphi %v1527_v3, %v1780_v3   ;;  %v1322_v2 = vphi %v1525_v2, %v731_v2  }
  0x5b   : >> { %v1030_v6 = vld [vmem:[%s1491_s15 + $0x2e8] sm:$0xff]  ;;  %440 = vmatpush.msra.mxu0 %v429_v4  ;;  %v1027_v7 = vld [vmem:[%s1491_s15 + $0x2d0] sm:$0xff]  ;;  %v1024_v9 = vld [vmem:[%s1491_s15 + $0x2b8] sm:$0xff]  ;;  %s1057_s21 = smul.u32 24, %s560_s10  ;;  %s547_s23 = sld [smem:[#allocation5 + %s1330_s28]] }
  0x5c   : >> { %625 = vmatpush.msra.mxu3 %v1030_v6  ;;  %v430_v10 = vld [vmem:[%s1491_s15 + $0x170] sm:$0xff]  ;;  %v427_v11 = vld [vmem:[%s1491_s15 + $0x158] sm:$0xff]  ;;  %v420_v12 = vld [vmem:[%s1491_s15 + $0x120] sm:$0xff]  ;;  %s1646_s11 = scalar_lea.vmem %s1517_s9, %s1056_s0  ;;  %s377_s13 = ssub.s32 3, %s1330_s28 }
  0x5d   : >> { %441 = vmatpush.msra.mxu0 %v426_v5  ;;  %460 = vmatpush.msra.mxu1 %v430_v10  ;;  %v1021_v13 = vld [vmem:[%s1491_s15 + $0x2a0] sm:$0xff]  ;;  %v417_v15 = vld [vmem:[%s1491_s15 + $0x108] sm:$0xff]  ;;  %v414_v18 = vld [vmem:[%s1491_s15 + $0xf0] sm:$0xff]  ;;  %s1653_s16 = scalar_lea.vmem %s1517_s9, %s1057_s21  ;;  %s732_s12 = sld [smem:[#allocation5 + %s377_s13]] }
  0x5e   : >> { %626 = vmatpush.msra.mxu3 %v1027_v7  ;;  %v424_v14 = vld [vmem:[%s1491_s15 + $0x140] sm:$0xff]  ;;  %v1018_v16 = vld [vmem:[%s1491_s15 + $0x288] sm:$0xff]  ;;  %v1015_v19 = vld [vmem:[%s1491_s15 + $0x270] sm:$0xff]  ;;  %s558_s19 = scalar_lea.vmem [#allocation2], %s1330_s28  ;;  %s743_s14 = scalar_lea.vmem [#allocation3], %s377_s13 }
  0x5f   : >> { %442 = vmatpush.msra.mxu0 %v423_v8  ;;  %461 = vmatpush.msra.mxu1 %v427_v11  ;;  %v421_v17 = vld [vmem:[%s1491_s15 + $0x128] sm:$0xff]  ;;  %v418_v20 = vld [vmem:[%s1491_s15 + $0x110] sm:$0xff]  ;;  %v411_v21 = vld [vmem:[%s1491_s15 + $0xd8] sm:$0xff]  ;;  %s374_s28 = sadd.s32 1, %s1330_s28  }
  0x60   : >> { %627 = vmatpush.msra.mxu3 %v1024_v9  ;;  %v1012_v22 = vld [vmem:[%s1491_s15 + $0x258] sm:$0xff]  ;;  %v408_v25 = vld [vmem:[%s1491_s15 + $0xc0] sm:$0xff]  ;;  %v425_v29 = vld [vmem:[%s1491_s15 + $0x148] sm:$0xff]  ;;  %p371_p7 = scmp.ge.s32.totalorder %s374_s28, 4  }
  0x61   : >> { %443 = vmatpush.msra.mxu0 %v420_v12  ;;  %462 = vmatpush.msra.mxu1 %v424_v14  ;;  %v415_v23 = vld [vmem:[%s1491_s15 + $0xf8] sm:$0xff]  ;;  %v1009_v26 = vld [vmem:[%s1491_s15 + $0x240] sm:$0xff]  ;;  %v405_v30 = vld [vmem:[%s1491_s15 + $0xa8] sm:$0xff]  ;;  %s983_s24 = sadd.s32 4294967295, %s547_s23 }
  0x62   : >> { %628 = vmatpush.msra.mxu3 %v1021_v13  ;;  %v431_v24 = vld [vmem:[%s1491_s15 + $0x178] sm:$0xff]  ;;  %v428_v27 = vld [vmem:[%s1491_s15 + $0x160] sm:$0xff]  ;;  %v1006_v31 = vld [vmem:[%s1491_s15 + $0x228] sm:$0xff] }
  0x63   : >> { %444 = vmatpush.msra.mxu0 %v417_v15  ;;  %463 = vmatpush.msra.mxu1 %v421_v17  ;;  %v412_v28 = vld [vmem:[%s1491_s15 + $0xe0] sm:$0xff]  ;;  %v409_v32 = vld [vmem:[%s1491_s15 + $0xc8] sm:$0xff]  ;;  %v422_v33 = vld [vmem:[%s1491_s15 + $0x130] sm:$0xff]  ;;  %s1036_s20 = sadd.s32 4294967295, %s732_s12 }
  0x64   : >> { %629 = vmatpush.msra.mxu3 %v1018_v16  ;;  %480 = vmatpush.msra.mxu2 %v431_v24  ;;  %v402_v34 = vld [vmem:[%s1491_s15 + $0x90] sm:$0xff]  ;;  %v419_v37 = vld [vmem:[%s1491_s15 + $0x118] sm:$0xff]  ;;  %v416_v41 = vld [vmem:[%s1491_s15 + $0x100] sm:$0xff] }
  0x65   : >> { %445 = vmatpush.msra.mxu0 %v414_v18  ;;  %464 = vmatpush.msra.mxu1 %v418_v20  ;;  %v1003_v35 = vld [vmem:[%s1491_s15 + $0x210] sm:$0xff]  ;;  %v399_v38 = vld [vmem:[%s1491_s15 + $0x78] sm:$0xff]  ;;  %v396_v42 = vld [vmem:[%s1491_s15 + $0x60] sm:$0xff] }
  0x66   : >> { %630 = vmatpush.msra.mxu3 %v1015_v19  ;;  %481 = vmatpush.msra.mxu2 %v428_v27  ;;  %v406_v36 = vld [vmem:[%s1491_s15 + $0xb0] sm:$0xff]  ;;  %v1000_v39 = vld [vmem:[%s1491_s15 + $0x1f8] sm:$0xff]  ;;  %v997_v43 = vld [vmem:[%s1491_s15 + $0x1e0] sm:$0xff] }
  0x67   : >> { %446 = vmatpush.msra.mxu0 %v411_v21  ;;  %465 = vmatpush.msra.mxu1 %v415_v23  ;;  %v403_v40 = vld [vmem:[%s1491_s15 + $0x98] sm:$0xff]  ;;  %v400_v44 = vld [vmem:[%s1491_s15 + $0x80] sm:$0xff]  ;;  %v413_v45 = vld [vmem:[%s1491_s15 + $0xe8] sm:$0xff] }
  0x68   : >> { %631 = vmatpush.msra.mxu3 %v1012_v22  ;;  %482 = vmatpush.msra.mxu2 %v425_v29  ;;  %v393_v46 = vld [vmem:[%s1491_s15 + $0x48] sm:$0xff]  ;;  %v410_v49 = vld [vmem:[%s1491_s15 + $0xd0] sm:$0xff]  ;;  %v407_v53 = vld [vmem:[%s1491_s15 + $0xb8] sm:$0xff] }
  0x69   : >> { %447 = vmatpush.msra.mxu0 %v408_v25  ;;  %466 = vmatpush.msra.mxu1 %v412_v28  ;;  %v994_v47 = vld [vmem:[%s1491_s15 + $0x1c8] sm:$0xff]  ;;  %v390_v50 = vld [vmem:[%s1491_s15 + $0x30] sm:$0xff]  ;;  %v387_v54 = vld [vmem:[%s1491_s15 + $0x18] sm:$0xff] }
  0x6a   : >> { %632 = vmatpush.msra.mxu3 %v1009_v26  ;;  %483 = vmatpush.msra.mxu2 %v422_v33  ;;  %v397_v48 = vld [vmem:[%s1491_s15 + $0x68] sm:$0xff]  ;;  %v991_v51 = vld [vmem:[%s1491_s15 + $0x1b0] sm:$0xff]  ;;  %v988_v55 = vld [vmem:[%s1491_s15 + $0x198] sm:$0xff] }
  0x6b   : >> { %448 = vmatpush.msra.mxu0 %v405_v30  ;;  %467 = vmatpush.msra.mxu1 %v409_v32  ;;  %v394_v52 = vld [vmem:[%s1491_s15 + $0x50] sm:$0xff]  ;;  %v391_v56 = vld [vmem:[%s1491_s15 + $0x38] sm:$0xff]  ;;  %v404_v57 = vld [vmem:[%s1491_s15 + $0xa0] sm:$0xff] }
  0x6c   : >> { %633 = vmatpush.msra.mxu3 %v1006_v31  ;;  %484 = vmatpush.msra.mxu2 %v419_v37  ;;  %v384_v58 = vld [vmem:[%s1491_s15] sm:$0xff]  ;;  %v1031_v60 = vld [vmem:[%s1491_s15 + $0x2f0] sm:$0xff]  ;;  %v1028_v62 = vld [vmem:[%s1491_s15 + $0x2d8] sm:$0xff] }
  0x6d   : >> { %449 = vmatpush.msra.mxu0 %v402_v34  ;;  %468 = vmatpush.msra.mxu1 %v406_v36  ;;  %v985_v59 = vld [vmem:[%s1491_s15 + $0x180] sm:$0xff]  ;;  %v401_v63 = vld [vmem:[%s1491_s15 + $0x88] sm:$0xff]  ;;  %v1032_v5 = vld [vmem:[%s1491_s15 + $0x2f8] sm:$0xff] }
  0x6e   : >> { %634 = vmatpush.msra.mxu3 %v1003_v35  ;;  %485 = vmatpush.msra.mxu2 %v416_v41  ;;  %v388_v61 = vld [vmem:[%s1491_s15 + $0x20] sm:$0xff]  ;;  %v385_v0 = vld [vmem:[%s1491_s15 + $0x8] sm:$0xff]  ;;  %v398_v6 = vld [vmem:[%s1491_s15 + $0x70] sm:$0xff] }
  0x6f   : >> { %450 = vmatpush.msra.mxu0 %v399_v38  ;;  %469 = vmatpush.msra.mxu1 %v403_v40  ;;  %v1025_v4 = vld [vmem:[%s1491_s15 + $0x2c0] sm:$0xff]  ;;  %v1022_v7 = vld [vmem:[%s1491_s15 + $0x2a8] sm:$0xff]  ;;  %v395_v9 = vld [vmem:[%s1491_s15 + $0x58] sm:$0xff] }
  0x70   : >> { %635 = vmatpush.msra.mxu3 %v1000_v39  ;;  %486 = vmatpush.msra.mxu2 %v413_v45  ;;  %v1029_v8 = vld [vmem:[%s1491_s15 + $0x2e0] sm:$0xff]  ;;  %v1019_v10 = vld [vmem:[%s1491_s15 + $0x290] sm:$0xff]  ;;  %v1026_v11 = vld [vmem:[%s1491_s15 + $0x2c8] sm:$0xff] }
  0x71   : >> { %451 = vmatpush.msra.mxu0 %v396_v42  ;;  %470 = vmatpush.msra.mxu1 %v400_v44  ;;  %v392_v12 = vld [vmem:[%s1491_s15 + $0x40] sm:$0xff]  ;;  %v1016_v13 = vld [vmem:[%s1491_s15 + $0x278] sm:$0xff]  ;;  %v1023_v14 = vld [vmem:[%s1491_s15 + $0x2b0] sm:$0xff] }
  0x72   : >> { %636 = vmatpush.msra.mxu3 %v997_v43  ;;  %487 = vmatpush.msra.mxu2 %v410_v49  ;;  %v389_v15 = vld [vmem:[%s1491_s15 + $0x28] sm:$0xff]  ;;  %v1013_v16 = vld [vmem:[%s1491_s15 + $0x260] sm:$0xff]  ;;  %v1020_v17 = vld [vmem:[%s1491_s15 + $0x298] sm:$0xff] }
  0x73   : >> { %452 = vmatpush.msra.mxu0 %v393_v46  ;;  %471 = vmatpush.msra.mxu1 %v397_v48  ;;  %v386_v18 = vld [vmem:[%s1491_s15 + $0x10] sm:$0xff]  ;;  %v1010_v19 = vld [vmem:[%s1491_s15 + $0x248] sm:$0xff]  ;;  %v1017_v20 = vld [vmem:[%s1491_s15 + $0x280] sm:$0xff] }
  0x74   : >> { %637 = vmatpush.msra.mxu3 %v994_v47  ;;  %488 = vmatpush.msra.mxu2 %v407_v53  ;;  %v1007_v21 = vld [vmem:[%s1491_s15 + $0x230] sm:$0xff]  ;;  %v1014_v22 = vld [vmem:[%s1491_s15 + $0x268] sm:$0xff]  ;;  %v1004_v23 = vld [vmem:[%s1491_s15 + $0x218] sm:$0xff] }
  0x75   : >> { %453 = vmatpush.msra.mxu0 %v390_v50  ;;  %472 = vmatpush.msra.mxu1 %v394_v52  ;;  %v1011_v24 = vld [vmem:[%s1491_s15 + $0x250] sm:$0xff]  ;;  %v1001_v25 = vld [vmem:[%s1491_s15 + $0x200] sm:$0xff]  ;;  %v1008_v26 = vld [vmem:[%s1491_s15 + $0x238] sm:$0xff] }
  0x76   : >> { %638 = vmatpush.msra.mxu3 %v991_v51  ;;  %489 = vmatpush.msra.mxu2 %v404_v57  ;;  %v998_v27 = vld [vmem:[%s1491_s15 + $0x1e8] sm:$0xff]  ;;  %v1005_v28 = vld [vmem:[%s1491_s15 + $0x220] sm:$0xff]  ;;  %v995_v29 = vld [vmem:[%s1491_s15 + $0x1d0] sm:$0xff] }
  0x77   : >> { %454 = vmatpush.msra.mxu0 %v387_v54  ;;  %473 = vmatpush.msra.mxu1 %v391_v56  ;;  %v1002_v30 = vld [vmem:[%s1491_s15 + $0x208] sm:$0xff]  ;;  %v992_v31 = vld [vmem:[%s1491_s15 + $0x1b8] sm:$0xff]  ;;  %v999_v32 = vld [vmem:[%s1491_s15 + $0x1f0] sm:$0xff] }
  0x78   : >> { %639 = vmatpush.msra.mxu3 %v988_v55  ;;  %490 = vmatpush.msra.mxu2 %v401_v63  ;;  %v989_v33 = vld [vmem:[%s1491_s15 + $0x1a0] sm:$0xff]  ;;  %v996_v34 = vld [vmem:[%s1491_s15 + $0x1d8] sm:$0xff]  ;;  %v986_v35 = vld [vmem:[%s1491_s15 + $0x188] sm:$0xff] }
  0x79   : >> { %455 = vmatpush.msra.mxu0 %v384_v58  ;;  %474 = vmatpush.msra.mxu1 %v388_v61  ;;  %v993_v36 = vld [vmem:[%s1491_s15 + $0x1c0] sm:$0xff]  ;;  %v990_v37 = vld [vmem:[%s1491_s15 + $0x1a8] sm:$0xff]  ;;  %v987_v38 = vld [vmem:[%s1491_s15 + $0x190] sm:$0xff] }
  0x7a   : >> { %640 = vmatpush.msra.mxu3 %v985_v59  ;;  %456 = vmatmul.f32.vlgmr.msra.gmra.mxu0 %v1326_v3  ;;  %v432_v39 = vld [vmem:[%s1499_s22] sm:$0x7]  ;;  %v1649_v41 = vld [vmem:[%s1499_s22 + $0x3] sm:$0x7]  ;;  %v381_v42 = vld [vmem:[%s1646_s11] sm:$0xff] }
  0x7b   : >> { %645 = vmatpush.msrb.mxu0 %v1031_v60  ;;  %641 = vmatmul.f32.vlgmr.msra.gmra.mxu3 %v1322_v2  ;;  %v434_v40 = vperm.slane %v432_v39, 0  ;;  %v435_v45 = vperm.slane %v432_v39, 1  ;;  %v619_v46 = vperm.slane %v1649_v41, 0  ;;  %v382_v48 = vld [vmem:[%s1646_s11 + $0x8] sm:$0xff]  ;;  %v564_v51 = vld [vmem:[%s1653_s16] sm:$0xff] }
  0x7c   : >> { %475 = vmatpush.msra.mxu1 %v385_v0  ;;  %491 = vmatpush.msra.mxu2 %v398_v6 }
  0x7d   : >> { %646 = vmatpush.msrb.mxu0 %v1028_v62  ;;  %476 = vmatmul.f32.vlgmr.msra.gmra.mxu1 %v1326_v3 }
  0x7e   : >> { %665 = vmatpush.msrb.mxu1 %v1032_v5  ;;  %492 = vmatpush.msra.mxu2 %v395_v9 }
  0x7f   : >> { %647 = vmatpush.msrb.mxu0 %v1025_v4 }
  0x80   : >> { %666 = vmatpush.msrb.mxu1 %v1029_v8  ;;  %493 = vmatpush.msra.mxu2 %v392_v12 }
  0x81   : >> { %648 = vmatpush.msrb.mxu0 %v1022_v7  ;;  %v436_v7 = vperm.slane %v432_v39, 2 }
  0x82   : >> { %667 = vmatpush.msrb.mxu1 %v1026_v11  ;;  %494 = vmatpush.msra.mxu2 %v389_v15 }
  0x83   : >> { %649 = vmatpush.msrb.mxu0 %v1019_v10 }
  0x84   : >> { %668 = vmatpush.msrb.mxu1 %v1023_v14  ;;  %495 = vmatpush.msra.mxu2 %v386_v18 }
  0x85   : >> { %650 = vmatpush.msrb.mxu0 %v1016_v13  ;;  %496 = vmatmul.f32.vlgmr.msra.gmra.mxu2 %v1326_v3 }
  0x86   : >> { %669 = vmatpush.msrb.mxu1 %v1020_v17 }
  0x87   : >> { %651 = vmatpush.msrb.mxu0 %v1013_v16  ;;  %v620_v16 = vperm.slane %v1649_v41, 1 }
  0x88   : >> { %670 = vmatpush.msrb.mxu1 %v1017_v20 }
  0x89   : >> { %652 = vmatpush.msrb.mxu0 %v1010_v19  ;;  %v734_v19 = vstv %s1036_s20 }
  0x8a   : >> { %671 = vmatpush.msrb.mxu1 %v1014_v22 }
  0x8b   : >> { %653 = vmatpush.msrb.mxu0 %v1007_v21 }
  0x8c   : >> { %672 = vmatpush.msrb.mxu1 %v1011_v24 }
  0x8d   : >> { %654 = vmatpush.msrb.mxu0 %v1004_v23 }
  0x8e   : >> { %673 = vmatpush.msrb.mxu1 %v1008_v26 }
  0x8f   : >> { %655 = vmatpush.msrb.mxu0 %v1001_v25  ;;  %v565_v25 = vld [vmem:[%s1653_s16 + $0x8] sm:$0xff] }
  0x90   : >> { %674 = vmatpush.msrb.mxu1 %v1005_v28 }
  0x91   : >> { %656 = vmatpush.msrb.mxu0 %v998_v27 }
  0x92   : >> { %675 = vmatpush.msrb.mxu1 %v1002_v30 }
  0x93   : >> { %657 = vmatpush.msrb.mxu0 %v995_v29 }
  0x94   : >> { %676 = vmatpush.msrb.mxu1 %v999_v32 }
  0x95   : >> { %658 = vmatpush.msrb.mxu0 %v992_v31  ;;  %v383_v31 = vld [vmem:[%s1646_s11 + $0x10] sm:$0xff] }
  0x96   : >> { %677 = vmatpush.msrb.mxu1 %v996_v34 }
  0x97   : >> { %659 = vmatpush.msrb.mxu0 %v989_v33 }
  0x98   : >> { %678 = vmatpush.msrb.mxu1 %v993_v36 }
  0x99   : >> { %660 = vmatpush.msrb.mxu0 %v986_v35 }
  0x9a   : >> { %661 = vmatmul.f32.vlgmr.msrb.gmra.mxu0 %v1322_v2  ;;  %679 = vmatpush.msrb.mxu1 %v990_v37 }
  0x9c   : >> { %680 = vmatpush.msrb.mxu1 %v987_v38 }
  0x9d   : >> { %681 = vmatmul.f32.vlgmr.msrb.gmra.mxu1 %v1322_v2 }
  0xf7   : >> { %v457_v43 = vpop.f32.mrf.mxu0 }
  0xf8   : >> { %v458_v44 = vadd.f32 %v457_v43, %v434_v40 }
  0xfa   : >> { %v500_v47 = vadd.f32 %v458_v44, %v381_v42  ;;  %v477_v49 = vpop.f32.mrf.mxu1 }
  0xfb   : >> { %v478_v53 = vadd.f32 %v477_v49, %v435_v45  ;;  %v1042_v49 = vld [vmem:[%s1512_s18 + $0xa8] sm:$0xff] (%p371_p7) }
  0xfc   : >> { %v981_v50 = vmul.f32 -1.442695, %v500_v47 }
  0xfd   : >> { %v501_v55 = vadd.f32 %v478_v53, %v382_v48  ;;  %v549_v48 = vstv %s983_s24 }
  0xfe   : >> { %v642_v52 = vpop.f32.mrf.mxu3  ;;  %1143 = vpow2.f32 %v981_v50  ;;  %vm550_vm11 = vcmp.eq.s32.totalorder %v1507_v1, %v549_v48  ;;  %v752_v48 = vld [vmem:[%s1512_s18 + $0x30] sm:$0xff] (%p371_p7) }
  0xff   : >> { %v643_v54 = vadd.f32 %v642_v52, %v619_v46  ;;  %v982_v57 = vmul.f32 -1.442695, %v501_v55 }
 0x101   : >> { %v685_v56 = vadd.f32 %v643_v54, %v564_v51  ;;  %1145 = vpow2.f32 %v982_v57  ;;  %v621_v51 = vperm.slane %v1649_v41, 2 }
 0x103   : >> { %v1034_v58 = vmul.f32 -1.442695, %v685_v56 }
 0x104   : >> { %v1144_v59 = vpop.eup %1143 }
 0x105   : >> { %1147 = vpow2.f32 %v1034_v58  ;;  %v508_v60 = vadd.f32 1.0, %v1144_v59 }
 0x107   : >> { %1149 = vrcp.f32 %v508_v60  ;;  %v1146_v61 = vpop.eup %1145  ;;  %v519_v6 = vand.u32 2147483647, %v508_v60  ;;  %v521_v8 = vand.u32 2147483648, %v508_v60  ;;  %vm515_vm0 = vweird.f32 %v508_v60 }
 0x108   : >> { %v509_v63 = vadd.f32 1.0, %v1146_v61  ;;  %v497_v9 = vpop.f32.mrf.mxu2 }
 0x109   : >> { %vm1663_vm2 = vcmp.eq.f32.partialorder %v519_v6, 8.507059e+37  ;;  %v498_v18 = vadd.f32 %v497_v9, %v436_v7  ;;  %v522_v20 = vor.u32 1.1754944e-38, %v521_v8 }
 0x10a   : >> { %1151 = vrcp.f32 %v509_v63  ;;  %vm530_vm3 = vweird.f32 %v509_v63  ;;  %v536_v17 = vand.u32 2147483648, %v509_v63  ;;  %v534_v24 = vand.u32 2147483647, %v509_v63 }
 0x10b   : >> { %v1148_v62 = vpop.eup %1147 }
 0x10c   : >> { %v1658_v0 = vadd.f32 1.0, %v1148_v62  ;;  %v537_v30 = vor.u32 1.1754944e-38, %v536_v17  ;;  %vm535_vm7 = vcmp.eq.f32.partialorder %v534_v24, 8.507059e+37 }
 0x10d   : >> { %v1150_v4 = vpop.eup %1149 }
 0x10e   : >> { %1153 = vrcp.f32 %v1658_v0  ;;  %v511_v5 = vmul.f32 %v1150_v4, %v508_v60  ;;  %vm516_vm1 = vweird.f32 %v1150_v4  ;;  %vm700_vm8 = vweird.f32 %v1658_v0 }
 0x10f   : >> { %vm1668_vm4 = vmor %vm515_vm0, %vm516_vm1  ;;  %v706_v44 = vand.u32 2147483648, %v1658_v0  ;;  %v704_v46 = vand.u32 2147483647, %v1658_v0  ;;  %vm735_vm1 = vcmp.eq.s32.totalorder %v1507_v1, %v734_v19  ;;  %v759_v1 = vld [vmem:[%s1512_s18 + $0x68] sm:$0xff] (%p371_p7) }
 0x110   : >> { %v512_v10 = vsub.f32 1.0, %v511_v5  ;;  %v1152_v11 = vpop.eup %1151 }
 0x111   : >> { %v526_v13 = vmul.f32 %v1152_v11, %v509_v63  ;;  %vm531_vm5 = vweird.f32 %v1152_v11  ;;  %v707_v55 = vor.u32 1.1754944e-38, %v706_v44  ;;  %vm705_vm12 = vcmp.eq.f32.partialorder %v704_v46, 8.507059e+37  ;;  %v566_v63 = vld [vmem:[%s1653_s16 + $0x10] sm:$0xff]  ;;  %v754_v44 = vld [vmem:[%s1512_s18 + $0x40] sm:$0xff] (%p371_p7)  ;;  %v753_v46 = vld [vmem:[%s1512_s18 + $0x38] sm:$0xff] (%p371_p7) }
 0x112   : >> { %v513_v14 = vmul.f32 %v1150_v4, %v512_v10  ;;  %vm532_vm6 = vmor %vm530_vm3, %vm531_vm5 }
 0x113   : >> { %v527_v21 = vsub.f32 1.0, %v526_v13 }
 0x114   : >> { %v1661_v12 = vpop.eup %1153  ;;  %v514_v22 = vadd.f32 %v1150_v4, %v513_v14 }
 0x115   : >> { %v696_v23 = vmul.f32 %v1661_v12, %v1658_v0  ;;  %v528_v27 = vmul.f32 %v1152_v11, %v527_v21  ;;  %vm701_vm9 = vweird.f32 %v1661_v12 }
 0x116   : >> { %v518_v28 = vsel %vm1668_vm4, %v1150_v4, %v514_v22  ;;  %vm1689_vm10 = vmor %vm700_vm8, %vm701_vm9 }
 0x117   : >> { %v662_v26 = vpop.f32.mrf.mxu0  ;;  %v523_v32 = vsel %vm1663_vm2, %v522_v20, %v518_v28  ;;  %v529_v33 = vadd.f32 %v1152_v11, %v528_v27  ;;  %v697_v36 = vsub.f32 1.0, %v696_v23 }
 0x118   : >> { %v663_v29 = vadd.f32 %v662_v26, %v620_v16  ;;  %v540_v34 = vmul.f32 %v523_v32, %v498_v18  ;;  %v1051_v32 = vld [vmem:[%s1512_s18 + $0xf0] sm:$0xff] (%p371_p7) }
 0x119   : >> { %v533_v37 = vsel %vm532_vm6, %v1152_v11, %v529_v33  ;;  %v698_v42 = vmul.f32 %v1661_v12, %v697_v36  ;;  %v760_v33 = vld [vmem:[%s1512_s18 + $0x70] sm:$0xff] (%p371_p7)  ;;  %v1048_v36 = vld [vmem:[%s1512_s18 + $0xd8] sm:$0xff] (%p371_p7) }
 0x11a   : >> { %v686_v35 = vadd.f32 %v663_v29, %v565_v25  ;;  %v541_v38 = vadd.f32 %v540_v34, %v383_v31  ;;  %v538_v40 = vsel %vm535_vm7, %v537_v30, %v533_v37  ;;  %v682_v54 = vpop.f32.mrf.mxu1  ;;  %v1052_v30 = vld [vmem:[%s1512_s18 + $0xf8] sm:$0xff] (%p371_p7)  ;;  %v1050_v34 = vld [vmem:[%s1512_s18 + $0xe8] sm:$0xff] (%p371_p7) }
 0x11b   : >> { %v543_v43 = vsub.f32 1.0, %v538_v40  ;;  %v699_v45 = vadd.f32 %v1661_v12, %v698_v42  ;;  %v545_v47 = vmul.f32 %v1326_v3, %v538_v40  ;;  %v683_v58 = vadd.f32 %v682_v54, %v621_v51  ;;  %v761_v31 = vld [vmem:[%s1512_s18 + $0x78] sm:$0xff] (%p371_p7)  ;;  %780 = vmatpush.msra.mxu0 (%p371_p7), %v1052_v30  ;;  %v1046_v40 = vld [vmem:[%s1512_s18 + $0xc8] sm:$0xff] (%p371_p7)  ;;  %v1041_v51 = vld [vmem:[%s1512_s18 + $0xa0] sm:$0xff] (%p371_p7) }
 0x11c   : >> { %v1035_v39 = vmul.f32 -1.442695, %v686_v35  ;;  %1155 = vtanh.f32 %v541_v38  ;;  %800 = vmatpush.msra.mxu1 (%p371_p7), %v761_v31  ;;  %v758_v35 = vld [vmem:[%s1512_s18 + $0x60] sm:$0xff] (%p371_p7)  ;;  %v757_v37 = vld [vmem:[%s1512_s18 + $0x58] sm:$0xff] (%p371_p7)  ;;  %v1047_v38 = vld [vmem:[%s1512_s18 + $0xd0] sm:$0xff] (%p371_p7) }
 0x11d   : >> { %v703_v3 = vsel %vm1689_vm10, %v1661_v12, %v699_v45  ;;  %781 = vmatpush.msra.mxu0 (%p371_p7), %v1051_v32  ;;  %v755_v42 = vld [vmem:[%s1512_s18 + $0x48] sm:$0xff] (%p371_p7)  ;;  %v1044_v45 = vld [vmem:[%s1512_s18 + $0xb8] sm:$0xff] (%p371_p7) }
 0x11e   : >> { %1157 = vpow2.f32 %v1035_v39  ;;  %v708_v60 = vsel %vm705_vm12, %v707_v55, %v703_v3  ;;  %801 = vmatpush.msra.mxu1 (%p371_p7), %v760_v33  ;;  %v756_v39 = vld [vmem:[%s1512_s18 + $0x50] sm:$0xff] (%p371_p7)  ;;  %v749_v54 = vld [vmem:[%s1512_s18 + $0x18] sm:$0xff] (%p371_p7) }
 0x11f   : >> { %v725_v62 = vmul.f32 %v708_v60, %v683_v58  ;;  %782 = vmatpush.msra.mxu0 (%p371_p7), %v1050_v34  ;;  %v1039_v55 = vld [vmem:[%s1512_s18 + $0x90] sm:$0xff] (%p371_p7)  ;;  %v1037_v58 = vld [vmem:[%s1512_s18 + $0x80] sm:$0xff] (%p371_p7) }
 0x120   : > { %802 = vmatpush.msra.mxu1 (%p371_p7), %v759_v1 }
 0x121   : >> { %v726_v7 = vadd.f32 %v725_v62, %v566_v63 }
 0x122   : >> { %v1156_v50 = vpop.eup %1155  ;;  %803 = vmatpush.msra.mxu1 (%p371_p7), %v758_v35 }
 0x123   : >> { %v544_v53 = vmul.f32 %v1156_v50, %v543_v43  ;;  %v1045_v43 = vld [vmem:[%s1512_s18 + $0xc0] sm:$0xff] (%p371_p7)  ;;  %v751_v50 = vld [vmem:[%s1512_s18 + $0x28] sm:$0xff] (%p371_p7) }
 0x124   : >> { %v1158_v52 = vpop.eup %1157  ;;  %804 = vmatpush.msra.mxu1 (%p371_p7), %v757_v37 }
 0x125   : >> { %v694_v56 = vadd.f32 1.0, %v1158_v52  ;;  %v546_v57 = vadd.f32 %v545_v47, %v544_v53   ;;  %v1043_v47 = vld [vmem:[%s1512_s18 + $0xb0] sm:$0xff] (%p371_p7)  ;;  %v750_v52 = vld [vmem:[%s1512_s18 + $0x20] sm:$0xff] (%p371_p7)  ;;  %v1040_v53 = vld [vmem:[%s1512_s18 + $0x98] sm:$0xff] (%p371_p7) }
 0x126   : > { %805 = vmatpush.msra.mxu1 (%p371_p7), %v756_v39 }
 0x127   : >> { %1159 = vrcp.f32 %v694_v56  ;;  %v551_v59 = vsel %vm550_vm11, %v546_v57, 0.0  ;;  %v721_v10 = vand.u32 2147483648, %v694_v56  ;;  %v719_v12 = vand.u32 2147483647, %v694_v56 }
 0x128   : >> { %v552_v41 = vrot.slane %v551_v59, 4  ;;  %1161 = vtanh.f32 %v726_v7  ;;  %vm715_vm14 = vweird.f32 %v694_v56  ;;  %v1780_v3 = vmov %v546_v57  ;;  %806 = vmatpush.msra.mxu1 (%p371_p7), %v755_v42  ;;  %v747_v57 = vld [vmem:[%s1512_s18 + $0x8] sm:$0xff] (%p371_p7) }
 0x129   : >> { %v722_v15 = vor.u32 1.1754944e-38, %v721_v10  ;;  %vm720_vm0 = vcmp.eq.f32.partialorder %v719_v12, 8.507059e+37  ;;  %v1038_v3 = vld [vmem:[%s1512_s18 + $0x88] sm:$0xff] (%p371_p7) }
 0x12a   : >> { %v553_v61 = vadd.f32 %v552_v41, %v551_v59  ;;  %807 = vmatpush.msra.mxu1 (%p371_p7), %v754_v44  ;;  %v746_v59 = vld [vmem:[%s1512_s18] sm:$0xff] (%p371_p7) }
 0x12c   : >> { %v554_v4 = vrot.slane %v553_v61, 2  ;;  %808 = vmatpush.msra.mxu1 (%p371_p7), %v753_v46 }
 0x12d   : >> { %v1160_v0 = vpop.eup %1159 }
 0x12e   : >> { %v711_v5 = vmul.f32 %v1160_v0, %v694_v56  ;;  %v555_v6 = vadd.f32 %v554_v4, %v553_v61  ;;  %vm716_vm13 = vweird.f32 %v1160_v0  ;;  %v1162_v20 = vpop.eup %1161  ;;  %809 = vmatpush.msra.mxu1 (%p371_p7), %v752_v48  ;;  %v748_v56 = vld [vmem:[%s1512_s18 + $0x10] sm:$0xff] (%p371_p7)  ;;  %v1163_v61 = vld [vmem:[%s307_s7] ss:$0 sm:$0xff] (%p371_p7) }
 0x12f   : >> { %vm717_vm15 = vmor %vm715_vm14, %vm716_vm13 }
 0x130   : >> { %v712_v8 = vsub.f32 1.0, %v711_v5  ;;  %v556_v9 = vrot.slane %v555_v6, 1  ;;  %810 = vmatpush.msra.mxu1 (%p371_p7), %v751_v50 }
 0x132   : >> { %v713_v11 = vmul.f32 %v1160_v0, %v712_v8  ;;  %v557_v13 = vadd.f32 %v556_v9, %v555_v6  ;;  %811 = vmatpush.msra.mxu1 (%p371_p7), %v750_v52 }
 0x134   : >> { %v714_v14 = vadd.f32 %v1160_v0, %v713_v11  ;;  %559 = vst [vmem:[%s558_s19] sm:$0x1] %v557_v13  ;;  %812 = vmatpush.msra.mxu1 (%p371_p7), %v749_v54 }
 0x136   : >> { %v718_v16 = vsel %vm717_vm15, %v1160_v0, %v714_v14  ;;  %813 = vmatpush.msra.mxu1 (%p371_p7), %v748_v56 }
 0x137   : >> { %v723_v17 = vsel %vm720_vm0, %v722_v15, %v718_v16 }
 0x138   : >> { %v728_v18 = vsub.f32 1.0, %v723_v17  ;;  %v730_v22 = vmul.f32 %v1322_v2, %v723_v17  ;;  %814 = vmatpush.msra.mxu1 (%p371_p7), %v747_v57 }
 0x13a   : >> { %v729_v21 = vmul.f32 %v1162_v20, %v728_v18  ;;  %815 = vmatpush.msra.mxu1 (%p371_p7), %v746_v59 }
 0x13b   : > { %v745_v41 = vld [vmem:[#allocation2] sm:$0xf] (%p371_p7) }
 0x13c   : >> { %v731_v2 = vadd.f32 %v730_v22, %v729_v21   ;;  %816 = vmatmul.f32.vlgmr.msra.gmra.mxu1 (%p371_p7), %v745_v41 }
 0x13e   : >> { %v736_v23 = vsel %vm735_vm1, %v731_v2, 0.0  ;;  %v1049_v2 = vld [vmem:[%s1512_s18 + $0xe0] sm:$0xff] (%p371_p7) }
 0x13f   : >> { %v737_v24 = vrot.slane %v736_v23, 4  ;;  %783 = vmatpush.msra.mxu0 (%p371_p7), %v1049_v2 }
 0x141   : >> { %v738_v25 = vadd.f32 %v737_v24, %v736_v23  ;;  %784 = vmatpush.msra.mxu0 (%p371_p7), %v1048_v36 }
 0x143   : >> { %v739_v26 = vrot.slane %v738_v25, 2  ;;  %785 = vmatpush.msra.mxu0 (%p371_p7), %v1047_v38 }
 0x145   : >> { %v740_v27 = vadd.f32 %v739_v26, %v738_v25  ;;  %786 = vmatpush.msra.mxu0 (%p371_p7), %v1046_v40 }
 0x147   : >> { %v741_v28 = vrot.slane %v740_v27, 1  ;;  %373 = sbr.rel (!%p371_p7) target bundleno = 90 (0x5a), region = 124  ;;  %787 = vmatpush.msra.mxu0 (%p371_p7), %v1045_v43 }
 0x149   : >> { %v742_v29 = vadd.f32 %v741_v28, %v740_v27  ;;  %788 = vmatpush.msra.mxu0 (%p371_p7), %v1044_v45 }
 0x14b   : >> { %744 = vst [vmem:[%s743_s14] sm:$0x1] %v742_v29  ;;  %789 = vmatpush.msra.mxu0 (%p371_p7), %v1043_v47 }
 0x14d   : > { %790 = vmatpush.msra.mxu0 %v1042_v49 }
 0x14f   : > { %791 = vmatpush.msra.mxu0 %v1041_v51 }
 0x151   : > { %792 = vmatpush.msra.mxu0 %v1040_v53 }
 0x152   : > { %v762_v60 = vld [vmem:[#allocation3] sm:$0xf] }
 0x153   : > { %793 = vmatpush.msra.mxu0 %v1039_v55 }
 0x155   : > { %794 = vmatpush.msra.mxu0 %v1038_v3 }
 0x157   : > { %795 = vmatpush.msra.mxu0 %v1037_v58 }
 0x158   : > { %796 = vmatmul.f32.vlgmr.msra.gmra.mxu0 %v762_v60 }
 0x1b9   : > { %v817_v63 = vpop.f32.mrf.mxu1 }
 0x1d5   : > { %v797_v62 = vpop.f32.mrf.mxu0 }
 0x1d6   : > { %v818_v0 = vadd.f32 %v817_v63, %v797_v62 }
 0x1d8   : > { %v824_v4 = vadd.f32 %v1163_v61, %v818_v0 }
 0x1da   : > { %825 = vst [vmem:[%s1522_s30] sm:$0xf] %v824_v4 }
 0x1db PF: > { %p27_p10 = scmp.ge.s32.totalorder %s1397_s29, 4   ;;  %s1781_s25 = smov %s1310_s26 }
 0x1dc   : > { %s1782_s26 = smov %s1314_s27  ;;  %s1783_s27 = smov %s1407_s8 }
 0x1dd   : > { %s1784_s28 = smov %s1397_s29  ;;  %29 = sbr.rel (!%p27_p10) target bundleno = 11 (0xb), region = 135 }
 0x1e2   :  { %845 = vsyncpa [#allocation7], 1 }
 0x1e3   :  { %847 = vsyncpa [#allocation7 + $0x1], 1 }
 0x1e4   :  { %848 = vsyncpa [#allocation9], 1 }
 0x1e5   :  { %850 = vsyncpa [#allocation9 + $0x1], 1 }

// kernel: enc_network_forward.6
= control target key start
LH: loop header
LB: loop body
LE: loop exit
PB: predicated region body
PF: predicated region fallthrough
CT: control target
= control target key end

     0   :  { %s1925_s0 = inlined_call_operand.vmem [shape: f32[2,4,8,384], index: 0, kind: input, shape index: {}]   ;;  %s1926_s1 = inlined_call_operand.vmem [shape: f32[2,4,128], index: 1, kind: input, shape index: {}]   ;;  %s1927_s2 = inlined_call_operand.hbm [shape: f32[128,128], index: 2, kind: input, shape index: {}]   ;;  %s1928_s3 = inlined_call_operand.hbm [shape: f32[2,128,128], index: 3, kind: input, shape index: {}]   ;;  %s1929_s4 = inlined_call_operand.vmem [shape: f32[2,1,128], index: 4, kind: input, shape index: {}]   ;;  %s1930_s5 = inlined_call_operand.vmem [shape: f32[2,128,384], index: 5, kind: input, shape index: {}]   ;;  %s1931_s6 = inlined_call_operand.hbm [shape: f32[2,128,384], index: 6, kind: input, shape index: {}]   ;;  %s1932_s7 = inlined_call_operand.vmem [shape: f32[2,1,384], index: 7, kind: input, shape index: {}]   ;;  %s1933_s8 = inlined_call_operand.vmem [shape: f32[2,4,8,128], index: 8, kind: output, shape index: {0}]   ;;  %s1934_s9 = inlined_call_operand.vmem [shape: f32[2,8,128], index: 9, kind: output, shape index: {1}]  }
   0x1   :  { %1936 = sst [smem:[#allocation12_spill]] %s1927_s2 }
   0x2   :  { %1937 = sst [smem:[#allocation13_spill]] %s1928_s3 }
   0x3   :  { %15 = vsyncpa [#allocation4], 0 }
   0x4   :  { %16 = vsyncpa [#allocation6], 0 }
   0x5   :  { %18 = vsyncpa [#allocation6 + $0x1], 0  ;;  %s1558_s30 = smov 0   ;;  %s1560_s10 = smov 0  }
   0x6   :  { %s1562_s11 = smov 0   ;;  %s1564_s12 = smov 0  }
   0x7 LB: > { %1938 = sst [smem:[#allocation10_spill]] %s1487_s11  ;;  %s1579_s13 = sadd.s32 1, %s1491_s12   ;;  %s1491_s12 = sphi %s1564_s12, %s1949_s12   ;;  %s1487_s11 = sphi %s1562_s11, %s1946_s11   ;;  %s1483_s10 = sphi %s1560_s10, %s1948_s10   ;;  %s1479_s30 = sphi %s1558_s30, %s1947_s30  }
   0x8   : > { %s104_s14 = sadd.s32 1, %s1487_s11  ;;  %s101_s15 = ssub.s32 %s1491_s12, %s1579_s13 }
   0x9   : > { %p111_p0 = scmp.ne.s32.totalorder %s1487_s11, %s1483_s10  ;;  %p102_p1 = scmp.eq.s32.totalorder %s101_s15, 0 }
   0xa   : > { %p112_p2 = scmp.eq.s32.totalorder %s1491_s12, 0  ;;  %p1283_p4 = scmp.lt.s32.totalorder %s1491_s12, 2 }
   0xb   : > { %s1588_s16 = scalar_select %p102_p1, %s1487_s11, %s104_s14  }
   0xc   : > { %p113_p3 = por %p112_p2, %p111_p0  ;;  %s326_s17 = sand.u32 1, %s1491_s12  }
   0xd   : > { %1939 = sst [smem:[#allocation11_spill]] %s1588_s16  ;;  %s328_s18 = sand.u32 1, %s1487_s11  }
   0xe   : > { %s1228_s19 = sshll.u32 %s328_s18, 7  ;;  %s1250_s20 = sshll.u32 %s1491_s12, 7 }
   0xf   : > { %s1940_s3 = sld [smem:[#allocation13_spill]]  ;;  %s330_s25 = scalar_lea.vmem [#allocation5], %s1228_s19 }
  0x10   : > { %s338_s26 = sshll.u32 %s330_s25, 4  ;;  %p1597_p5 = pnand %p1283_p4, %p113_p3  ;;  %s339_s26 = int_to_ptr.vmem [resolvable:$true] %s338_s26 }
  0x11   : > { %s1601_s28 = smul.u32 384, %s328_s18  ;;  %s1604_s29 = sadd.s32 4294967295, %s1491_s12  }
  0x12   : > { %s1606_s14 = scalar_lea.sflag [#allocation6], %s326_s17  ;;  %p1359_p7 = pneg %p1597_p5 }
  0x15   : > { %s335_s23 = scalar_lea.hbm %s1940_s3, %s1250_s20  ;;  %s1362_s22 = scalar_lea.hbm %s1940_s3, 256 }
  0x16   : > { %s336_s24 = sshll.u32 %s335_s23, 4  ;;  %s337_s24 = int_to_ptr.hbm [resolvable:$true] %s336_s24 }
  0x17   : > { %s1355_s15 = sshra.s32 %s337_s24, 4  ;;  %s1356_s15 = int_to_ptr.hbm [resolvable:$true] %s1355_s15 }
  0x18   : > { %s1357_s20 = scalar_lea.hbm %s1356_s15, 128  ;;  %p1363_p10 = scmp.lt.s32.totalorder %s1356_s15, %s1940_s3 }
  0x19   : > { %p1358_p6 = scmp.ne.s32.totalorder %s1356_s15, %s1357_s20  ;;  %p1364_p11 = scmp.lt.s32.totalorder %s1362_s22, %s1357_s20 }
  0x1b   : > { %p1360_p8 = pnand %p1359_p7, %p1358_p6  ;;  %p1365_p12 = por %p1364_p11, %p1363_p10 }
  0x1d   : > { %p1361_p9 = pneg %p1360_p8 }
  0x1f   : > { %p1366_p13 = pnand %p1365_p12, %p1361_p9 }
  0x21   : > { %1369 = shalt.err (!%p1366_p13)
}
  0x22   : > { %s1501_s17 = smov 128   ;;  %s1502_s25 = smov 8  }
  0x23   : > { %1278 = dma.hbm_to_vmem [thread:$0]  (!%p1597_p5), %s337_s24, 2048, %s339_s26, %s1606_s14, %s1501_s17, %s1501_s17, %s1502_s25  }
  0x24   : > { %p118_p0 = scmp.eq.s32.totalorder %s1604_s29, 0  ;;  %p117_p1 = scmp.ne.s32.totalorder %s1483_s10, %s1479_s30 }
  0x25   : > { %p1225_p2 = scmp.ge.s32.totalorder %s1491_s12, 1  ;;  %p284_p3 = scmp.lt.s32.totalorder %s1491_s12, 3 }
  0x26   : > { %p1629_p4 = por %p118_p0, %p117_p1  ;;  %s1943_s2 = sld [smem:[#allocation12_spill]] }
  0x27   : > { %p1636_p6 = pnand %p1225_p2, %p284_p3  ;;  %s1254_s24 = smul.u32 384, %s1491_s12 }
  0x28   : > { %s1503_s30 = smov [#allocation3]   ;;  %s366_s19 = scalar_lea.vmem [#allocation7], %s1601_s28 }
  0x29   : > { %p1271_p8 = pneg %p1636_p6  ;;  %s297_s26 = sshll.u32 %s1503_s30, 4  ;;  %s298_s26 = int_to_ptr.vmem [resolvable:$true] %s297_s26 }
  0x2a   : > { %s371_s3 = scalar_lea.hbm %s1931_s6, %s1254_s24  ;;  %s1422_s24 = scalar_lea.hbm %s1931_s6, 768 }
  0x2b   : > { %p1272_p9 = pnand %p1271_p8, %p118_p0  ;;  %s372_s20 = sshll.u32 %s371_s3, 4  ;;  %s373_s20 = int_to_ptr.hbm [resolvable:$true] %s372_s20 }
  0x2c   : > { %s295_s21 = sshll.u32 %s1943_s2, 4  ;;  %s374_s2 = sshll.u32 %s366_s19, 4  ;;  %s296_s21 = int_to_ptr.hbm [resolvable:$true] %s295_s21  ;;  %s375_s2 = int_to_ptr.vmem [resolvable:$true] %s374_s2 }
  0x2d   : > { %1274 = dma.hbm_to_vmem [thread:$0]  (!%p1272_p9), %s296_s21, 2048, %s298_s26, [#allocation4], %s1501_s17, %s1501_s17, %s1502_s25  }
  0x2e   : > { %s1415_s16 = sshra.s32 %s373_s20, 4  ;;  %s1416_s16 = int_to_ptr.hbm [resolvable:$true] %s1415_s16 }
  0x2f   : > { %s1417_s12 = scalar_lea.hbm %s1416_s16, 384  ;;  %p1423_p13 = scmp.lt.s32.totalorder %s1416_s16, %s1931_s6 }
  0x30   : > { %p1418_p10 = scmp.ne.s32.totalorder %s1416_s16, %s1417_s12  ;;  %p1424_p1 = scmp.lt.s32.totalorder %s1422_s24, %s1417_s12 }
  0x32   : > { %p1420_p11 = pnand %p1418_p10, %p1359_p7  ;;  %p1425_p2 = por %p1424_p1, %p1423_p13 }
  0x34   : > { %p1421_p12 = pneg %p1420_p11 }
  0x36   : > { %p1426_p3 = pnand %p1425_p2, %p1421_p12 }
  0x38   : > { %1429 = shalt.err (!%p1426_p3)
}
  0x39   : > { %s1504_s3 = smov 384   ;;  %s1505_s28 = smov 24  }
  0x3a   : > { %1281 = dma.hbm_to_vmem [thread:$0]  (!%p1597_p5), %s373_s20, 6144, %s375_s2, %s1606_s14, %s1504_s3, %s1504_s3, %s1505_s28  }
  0x3b   : > { %393 = sbr.rel (%p1636_p6) target bundleno = 1206 (0x4b6), region = 52 }
  0x40   : > { %1470 = dma.done.wait (%p118_p0), [#allocation4], 2048  }
  0x41   : > { %1472 = vsyncadd (%p118_p0), [#allocation4], 4294965248  ;;  %s400_s11 = sand.u32 1, %s1604_s29   ;;  %s402_s16 = sand.u32 1, %s1483_s10  }
  0x42   : > { %s1234_s17 = sshll.u32 %s402_s16, 7  ;;  %s401_s25 = scalar_lea.sflag [#allocation6], %s400_s11 }
  0x43   : > { %s1669_s21 = scalar_lea.vmem [#allocation5], %s1234_s17 }
  0x44   : > { %1474 = dma.done.wait (%p1629_p4), %s401_s25, 8192  }
  0x45   : > { %1476 = vsyncadd (%p1629_p4), %s401_s25, 4294959104  ;;  %s1675_s2 = smul.u32 384, %s402_s16  ;;  %p480_p5 = scmp.lt.s32.totalorder %s1604_s29, 1  ;;  %v1683_v0 = vld [vmem:[#allocation3 + $0x78] sm:$0xff]  ;;  %v1685_v1 = vld [vmem:[#allocation3 + $0x70] sm:$0xff]  ;;  %vm528_vm0 = vcmask 1043456   ;;  %v592_v54 = vlaneseq }
  0x46   : > { %569 = vmatpush.msra.mxu0 %v1683_v0  ;;  %619 = vmatpush.xpose.msra.mxu1 %v1683_v0  ;;  %v1699_v2 = vld [vmem:[#allocation3 + $0x68] sm:$0xff]  ;;  %v1712_v3 = vld [vmem:[#allocation3 + $0x60] sm:$0xff]  ;;  %v513_v5 = vld [vmem:[#allocation3 + $0x10] sm:$0xff]  ;;  %v546_v44 = vmul.f32 %v1685_v1, %v1685_v1  ;;  %v547_v46 = vmul.f32 %v1683_v0, %v1683_v0 }
  0x47   : > { %s1679_s27 = scalar_select %p480_p5, %s1604_s29, 1  ;;  %v1714_v4 = vld [vmem:[#allocation3 + $0x8] sm:$0xff]  ;;  %v511_v7 = vld [vmem:[#allocation3] sm:$0xff]  ;;  %v522_v9 = vld [vmem:[#allocation3 + $0x58] sm:$0xff]  ;;  %v534_v10 = vmul.f32 %v513_v5, %v513_v5  ;;  %v544_v40 = vmul.f32 %v1712_v3, %v1712_v3  ;;  %v545_v42 = vmul.f32 %v1699_v2, %v1699_v2  ;;  %v593_v58 = vand.u32 127, %v592_v54 }
  0x48   : > { %570 = vmatpush.msra.mxu0 %v1685_v1  ;;  %v533_v6 = vmul.f32 %v1714_v4, %v1714_v4  ;;  %v532_v11 = vmul.f32 %v511_v7, %v511_v7  ;;  %v514_v13 = vld [vmem:[#allocation3 + $0x18] sm:$0xff]  ;;  %v521_v14 = vld [vmem:[#allocation3 + $0x50] sm:$0xff]  ;;  %v515_v18 = vld [vmem:[#allocation3 + $0x20] sm:$0xff]  ;;  %v543_v39 = vmul.f32 %v522_v9, %v522_v9 }
  0x49   : > { %s1256_s14 = smul.u32 96, %s1679_s27  ;;  %s1236_s22 = sshll.u32 %s1679_s27, 2  ;;  %v535_v15 = vmul.f32 %v514_v13, %v514_v13  ;;  %v520_v19 = vld [vmem:[#allocation3 + $0x48] sm:$0xff]  ;;  %v536_v20 = vmul.f32 %v515_v18, %v515_v18  ;;  %v519_v23 = vld [vmem:[#allocation3 + $0x40] sm:$0xff]  ;;  %v517_v26 = vld [vmem:[#allocation3 + $0x30] sm:$0xff]  ;;  %v542_v38 = vmul.f32 %v521_v14, %v521_v14  ;;  %vm594_vm1 = vcmp.lt.s32.totalorder %v593_v58, 8 }
  0x4a   : > { %s1258_s19 = smul.u32 3, %s1679_s27  ;;  %s488_s24 = scalar_lea.vmem %s1926_s1, %s1236_s22  ;;  %571 = vmatpush.msra.mxu0 %v1699_v2  ;;  %620 = vmatpush.xpose.msra.mxu1 %v1685_v1  ;;  %v548_v16 = vadd.f32 %v533_v6, %v532_v11  ;;  %v516_v22 = vld [vmem:[#allocation3 + $0x28] sm:$0xff]  ;;  %v518_v27 = vld [vmem:[#allocation3 + $0x38] sm:$0xff]  ;;  %v538_v28 = vmul.f32 %v517_v26, %v517_v26  ;;  %v540_v32 = vmul.f32 %v519_v23, %v519_v23 }
  0x4b   : > { %s1690_s20 = scalar_lea.vmem %s1925_s0, %s1256_s14  ;;  %s1251_s18 = sshll.u32 %s1679_s27, 5  ;;  %v1719_v8 = vld [vmem:[%s488_s24] sm:$0xf]  ;;  %v537_v24 = vmul.f32 %v516_v22, %v516_v22  ;;  %v539_v30 = vmul.f32 %v518_v27, %v518_v27  ;;  %v541_v34 = vmul.f32 %v520_v19, %v520_v19  ;;  %v684_v11 = vld [vmem:[%s1669_s21 + $0x78] sm:$0xff] }
  0x4c   : > { %s1704_s28 = scalar_lea.vmem %s1932_s7, %s1258_s19  ;;  %s1709_s17 = scalar_lea.vmem %s1933_s8, %s1251_s18  ;;  %v527_v12 = vmul.f32 %v1719_v8, %v1719_v8  ;;  %572 = vmatpush.msra.mxu0 %v1712_v3  ;;  %v549_v21 = vadd.f32 %v548_v16, %v534_v10  ;;  %689 = vmatpush.msra.mxu2 %v684_v11  ;;  %v679_v16 = vld [vmem:[%s1669_s21 + $0x50] sm:$0xff] }
  0x4d   : > { %s1257_s25 = smul.u32 384, %s1679_s27  ;;  %s491_s29 = scalar_lea.vmem %s1929_s4, %s1679_s27 }
  0x4e   : > { %v529_v17 = vsel %vm528_vm0, %v527_v12, 0.0  ;;  %573 = vmatpush.msra.mxu0 %v522_v9  ;;  %621 = vmatpush.xpose.msra.mxu1 %v1699_v2  ;;  %v550_v25 = vadd.f32 %v549_v21, %v535_v15  ;;  %v683_v12 = vld [vmem:[%s1669_s21 + $0x70] sm:$0xff]  ;;  %v680_v15 = vld [vmem:[%s1669_s21 + $0x58] sm:$0xff]  ;;  %v674_v21 = vld [vmem:[%s1669_s21 + $0x28] sm:$0xff]  ;;  %s1240_s18 = sshll.u32 %s1679_s27, 3  ;;  %s1831_s22 = scalar_lea.vmem [#allocation7], %s1675_s2 }
  0x4f   : > { %530 = vadd.xlane.f32.xlu0 %v529_v17  ;;  %690 = vmatpush.msra.mxu2 %v683_v12  ;;  %v678_v17 = vld [vmem:[%s1669_s21 + $0x48] sm:$0xff]  ;;  %s1760_s26 = scalar_lea.vmem %s1930_s5, %s1257_s25  ;;  %s509_s25 = scalar_lea.vmem %s1934_s9, %s1240_s18 }
  0x50   : > { %574 = vmatpush.msra.mxu0 %v521_v14  ;;  %v551_v29 = vadd.f32 %v550_v25, %v536_v20  ;;  %v675_v20 = vld [vmem:[%s1669_s21 + $0x30] sm:$0xff]  ;;  %v723_v11 = vld [vmem:[%s1760_s26 + $0x70] sm:$0xff]  ;;  %v718_v12 = vld [vmem:[%s1760_s26 + $0x48] sm:$0xff]  ;;  %s1835_s27 = smov 0  }
  0x52   : > { %575 = vmatpush.msra.mxu0 %v520_v19  ;;  %622 = vmatpush.xpose.msra.mxu1 %v1712_v3  ;;  %v552_v31 = vadd.f32 %v551_v29, %v537_v24  ;;  %v672_v29 = vld [vmem:[%s1669_s21 + $0x18] sm:$0xff] }
  0x54   : > { %576 = vmatpush.msra.mxu0 %v519_v23  ;;  %v553_v33 = vadd.f32 %v552_v31, %v538_v28  ;;  %v673_v28 = vld [vmem:[%s1669_s21 + $0x20] sm:$0xff]  ;;  %v670_v31 = vld [vmem:[%s1669_s21 + $0x8] sm:$0xff] }
  0x56   : > { %577 = vmatpush.msra.mxu0 %v518_v27  ;;  %623 = vmatpush.xpose.msra.mxu1 %v522_v9  ;;  %v554_v35 = vadd.f32 %v553_v33, %v539_v30  ;;  %v671_v30 = vld [vmem:[%s1669_s21 + $0x10] sm:$0xff]  ;;  %v754_v33 = vld [vmem:[%s1760_s26 + $0x168] sm:$0xff] }
  0x57   : > { %757 = vmatpush.msra.mxu3 %v754_v33 }
  0x58   : > { %578 = vmatpush.msra.mxu0 %v517_v26  ;;  %v555_v36 = vadd.f32 %v554_v35, %v540_v32  ;;  %v669_v32 = vld [vmem:[%s1669_s21] sm:$0xff]  ;;  %v756_v35 = vld [vmem:[%s1760_s26 + $0x178] sm:$0xff] }
  0x5a   : > { %579 = vmatpush.msra.mxu0 %v516_v22  ;;  %624 = vmatpush.xpose.msra.mxu1 %v521_v14  ;;  %v556_v37 = vadd.f32 %v555_v36, %v541_v34  ;;  %v681_v14 = vld [vmem:[%s1669_s21 + $0x60] sm:$0xff] }
  0x5b   : > { %v755_v34 = vld [vmem:[%s1760_s26 + $0x170] sm:$0xff] }
  0x5c   : > { %580 = vmatpush.msra.mxu0 %v515_v18  ;;  %v557_v41 = vadd.f32 %v556_v37, %v542_v38  ;;  %v751_v36 = vld [vmem:[%s1760_s26 + $0x150] sm:$0xff]  ;;  %v752_v37 = vld [vmem:[%s1760_s26 + $0x158] sm:$0xff]  ;;  %v753_v38 = vld [vmem:[%s1760_s26 + $0x160] sm:$0xff] }
  0x5d   : > { %758 = vmatpush.msra.mxu3 %v751_v36 }
  0x5e   : > { %581 = vmatpush.msra.mxu0 %v514_v13  ;;  %625 = vmatpush.xpose.msra.mxu1 %v520_v19  ;;  %v558_v43 = vadd.f32 %v557_v41, %v543_v39  ;;  %v676_v19 = vld [vmem:[%s1669_s21 + $0x38] sm:$0xff]  ;;  %v748_v39 = vld [vmem:[%s1760_s26 + $0x138] sm:$0xff] }
  0x5f   : > { %v750_v41 = vld [vmem:[%s1760_s26 + $0x148] sm:$0xff]  ;;  %759 = vmatpush.msra.mxu3 %v748_v39 }
  0x60   : > { %582 = vmatpush.msra.mxu0 %v513_v5  ;;  %v559_v45 = vadd.f32 %v558_v43, %v544_v40  ;;  %v749_v40 = vld [vmem:[%s1760_s26 + $0x140] sm:$0xff]  ;;  %v746_v43 = vld [vmem:[%s1760_s26 + $0x128] sm:$0xff] }
  0x62   : > { %583 = vmatpush.msra.mxu0 %v1714_v4  ;;  %626 = vmatpush.xpose.msra.mxu1 %v519_v23  ;;  %v560_v47 = vadd.f32 %v559_v45, %v545_v42  ;;  %v745_v42 = vld [vmem:[%s1760_s26 + $0x120] sm:$0xff]  ;;  %v742_v45 = vld [vmem:[%s1760_s26 + $0x108] sm:$0xff] }
  0x63   : > { %760 = vmatpush.msra.mxu3 %v745_v42 }
  0x64   : > { %584 = vmatpush.msra.mxu0 %v511_v7  ;;  %v561_v48 = vadd.f32 %v560_v47, %v546_v44  ;;  %v747_v44 = vld [vmem:[%s1760_s26 + $0x130] sm:$0xff]  ;;  %v744_v47 = vld [vmem:[%s1760_s26 + $0x118] sm:$0xff] }
  0x65   : > { %585 = vmatmul.f32.vlgmr.msra.gmra.mxu0 %v1719_v8  ;;  %761 = vmatpush.msra.mxu3 %v742_v45 }
  0x66   : > { %627 = vmatpush.xpose.msra.mxu1 %v518_v27  ;;  %v562_v49 = vadd.f32 %v561_v48, %v547_v46  ;;  %v1506_v27 = vmov 1.0   ;;  %777 = vmatpush.msrb.mxu0 %v755_v34  ;;  %v743_v46 = vld [vmem:[%s1760_s26 + $0x110] sm:$0xff] }
  0x68   : > { %v563_v50 = vrot.slane %v562_v49, 4  ;;  %778 = vmatpush.msrb.mxu0 %v752_v37 }
  0x6a   : > { %628 = vmatpush.xpose.msra.mxu1 %v517_v26  ;;  %v564_v51 = vadd.f32 %v563_v50, %v562_v49  ;;  %779 = vmatpush.msrb.mxu0 %v749_v40 }
  0x6c   : > { %v565_v52 = vrot.slane %v564_v51, 2  ;;  %780 = vmatpush.msrb.mxu0 %v746_v43 }
  0x6e   : > { %629 = vmatpush.xpose.msra.mxu1 %v516_v22  ;;  %v566_v53 = vadd.f32 %v565_v52, %v564_v51  ;;  %781 = vmatpush.msrb.mxu0 %v743_v46 }
  0x70   : > { %v567_v55 = vrot.slane %v566_v53, 1 }
  0x72   : > { %630 = vmatpush.xpose.msra.mxu1 %v515_v18  ;;  %v568_v60 = vadd.f32 %v567_v55, %v566_v53  ;;  %v677_v18 = vld [vmem:[%s1669_s21 + $0x40] sm:$0xff] }
  0x73   : > { %v739_v55 = vld [vmem:[%s1760_s26 + $0xf0] sm:$0xff] }
  0x74   : > { %762 = vmatpush.msra.mxu3 %v739_v55 }
  0x76   : > { %631 = vmatpush.xpose.msra.mxu1 %v514_v13  ;;  %v682_v13 = vld [vmem:[%s1669_s21 + $0x68] sm:$0xff]  ;;  %s664_s21 = scalar_select %p118_p0, 1, 0 }
  0x77   : > { %691 = vmatpush.msra.mxu2 %v682_v13  ;;  %v719_v13 = vld [vmem:[%s1760_s26 + $0x50] sm:$0xff] }
  0x78   : > { %v665_v48 = vstv %s664_s21 }
  0x79   : > { %692 = vmatpush.msra.mxu2 %v681_v14  ;;  %vm666_vm5 = vcmp.eq.s32.totalorder %v665_v48, 1  ;;  %v720_v14 = vld [vmem:[%s1760_s26 + $0x58] sm:$0xff] }
  0x7a   : > { %632 = vmatpush.xpose.msra.mxu1 %v513_v5 }
  0x7b   : > { %693 = vmatpush.msra.mxu2 %v680_v15  ;;  %v715_v15 = vld [vmem:[%s1760_s26 + $0x30] sm:$0xff] }
  0x7d   : > { %694 = vmatpush.msra.mxu2 %v679_v16  ;;  %v716_v16 = vld [vmem:[%s1760_s26 + $0x38] sm:$0xff] }
  0x7e   : > { %633 = vmatpush.xpose.msra.mxu1 %v1714_v4 }
  0x7f   : > { %695 = vmatpush.msra.mxu2 %v678_v17  ;;  %v717_v17 = vld [vmem:[%s1760_s26 + $0x40] sm:$0xff] }
  0x81   : > { %696 = vmatpush.msra.mxu2 %v677_v18  ;;  %v1507_v18 = vmov 64.0  }
  0x82   : > { %634 = vmatpush.xpose.msra.mxu1 %v511_v7 }
  0x83   : > { %697 = vmatpush.msra.mxu2 %v676_v19  ;;  %v712_v19 = vld [vmem:[%s1760_s26 + $0x18] sm:$0xff] }
  0x85   : > { %698 = vmatpush.msra.mxu2 %v675_v20  ;;  %v713_v20 = vld [vmem:[%s1760_s26 + $0x20] sm:$0xff] }
  0x87   : > { %699 = vmatpush.msra.mxu2 %v674_v21  ;;  %v714_v21 = vld [vmem:[%s1760_s26 + $0x28] sm:$0xff] }
  0x89   : > { %700 = vmatpush.msra.mxu2 %v673_v28 }
  0x8b   : > { %701 = vmatpush.msra.mxu2 %v672_v29 }
  0x8d   : > { %702 = vmatpush.msra.mxu2 %v671_v30 }
  0x8f   : > { %703 = vmatpush.msra.mxu2 %v670_v31 }
  0x91   : > { %704 = vmatpush.msra.mxu2 %v669_v32 }
  0x93   : > { %797 = vmatpush.msrb.mxu2 %v756_v35 }
  0x95   : > { %798 = vmatpush.msrb.mxu2 %v753_v38  ;;  %v1340_v38 = vld [vmem:[%s491_s29] ss:$0 sm:$0xff] }
  0x97   : > { %799 = vmatpush.msrb.mxu2 %v750_v41 }
  0x99   : > { %800 = vmatpush.msrb.mxu2 %v747_v44 }
  0x9b   : > { %801 = vmatpush.msrb.mxu2 %v744_v47  ;;  %v1833_v47 = vmov 0.0  }
  0xc2   : > { %v531_v57 = vpop.xlane.xlu0 %530 }
  0xe2   : > { %v586_v56 = vpop.f32.mrf.mxu0 }
  0xe3   : > { %v589_v59 = vmul.f32 2.0, %v586_v56  ;;  %v740_v56 = vld [vmem:[%s1760_s26 + $0xf8] sm:$0xff] }
  0xe4   : > { %782 = vmatpush.msrb.mxu0 %v740_v56 }
  0xe5   : > { %v590_v61 = vsub.f32 %v531_v57, %v589_v59  ;;  %v741_v57 = vld [vmem:[%s1760_s26 + $0x100] sm:$0xff]  ;;  %v738_v59 = vld [vmem:[%s1760_s26 + $0xe8] sm:$0xff] }
  0xe6   : > { %802 = vmatpush.msrb.mxu2 %v741_v57 }
  0xe7   : > { %v591_v62 = vadd.f32 %v590_v61, %v568_v60  ;;  %v733_v60 = vld [vmem:[%s1760_s26 + $0xc0] sm:$0xff]  ;;  %v734_v61 = vld [vmem:[%s1760_s26 + $0xc8] sm:$0xff] }
  0xe8   : > { %803 = vmatpush.msrb.mxu2 %v738_v59 }
  0xe9   : > { %v595_v63 = vsel %vm594_vm1, %v591_v62, 1e+30  ;;  %v735_v62 = vld [vmem:[%s1760_s26 + $0xd0] sm:$0xff] }
  0xea   : > { %v596_v0 = vsel %vm528_vm0, %v595_v63, inf  ;;  %804 = vmatpush.msrb.mxu2 %v735_v62 }
  0xeb   : > { %597 = vmin.xlane.f32.xlu0 %v596_v0  ;;  %v731_v0 = vld [vmem:[%s1760_s26 + $0xb0] sm:$0xff] }
 0x15e   : > { %v598_v1 = vpop.xlane.xlu0 %597 }
 0x15f   : > { %vm599_vm2 = vcmp.eq.f32.partialorder %v595_v63, %v598_v1  ;;  %v730_v63 = vld [vmem:[%s1760_s26 + $0xa8] sm:$0xff]  ;;  %v732_v1 = vld [vmem:[%s1760_s26 + $0xb8] sm:$0xff] }
 0x160   : > { %v600_v2 = vsel %vm599_vm2, %v593_v58, 128  ;;  %805 = vmatpush.msrb.mxu2 %v732_v1 }
 0x161   : > { %v601_v3 = vsel %vm528_vm0, %v600_v2, 2147483647  ;;  %v727_v2 = vld [vmem:[%s1760_s26 + $0x90] sm:$0xff] }
 0x162   : > { %v603_v4 = vshra.s32 %v601_v3, 16  ;;  %v602_v6 = vand.u32 65535, %v601_v3  ;;  %v728_v3 = vld [vmem:[%s1760_s26 + $0x98] sm:$0xff] }
 0x164   : > { %v605_v5 = vcvt.s32.f32 %v603_v4  ;;  %v604_v9 = vcvt.s32.f32 %v602_v6  ;;  %v729_v4 = vld [vmem:[%s1760_s26 + $0xa0] sm:$0xff] }
 0x165   : > { %v725_v6 = vld [vmem:[%s1760_s26 + $0x80] sm:$0xff]  ;;  %806 = vmatpush.msrb.mxu2 %v729_v4 }
 0x166   : > { %606 = vmin.xlane.f32.xlu1 %v605_v5 }
 0x1d9   : > { %v607_v7 = vpop.xlane.xlu1 %606 }
 0x1da   : > { %vm608_vm3 = vcmp.eq.f32.partialorder %v605_v5, %v607_v7  ;;  %v613_v22 = vcvt.f32.s32 %v607_v7  ;;  %v724_v5 = vld [vmem:[%s1760_s26 + $0x78] sm:$0xff]  ;;  %v726_v7 = vld [vmem:[%s1760_s26 + $0x88] sm:$0xff] }
 0x1db   : > { %v609_v10 = vsel %vm608_vm3, %v604_v9, inf  ;;  %807 = vmatpush.msrb.mxu2 %v726_v7  ;;  %v721_v9 = vld [vmem:[%s1760_s26 + $0x60] sm:$0xff] }
 0x1dc   : > { %610 = vmin.xlane.f32.xlu1 %v609_v10  ;;  %v614_v24 = vshll.u32 %v613_v22, 16  ;;  %v722_v10 = vld [vmem:[%s1760_s26 + $0x68] sm:$0xff]  ;;  %v709_v22 = vld [vmem:[%s1760_s26] sm:$0xff] }
 0x1dd   : > { %808 = vmatpush.msrb.mxu2 %v723_v11 }
 0x1df   : > { %809 = vmatpush.msrb.mxu2 %v720_v14 }
 0x1e1   : > { %810 = vmatpush.msrb.mxu2 %v717_v17 }
 0x1e3   : > { %811 = vmatpush.msrb.mxu2 %v714_v21 }
 0x24f   : > { %v611_v23 = vpop.xlane.xlu1 %610 }
 0x250   : > { %v612_v25 = vcvt.f32.s32 %v611_v23  ;;  %v710_v23 = vld [vmem:[%s1760_s26 + $0x8] sm:$0xff] }
 0x252   : > { %v615_v26 = vadd.s32 %v614_v24, %v612_v25  ;;  %v711_v24 = vld [vmem:[%s1760_s26 + $0x10] sm:$0xff] }
 0x253   : > { %812 = vmatpush.msrb.mxu2 %v711_v24 }
 0x254   : > { %vm616_vm4 = vcmp.eq.s32.totalorder %v593_v58, %v615_v26  ;;  %v737_v58 = vld [vmem:[%s1760_s26 + $0xe0] sm:$0xff] }
 0x255   : > { %1242 = vmatmul.msk.f32.vlgmr.msra.gmra.mxu1 %vm616_vm4, %v1506_v27  ;;  %783 = vmatpush.msrb.mxu0 %v737_v58 }
 0x257   : > { %784 = vmatpush.msrb.mxu0 %v734_v61 }
 0x259   : > { %785 = vmatpush.msrb.mxu0 %v731_v0 }
 0x25b   : > { %786 = vmatpush.msrb.mxu0 %v728_v3 }
 0x25d   : > { %787 = vmatpush.msrb.mxu0 %v725_v6 }
 0x25f   : > { %788 = vmatpush.msrb.mxu0 %v722_v10 }
 0x261   : > { %789 = vmatpush.msrb.mxu0 %v719_v13 }
 0x263   : > { %790 = vmatpush.msrb.mxu0 %v716_v16 }
 0x265   : > { %791 = vmatpush.msrb.mxu0 %v713_v20 }
 0x267   : > { %792 = vmatpush.msrb.mxu0 %v710_v23 }
 0x2d2   : > { %v636_v49 = vpop.f32.mrf.mxu1 }
 0x2d3   : > { %v639_v50 = vsub.f32 %v1719_v8, %v636_v49  ;;  %v667_v51 = vsel %vm666_vm5, %v636_v49, %v1719_v8  ;;  %v736_v8 = vld [vmem:[%s1760_s26 + $0xd8] sm:$0xff] }
 0x2d4   : > { %1341 = vtanh.f32 %v667_v51  ;;  %763 = vmatpush.msra.mxu3 %v736_v8 }
 0x2d5   : > { %v640_v52 = vmul.f32 %v639_v50, %v639_v50  ;;  %1343 = vrcp.f32 %v1507_v18 }
 0x2d6   : > { %764 = vmatpush.msra.mxu3 %v733_v60 }
 0x2d7   : > { %v641_v53 = vsel %vm528_vm0, %v640_v52, 0.0 }
 0x2d8   : > { %642 = vadd.xlane.f32.xlu2 %v641_v53  ;;  %765 = vmatpush.msra.mxu3 %v730_v63 }
 0x2da   : > { %v1342_v54 = vpop.eup %1341  ;;  %766 = vmatpush.msra.mxu3 %v727_v2 }
 0x2db   : > { %705 = vmatmul.f32.vlgmr.msra.gmra.mxu2 %v1342_v54  ;;  %v1344_v25 = vpop.eup %1343 }
 0x2dc   : > { %767 = vmatpush.msra.mxu3 %v724_v5  ;;  %v652_v26 = vmul.f32 64.0, %v1344_v25  ;;  %vm656_vm6 = vweird.f32 %v1344_v25 }
 0x2de   : > { %768 = vmatpush.msra.mxu3 %v721_v9  ;;  %v653_v27 = vsub.f32 1.0, %v652_v26 }
 0x2e0   : > { %769 = vmatpush.msra.mxu3 %v718_v12  ;;  %v654_v31 = vmul.f32 %v1344_v25, %v653_v27 }
 0x2e2   : > { %770 = vmatpush.msra.mxu3 %v715_v15  ;;  %v655_v34 = vadd.f32 %v1344_v25, %v654_v31 }
 0x2e4   : > { %771 = vmatpush.msra.mxu3 %v712_v19  ;;  %v657_v37 = vsel %vm656_vm6, %v1344_v25, %v655_v34 }
 0x2e6   : > { %772 = vmatpush.msra.mxu3 %v709_v22 }
 0x34b   : > { %v643_v28 = vpop.xlane.xlu2 %642 }
 0x34c   : > { %v644_v29 = vrot.slane %v643_v28, 4 }
 0x34e   : > { %v645_v30 = vadd.f32 %v644_v29, %v643_v28 }
 0x350   : > { %v646_v32 = vrot.slane %v645_v30, 2 }
 0x352   : > { %v647_v33 = vadd.f32 %v646_v32, %v645_v30 }
 0x354   : > { %v648_v35 = vrot.slane %v647_v33, 1 }
 0x356   : > { %v649_v36 = vadd.f32 %v648_v35, %v647_v33 }
 0x358   : > { %1259 = vpush %v649_v36 }
 0x359   : > { %1261 = vpush %v657_v37 }
 0x35e   : > { %v706_v39 = vpop.f32.mrf.mxu2 }
 0x35f   : > { %v707_v40 = vadd.f32 %v1340_v38, %v706_v39 }
 0x361   : > { %773 = vmatmul.f32.vlgmr.msra.gmra.mxu3 %v707_v40  ;;  %793 = vmatmul.f32.vlgmr.msrb.gmra.mxu0 %v707_v40 }
 0x362   : > { %813 = vmatmul.f32.vlgmr.msrb.gmra.mxu2 %v707_v40 }
 0x389   : > { %s1260_s24 = spop %1259 }
 0x38a   : > { %s1262_s23 = spop %1261 }
 0x38b   : > { %s659_s3 = smul.f32 %s1262_s23, %s1260_s24 }
 0x38d   : > { %s660_s14 = smul.f32 0.25, %s659_s3 }
 0x38f   : > { %v661_v41 = vstv %s660_s14 }
 0x390   : > { %662 = vst [vmem:[%s509_s25] sm:$0xff] %v661_v41 }
 0x3de   : > { %v794_v42 = vpop.f32.mrf.mxu0 }
 0x3df   : > { %v819_v43 = vrot.slane %v794_v42, 4 }
 0x3e4   : > { %v774_v44 = vpop.f32.mrf.mxu3 }
 0x3e5   : > { %v820_v45 = vsel %vm528_vm0, %v774_v44, %v819_v43  ;;  %v814_v46 = vpop.f32.mrf.mxu2 }
 0x3e6   : > { %822 = vst [vmem:[#allocation2] sm:$0xff] %v820_v45 }
 0x3e7   : > { %823 = vst [vmem:[#allocation2 + $0x8] sm:$0xf] %v814_v46 }
 0x3e8 LB: >> { %v901_v48 = vld [vmem:[%s1831_s22 + $0x168] sm:$0xff]  ;;  %v902_v49 = vld [vmem:[%s1831_s22 + $0x170] sm:$0xff]  ;;  %v899_v51 = vld [vmem:[%s1831_s22 + $0x158] sm:$0xff]  ;;  %s837_s2 = sshra.s32 %s1499_s27, 2  ;;  %s840_s21 = sand.u32 3, %s1499_s27  ;;  %s1499_s27 = sphi %s1835_s27, %s829_s27   ;;  %v1495_v47 = vphi %v1833_v47, %v1018_v47  }
 0x3e9   : >> { %v898_v50 = vld [vmem:[%s1831_s22 + $0x150] sm:$0xff]  ;;  %912 = vmatpush.msra.mxu0 %v901_v48  ;;  %932 = vmatpush.msra.mxu1 %v902_v49  ;;  %v895_v52 = vld [vmem:[%s1831_s22 + $0x138] sm:$0xff]  ;;  %v896_v53 = vld [vmem:[%s1831_s22 + $0x140] sm:$0xff]  ;;  %s1244_s26 = smul.u32 12, %s837_s2  ;;  %s1247_s30 = sshll.u32 %s1499_s27, 3 }
 0x3ea   : >> { %v892_v54 = vld [vmem:[%s1831_s22 + $0x120] sm:$0xff]  ;;  %v893_v55 = vld [vmem:[%s1831_s22 + $0x128] sm:$0xff]  ;;  %v890_v57 = vld [vmem:[%s1831_s22 + $0x110] sm:$0xff]  ;;  %s1252_s19 = smul.u32 24, %s1499_s27  ;;  %s1020_s24 = scalar_lea.vmem %s1709_s17, %s1247_s30 }
 0x3eb   : >> { %913 = vmatpush.msra.mxu0 %v898_v50  ;;  %933 = vmatpush.msra.mxu1 %v899_v51  ;;  %v889_v56 = vld [vmem:[%s1831_s22 + $0x108] sm:$0xff]  ;;  %v886_v8 = vld [vmem:[%s1831_s22 + $0xf0] sm:$0xff]  ;;  %v887_v58 = vld [vmem:[%s1831_s22 + $0xf8] sm:$0xff]  ;;  %s843_s15 = sadd.s32 %s1244_s26, %s840_s21  ;;  %s829_s27 = sadd.s32 1, %s1499_s27  }
 0x3ec   : >> { %v903_v59 = vld [vmem:[%s1831_s22 + $0x178] sm:$0xff]  ;;  %v900_v60 = vld [vmem:[%s1831_s22 + $0x160] sm:$0xff]  ;;  %v897_v63 = vld [vmem:[%s1831_s22 + $0x148] sm:$0xff]  ;;  %s844_s29 = scalar_lea.vmem [#allocation2], %s843_s15  ;;  %s1898_s12 = scalar_lea.vmem %s1690_s20, %s1252_s19 }
 0x3ed   : >> { %914 = vmatpush.msra.mxu0 %v895_v52  ;;  %934 = vmatpush.msra.mxu1 %v896_v53  ;;  %v883_v61 = vld [vmem:[%s1831_s22 + $0xd8] sm:$0xff]  ;;  %v884_v62 = vld [vmem:[%s1831_s22 + $0xe0] sm:$0xff]  ;;  %v881_v1 = vld [vmem:[%s1831_s22 + $0xc8] sm:$0xff]  ;;  %p826_p7 = scmp.ge.s32.totalorder %s829_s27, 4  }
 0x3ee   : >> { %952 = vmatpush.msra.mxu2 %v903_v59  ;;  %v880_v0 = vld [vmem:[%s1831_s22 + $0xc0] sm:$0xff]  ;;  %v894_v2 = vld [vmem:[%s1831_s22 + $0x130] sm:$0xff]  ;;  %v877_v3 = vld [vmem:[%s1831_s22 + $0xa8] sm:$0xff] }
 0x3ef   : >> { %915 = vmatpush.msra.mxu0 %v892_v54  ;;  %935 = vmatpush.msra.mxu1 %v893_v55  ;;  %v878_v4 = vld [vmem:[%s1831_s22 + $0xb0] sm:$0xff]  ;;  %v891_v5 = vld [vmem:[%s1831_s22 + $0x118] sm:$0xff]  ;;  %v888_v9 = vld [vmem:[%s1831_s22 + $0x100] sm:$0xff] }
 0x3f0   : >> { %953 = vmatpush.msra.mxu2 %v900_v60  ;;  %v874_v6 = vld [vmem:[%s1831_s22 + $0x90] sm:$0xff]  ;;  %v875_v7 = vld [vmem:[%s1831_s22 + $0x98] sm:$0xff]  ;;  %v872_v11 = vld [vmem:[%s1831_s22 + $0x80] sm:$0xff] }
 0x3f1   : >> { %916 = vmatpush.msra.mxu0 %v889_v56  ;;  %936 = vmatpush.msra.mxu1 %v890_v57  ;;  %v871_v10 = vld [vmem:[%s1831_s22 + $0x78] sm:$0xff]  ;;  %v885_v12 = vld [vmem:[%s1831_s22 + $0xe8] sm:$0xff]  ;;  %v868_v13 = vld [vmem:[%s1831_s22 + $0x60] sm:$0xff] }
 0x3f2   : >> { %954 = vmatpush.msra.mxu2 %v897_v63  ;;  %v869_v14 = vld [vmem:[%s1831_s22 + $0x68] sm:$0xff]  ;;  %v882_v15 = vld [vmem:[%s1831_s22 + $0xd0] sm:$0xff]  ;;  %v879_v18 = vld [vmem:[%s1831_s22 + $0xb8] sm:$0xff] }
 0x3f3   : >> { %917 = vmatpush.msra.mxu0 %v886_v8  ;;  %937 = vmatpush.msra.mxu1 %v887_v58  ;;  %v865_v16 = vld [vmem:[%s1831_s22 + $0x48] sm:$0xff]  ;;  %v866_v17 = vld [vmem:[%s1831_s22 + $0x50] sm:$0xff]  ;;  %v863_v20 = vld [vmem:[%s1831_s22 + $0x38] sm:$0xff] }
 0x3f4   : >> { %955 = vmatpush.msra.mxu2 %v894_v2  ;;  %v862_v19 = vld [vmem:[%s1831_s22 + $0x30] sm:$0xff]  ;;  %v876_v21 = vld [vmem:[%s1831_s22 + $0xa0] sm:$0xff]  ;;  %v859_v22 = vld [vmem:[%s1831_s22 + $0x18] sm:$0xff] }
 0x3f5   : >> { %918 = vmatpush.msra.mxu0 %v883_v61  ;;  %938 = vmatpush.msra.mxu1 %v884_v62  ;;  %v860_v23 = vld [vmem:[%s1831_s22 + $0x20] sm:$0xff]  ;;  %v873_v24 = vld [vmem:[%s1831_s22 + $0x88] sm:$0xff]  ;;  %v870_v27 = vld [vmem:[%s1831_s22 + $0x70] sm:$0xff] }
 0x3f6   : >> { %956 = vmatpush.msra.mxu2 %v891_v5  ;;  %v856_v25 = vld [vmem:[%s1831_s22] sm:$0xff]  ;;  %v857_v26 = vld [vmem:[%s1831_s22 + $0x8] sm:$0xff]  ;;  %v867_v28 = vld [vmem:[%s1831_s22 + $0x58] sm:$0xff] }
 0x3f7   : >> { %919 = vmatpush.msra.mxu0 %v880_v0  ;;  %939 = vmatpush.msra.mxu1 %v881_v1  ;;  %v864_v29 = vld [vmem:[%s1831_s22 + $0x40] sm:$0xff]  ;;  %v861_v30 = vld [vmem:[%s1831_s22 + $0x28] sm:$0xff]  ;;  %v858_v31 = vld [vmem:[%s1831_s22 + $0x10] sm:$0xff] }
 0x3f8   : >> { %957 = vmatpush.msra.mxu2 %v888_v9  ;;  %v845_v32 = vld [vmem:[%s844_s29] ss:$4 sm:$0x7] }
 0x3f9   : >> { %920 = vmatpush.msra.mxu0 %v877_v3  ;;  %940 = vmatpush.msra.mxu1 %v878_v4  ;;  %v904_v33 = vld [vmem:[%s1704_s28] sm:$0x7]  ;;  %v847_v34 = vperm.slane %v845_v32, 0  ;;  %v848_v35 = vperm.slane %v845_v32, 1  ;;  %v835_v37 = vld [vmem:[%s1898_s12 + $0x8] sm:$0xff]  ;;  %v849_v63 = vperm.slane %v845_v32, 2 }
 0x3fa   : >> { %958 = vmatpush.msra.mxu2 %v885_v12  ;;  %v834_v36 = vld [vmem:[%s1898_s12] sm:$0xff]  ;;  %v906_v38 = vperm.slane %v904_v33, 0  ;;  %v907_v39 = vperm.slane %v904_v33, 1  ;;  %v908_v58 = vperm.slane %v904_v33, 2  ;;  %v836_v3 = vld [vmem:[%s1898_s12 + $0x10] sm:$0xff] }
 0x3fb   : >> { %921 = vmatpush.msra.mxu0 %v874_v6  ;;  %941 = vmatpush.msra.mxu1 %v875_v7  ;;  %v853_v40 = vadd.f32 %v847_v34, %v834_v36  ;;  %v854_v41 = vadd.f32 %v848_v35, %v835_v37  ;;  %v855_v7 = vadd.f32 %v849_v63, %v836_v3 }
 0x3fc   : >> { %959 = vmatpush.msra.mxu2 %v882_v15 }
 0x3fd   : >> { %922 = vmatpush.msra.mxu0 %v871_v10  ;;  %942 = vmatpush.msra.mxu1 %v872_v11 }
 0x3fe   : >> { %960 = vmatpush.msra.mxu2 %v879_v18 }
 0x3ff   : >> { %923 = vmatpush.msra.mxu0 %v868_v13  ;;  %943 = vmatpush.msra.mxu1 %v869_v14 }
 0x400   : >> { %961 = vmatpush.msra.mxu2 %v876_v21 }
 0x401   : >> { %924 = vmatpush.msra.mxu0 %v865_v16  ;;  %944 = vmatpush.msra.mxu1 %v866_v17 }
 0x402   : >> { %962 = vmatpush.msra.mxu2 %v873_v24 }
 0x403   : >> { %925 = vmatpush.msra.mxu0 %v862_v19  ;;  %945 = vmatpush.msra.mxu1 %v863_v20 }
 0x404   : >> { %963 = vmatpush.msra.mxu2 %v870_v27 }
 0x405   : >> { %926 = vmatpush.msra.mxu0 %v859_v22  ;;  %946 = vmatpush.msra.mxu1 %v860_v23 }
 0x406   : >> { %964 = vmatpush.msra.mxu2 %v867_v28 }
 0x407   : >> { %927 = vmatpush.msra.mxu0 %v856_v25  ;;  %947 = vmatpush.msra.mxu1 %v857_v26 }
 0x408   : >> { %928 = vmatmul.f32.vlgmr.msra.gmra.mxu0 %v1495_v47  ;;  %948 = vmatmul.f32.vlgmr.msra.gmra.mxu1 %v1495_v47 }
 0x409   : >> { %965 = vmatpush.msra.mxu2 %v864_v29 }
 0x40b   : >> { %966 = vmatpush.msra.mxu2 %v861_v30 }
 0x40d   : >> { %967 = vmatpush.msra.mxu2 %v858_v31 }
 0x40e   : >> { %968 = vmatmul.f32.vlgmr.msra.gmra.mxu2 %v1495_v47 }
 0x485   : >> { %v929_v42 = vpop.f32.mrf.mxu0  ;;  %v949_v43 = vpop.f32.mrf.mxu1 }
 0x486   : >> { %v930_v44 = vadd.f32 %v929_v42, %v906_v38  ;;  %v950_v45 = vadd.f32 %v949_v43, %v907_v39 }
 0x488   : >> { %v972_v46 = vadd.f32 %v930_v44, %v853_v40  ;;  %v973_v48 = vadd.f32 %v950_v45, %v854_v41 }
 0x48a   : >> { %v1245_v49 = vmul.f32 -1.442695, %v972_v46  ;;  %v1246_v50 = vmul.f32 -1.442695, %v973_v48 }
 0x48c   : >> { %1345 = vpow2.f32 %v1245_v49 }
 0x48d   : >> { %1347 = vpow2.f32 %v1246_v50 }
 0x491   : >> { %v969_v61 = vpop.f32.mrf.mxu2 }
 0x492   : >> { %v1346_v51 = vpop.eup %1345  ;;  %v970_v4 = vadd.f32 %v969_v61, %v908_v58 }
 0x493   : >> { %v1348_v52 = vpop.eup %1347  ;;  %v980_v53 = vadd.f32 1.0, %v1346_v51 }
 0x494   : >> { %v981_v54 = vadd.f32 1.0, %v1348_v52 }
 0x495   : >> { %1349 = vrcp.f32 %v980_v53  ;;  %v993_v62 = vand.u32 2147483648, %v980_v53  ;;  %v991_v1 = vand.u32 2147483647, %v980_v53  ;;  %vm987_vm8 = vweird.f32 %v980_v53 }
 0x496   : >> { %1351 = vrcp.f32 %v981_v54  ;;  %vm1002_vm11 = vweird.f32 %v981_v54  ;;  %v1008_v12 = vand.u32 2147483648, %v981_v54  ;;  %v1006_v14 = vand.u32 2147483647, %v981_v54 }
 0x497   : >> { %v994_v6 = vor.u32 1.1754944e-38, %v993_v62  ;;  %vm992_vm10 = vcmp.eq.f32.partialorder %v991_v1, 8.507059e+37 }
 0x498   : >> { %v1009_v17 = vor.u32 1.1754944e-38, %v1008_v12  ;;  %vm1007_vm14 = vcmp.eq.f32.partialorder %v1006_v14, 8.507059e+37 }
 0x49b   : >> { %v1350_v55 = vpop.eup %1349 }
 0x49c   : >> { %v1352_v56 = vpop.eup %1351  ;;  %v983_v57 = vmul.f32 %v1350_v55, %v980_v53  ;;  %vm988_vm7 = vweird.f32 %v1350_v55 }
 0x49d   : >> { %v998_v8 = vmul.f32 %v1352_v56, %v981_v54  ;;  %vm989_vm9 = vmor %vm987_vm8, %vm988_vm7  ;;  %vm1003_vm12 = vweird.f32 %v1352_v56 }
 0x49e   : >> { %v984_v59 = vsub.f32 1.0, %v983_v57  ;;  %vm1004_vm13 = vmor %vm1002_vm11, %vm1003_vm12 }
 0x49f   : >> { %v999_v60 = vsub.f32 1.0, %v998_v8 }
 0x4a0   : >> { %v985_v0 = vmul.f32 %v1350_v55, %v984_v59 }
 0x4a1   : >> { %v1000_v2 = vmul.f32 %v1352_v56, %v999_v60 }
 0x4a2   : >> { %v986_v5 = vadd.f32 %v1350_v55, %v985_v0 }
 0x4a3   : >> { %v1001_v11 = vadd.f32 %v1352_v56, %v1000_v2 }
 0x4a4   : >> { %v990_v9 = vsel %vm989_vm9, %v1350_v55, %v986_v5 }
 0x4a5   : >> { %v995_v10 = vsel %vm992_vm10, %v994_v6, %v990_v9  ;;  %v1005_v16 = vsel %vm1004_vm13, %v1352_v56, %v1001_v11 }
 0x4a6   : >> { %v1012_v13 = vmul.f32 %v995_v10, %v970_v4  ;;  %v1010_v18 = vsel %vm1007_vm14, %v1009_v17, %v1005_v16 }
 0x4a7   : >> { %v1015_v19 = vsub.f32 1.0, %v1010_v18  ;;  %v1017_v22 = vmul.f32 %v1495_v47, %v1010_v18 }
 0x4a8   : >> { %v1013_v15 = vadd.f32 %v1012_v13, %v855_v7 }
 0x4aa   : >> { %1353 = vtanh.f32 %v1013_v15 }
 0x4b0   : >> { %v1354_v20 = vpop.eup %1353 }
 0x4b1   : >> { %v1016_v21 = vmul.f32 %v1354_v20, %v1015_v19  ;;  %828 = sbr.rel (!%p826_p7) target bundleno = 1000 (0x3e8), region = 145 }
 0x4b3   : >> { %v1018_v47 = vadd.f32 %v1017_v22, %v1016_v21  }
 0x4b5   : >> { %1021 = vst [vmem:[%s1020_s24] sm:$0xff] %v1018_v47 }
 0x4b6 PF: > { %s1945_s18 = sld [smem:[#allocation10_spill]]  ;;  %p21_p0 = scmp.ge.s32.totalorder %s1579_s13, 4  }
 0x4b7   : > { %s1946_s11 = sld [smem:[#allocation11_spill]]  ;;  %s1947_s30 = smov %s1483_s10 }
 0x4b8   : > { %s1949_s12 = smov %s1579_s13  ;;  %23 = sbr.rel (!%p21_p0) target bundleno = 7 (0x7), region = 156 }
 0x4bc   : > { %s1948_s10 = smov %s1945_s18 }
 0x4bd   :  { %1057 = vsyncpa [#allocation4], 1 }
 0x4be   :  { %1059 = vsyncpa [#allocation4 + $0x1], 1 }
 0x4bf   :  { %1060 = vsyncpa [#allocation6], 1 }
 0x4c0   :  { %1062 = vsyncpa [#allocation6 + $0x1], 1 }

</bundles_post_ra>
